<compile_context>
chip_gen: v7x
topology: tpu7x:2x2x1
jax: 0.10.0
libtpu: 0.0.40
codegen_flags: <defaults>
</compile_context>

<pallas_src>
import functools

import jax
import jax.numpy as jnp
import numpy as np
from jax.experimental import pallas as pl
from jax.experimental.pallas import tpu as pltpu

EPS = 1e-5
LANE = 128
BN_ROW_TILE = 512
VMEM_LIMIT_BYTES = 48 * 1024 * 1024   # explicit scoped-VMEM budget (< v7x 64 MiB)


def _round_up(v, m):
    return (v + m - 1) // m * m


def _nbytes(shape, dtype):
    return int(np.prod(shape)) * jnp.dtype(dtype).itemsize


# --------------------------- bn1 + relu kernel -------------------------------
# Only used for the projection-shortcut case (the bn1 activation feeds both
# conv1 and the 1x1 shortcut).  Emits bf16 so all downstream matmul DMA is
# halved; the BN/ReLU math itself is f32.

def _bn_relu_kernel(x_ref, s_ref, b_ref, o_ref):
    xf = x_ref[...].astype(jnp.float32)
    o_ref[...] = jnp.maximum(xf * s_ref[...] + b_ref[...], 0.0).astype(jnp.bfloat16)


def bn_relu_pallas(x2d, scale, bias):
    M, C = x2d.shape
    tm = min(BN_ROW_TILE, _round_up(M, 8))
    mp = _round_up(M, tm)
    if mp != M:
        x2d = jnp.pad(x2d, ((0, mp - M), (0, 0)))
    out = pl.pallas_call(
        _bn_relu_kernel,
        out_shape=jax.ShapeDtypeStruct((mp, C), jnp.bfloat16),
        grid=(mp // tm,),
        in_specs=[pl.BlockSpec((tm, C), lambda i: (i, 0)),
                  pl.BlockSpec((1, C), lambda i: (0, 0)),
                  pl.BlockSpec((1, C), lambda i: (0, 0))],
        out_specs=pl.BlockSpec((tm, C), lambda i: (i, 0)),
        compiler_params=pltpu.CompilerParams(
            dimension_semantics=("parallel",),
            vmem_limit_bytes=VMEM_LIMIT_BYTES),
    )(x2d.astype(jnp.bfloat16),
      scale.reshape(1, C).astype(jnp.float32),
      bias.reshape(1, C).astype(jnp.float32))
    return out[:M]


# -------------------- fused block kernel: identity shortcut ------------------

def _make_block_kernel_eq(H, W, C, out_dtype):
    M = H * W

    def kernel(x_ref, w1_ref, w2_ref, s1_ref, b1_ref, s2_ref, b2_ref,
               o_ref, apad_ref, opad_ref):
        # bn1 + relu prologue (f32 math); zero-pad into a VMEM scratch.
        xf = x_ref[0].astype(jnp.float32)                      # [H, W, C]
        a = jnp.maximum(xf * s1_ref[...] + b1_ref[...], 0.0)
        apad_ref[...] = jnp.zeros_like(apad_ref)
        apad_ref[1:H + 1, 1:W + 1, :] = a.astype(jnp.bfloat16)

        # conv1 (3x3, stride 1, pad 1): 9 shifted bf16 MXU matmuls, f32 accum.
        acc = jnp.zeros((M, C), jnp.float32)
        for kh in range(3):
            for kw in range(3):
                slab = apad_ref[kh:kh + H, kw:kw + W, :]
                acc = acc + jnp.dot(slab.reshape(M, C), w1_ref[kh * 3 + kw],
                                    preferred_element_type=jnp.float32)

        # bn2 + relu epilogue (f32); intermediate kept on-chip in bf16.
        out1 = jnp.maximum(acc * s2_ref[...] + b2_ref[...], 0.0)
        opad_ref[...] = jnp.zeros_like(opad_ref)
        opad_ref[1:H + 1, 1:W + 1, :] = out1.astype(jnp.bfloat16).reshape(H, W, C)

        # conv2 (3x3, stride 1, pad 1) + identity residual add (f32).
        acc2 = jnp.zeros((M, C), jnp.float32)
        for kh in range(3):
            for kw in range(3):
                slab = opad_ref[kh:kh + H, kw:kw + W, :]
                acc2 = acc2 + jnp.dot(slab.reshape(M, C), w2_ref[kh * 3 + kw],
                                      preferred_element_type=jnp.float32)
        y = acc2 + xf.reshape(M, C)
        o_ref[0] = y.reshape(H, W, C).astype(out_dtype)

    return kernel


def _conv_block_eq(x_p, w1, w2, s1, b1, s2, b2):
    N, H, W, C = x_p.shape
    kernel = _make_block_kernel_eq(H, W, C, jnp.float32)
    flops = 2 * N * H * W * C * C * 18
    bytes_accessed = (_nbytes(x_p.shape, jnp.bfloat16)
                      + _nbytes(w1.shape, jnp.bfloat16)
                      + _nbytes(w2.shape, jnp.bfloat16)
                      + _nbytes((N, H, W, C), jnp.float32))
    return pl.pallas_call(
        kernel,
        out_shape=jax.ShapeDtypeStruct((N, H, W, C), jnp.float32),
        grid=(N,),
        in_specs=[
            pl.BlockSpec((1, H, W, C), lambda n: (n, 0, 0, 0)),
            pl.BlockSpec((9, C, C), lambda n: (0, 0, 0)),
            pl.BlockSpec((9, C, C), lambda n: (0, 0, 0)),
            pl.BlockSpec((1, 1, C), lambda n: (0, 0, 0)),
            pl.BlockSpec((1, 1, C), lambda n: (0, 0, 0)),
            pl.BlockSpec((1, C), lambda n: (0, 0)),
            pl.BlockSpec((1, C), lambda n: (0, 0)),
        ],
        out_specs=pl.BlockSpec((1, H, W, C), lambda n: (n, 0, 0, 0)),
        scratch_shapes=[pltpu.VMEM((H + 2, W + 2, C), jnp.bfloat16),
                        pltpu.VMEM((H + 2, W + 2, C), jnp.bfloat16)],
        compiler_params=pltpu.CompilerParams(
            dimension_semantics=("parallel",),
            vmem_limit_bytes=VMEM_LIMIT_BYTES),
        cost_estimate=pl.CostEstimate(flops=flops, transcendentals=0,
                                      bytes_accessed=bytes_accessed),
    )(x_p, w1, w2, s1, b1, s2, b2)


# ------------------ fused block kernel: projection shortcut ------------------

def _make_block_kernel_proj(stride, Ho, Wo, Cin, Cout, out_dtype):
    n_phase = stride * stride
    M = Ho * Wo

    def kernel(*refs):
        ph_refs = refs[:n_phase]
        (asub_ref, w1_ref, w2_ref, ws_ref, s2_ref, b2_ref,
         o_ref, opad_ref) = refs[n_phase:]

        # conv1 (3x3, stride s, pad 1) over the pre-padded bn1+relu activation;
        # stride handled by the wrapper phase split, so every slice is static.
        acc = jnp.zeros((M, Cout), jnp.float32)
        for kh in range(3):
            for kw in range(3):
                p, dh = kh % stride, kh // stride
                q, dw = kw % stride, kw // stride
                slab = ph_refs[p * stride + q][0, dh:dh + Ho, dw:dw + Wo, :]
                acc = acc + jnp.dot(slab.reshape(M, Cin), w1_ref[kh * 3 + kw],
                                    preferred_element_type=jnp.float32)

        # bn2 + relu epilogue (f32); intermediate stays in VMEM as bf16.
        out1 = jnp.maximum(acc * s2_ref[...] + b2_ref[...], 0.0)
        opad_ref[...] = jnp.zeros_like(opad_ref)
        opad_ref[1:Ho + 1, 1:Wo + 1, :] = (
            out1.astype(jnp.bfloat16).reshape(Ho, Wo, Cout))

        # conv2 (3x3, stride 1, pad 1).
        acc2 = jnp.zeros((M, Cout), jnp.float32)
        for kh in range(3):
            for kw in range(3):
                slab = opad_ref[kh:kh + Ho, kw:kw + Wo, :]
                acc2 = acc2 + jnp.dot(slab.reshape(M, Cout), w2_ref[kh * 3 + kw],
                                      preferred_element_type=jnp.float32)

        # 1x1 strided shortcut conv fused in, then residual add (f32).
        res = jnp.dot(asub_ref[0].reshape(M, Cin), ws_ref[...],
                      preferred_element_type=jnp.float32)
        o_ref[0] = (acc2 + res).reshape(Ho, Wo, Cout).astype(out_dtype)

    return kernel


def _conv_block_proj(phases, a_sub, w1, w2, ws, s2, b2, stride):
    N, Ho, Wo, Cin = a_sub.shape
    Cout = w1.shape[-1]
    kernel = _make_block_kernel_proj(stride, Ho, Wo, Cin, Cout, jnp.float32)
    flops = 2 * N * Ho * Wo * (9 * Cin * Cout + 9 * Cout * Cout + Cin * Cout)
    bytes_accessed = (sum(_nbytes(p.shape, jnp.bfloat16) for p in phases)
                      + _nbytes(a_sub.shape, jnp.bfloat16)
                      + _nbytes(w1.shape, jnp.bfloat16)
                      + _nbytes(w2.shape, jnp.bfloat16)
                      + _nbytes(ws.shape, jnp.bfloat16)
                      + _nbytes((N, Ho, Wo, Cout), jnp.float32))
    in_specs = ([pl.BlockSpec((1,) + p.shape[1:], lambda n: (n, 0, 0, 0))
                 for p in phases]
                + [pl.BlockSpec((1, Ho, Wo, Cin), lambda n: (n, 0, 0, 0)),
                   pl.BlockSpec((9, Cin, Cout), lambda n: (0, 0, 0)),
                   pl.BlockSpec((9, Cout, Cout), lambda n: (0, 0, 0)),
                   pl.BlockSpec((Cin, Cout), lambda n: (0, 0)),
                   pl.BlockSpec((1, Cout), lambda n: (0, 0)),
                   pl.BlockSpec((1, Cout), lambda n: (0, 0))])
    return pl.pallas_call(
        kernel,
        out_shape=jax.ShapeDtypeStruct((N, Ho, Wo, Cout), jnp.float32),
        grid=(N,),
        in_specs=in_specs,
        out_specs=pl.BlockSpec((1, Ho, Wo, Cout), lambda n: (n, 0, 0, 0)),
        scratch_shapes=[pltpu.VMEM((Ho + 2, Wo + 2, Cout), jnp.bfloat16)],
        compiler_params=pltpu.CompilerParams(
            dimension_semantics=("parallel",),
            vmem_limit_bytes=VMEM_LIMIT_BYTES),
        cost_estimate=pl.CostEstimate(flops=flops, transcendentals=0,
                                      bytes_accessed=bytes_accessed),
    )(*phases, a_sub, w1, w2, ws, s2, b2)


# ---------------------------------- glue -------------------------------------

def _fold_bn(gamma, beta, mean, var):
    scale = gamma / jnp.sqrt(var + EPS)
    bias = beta - mean * scale
    return scale, bias


def _pad_vec(v, cp):
    return jnp.pad(v.astype(jnp.float32), (0, cp - v.shape[0]))


def _conv3x3_as_taps(w_oihw, cin_p, cout_p):
    """PyTorch [Cout, Cin, 3, 3] -> [9, Cin_p, Cout_p] bf16, tap index kh*3+kw."""
    co, ci, kh, kw = w_oihw.shape
    w = jnp.transpose(w_oihw, (2, 3, 1, 0)).reshape(kh * kw, ci, co)
    w = jnp.pad(w, ((0, 0), (0, cin_p - ci), (0, cout_p - co)))
    return w.astype(jnp.bfloat16)


@functools.partial(jax.jit, static_argnames=("stride", "equal_in_out"))
def basic_block_pallas(x_nchw, params, stride, equal_in_out):
    if equal_in_out and stride != 1:
        raise ValueError("identity shortcut requires stride == 1")

    x = jnp.transpose(x_nchw, (0, 2, 3, 1)).astype(jnp.float32)   # NCHW -> NHWC
    N, H, W, Cin = x.shape
    Cout = params["conv1"].shape[0]
    Cin_p = _round_up(Cin, LANE)
    Cout_p = _round_up(Cout, LANE)

    s1, b1 = _fold_bn(*params["bn1"])
    s2, b2 = _fold_bn(*params["bn2"])
    s1, b1 = _pad_vec(s1, Cin_p), _pad_vec(b1, Cin_p)
    s2, b2 = _pad_vec(s2, Cout_p), _pad_vec(b2, Cout_p)

    w1 = _conv3x3_as_taps(params["conv1"], Cin_p, Cout_p)
    w2 = _conv3x3_as_taps(params["conv2"], Cout_p, Cout_p)

    # Lane-dense channel padding; all matmul operands travel as bf16.
    xp = jnp.pad(x, ((0, 0), (0, 0), (0, 0), (0, Cin_p - Cin)))
    xp_bf16 = xp.astype(jnp.bfloat16)

    if equal_in_out:
        y = _conv_block_eq(xp_bf16, w1, w2,
                           s1.reshape(1, 1, Cin_p), b1.reshape(1, 1, Cin_p),
                           s2.reshape(1, Cout_p), b2.reshape(1, Cout_p))
    else:
        a = bn_relu_pallas(xp_bf16.reshape(-1, Cin_p), s1, b1)
        a = a.reshape(N, H, W, Cin_p)
        a_pad = jnp.pad(a, ((0, 0), (1, 1), (1, 1), (0, 0)))
        phases = [a_pad[:, p::stride, q::stride, :]
                  for p in range(stride) for q in range(stride)]
        a_sub = a[:, ::stride, ::stride, :]                        # 1x1 stride-s
        ws = jnp.transpose(params["convs"][:, :, 0, 0])            # [Cin, Cout]
        ws = jnp.pad(ws, ((0, Cin_p - Cin),
                          (0, Cout_p - Cout))).astype(jnp.bfloat16)
        y = _conv_block_proj(phases, a_sub, w1, w2, ws,
                             s2.reshape(1, Cout_p), b2.reshape(1, Cout_p),
                             stride)

    y = y[:, :, :, :Cout]
    return jnp.transpose(y, (0, 3, 1, 2))                          # NHWC -> NCHW


# ---------------------------- pure-JAX reference -----------------------------

def basic_block_reference(x_nchw, params, stride, equal_in_out):
    x = jnp.transpose(x_nchw, (0, 2, 3, 1)).astype(jnp.float32)

    def bn_relu(t, bn):
        g, b, m, v = bn
        return jnp.maximum((t - m) * (g / jnp.sqrt(v + EPS)) + b, 0.0)

    def conv(t, w, s, pad):
        return jax.lax.conv_general_dilated(
            t, jnp.transpose(w, (2, 3, 1, 0)),
            window_strides=(s, s), padding=((pad, pad), (pad, pad)),
            dimension_numbers=("NHWC", "HWIO", "NHWC"))

    a = bn_relu(x, params["bn1"])
    out = bn_relu(conv(a, params["conv1"], stride, 1), params["bn2"])
    out = conv(out, params["conv2"], 1, 1)
    sc = x if equal_in_out else conv(a, params["convs"], stride, 0)
    return jnp.transpose(sc + out, (0, 3, 1, 2))


# --------------------------------- params ------------------------------------

def make_params(key, cin, cout):
    ks = jax.random.split(key, 12)
    p = {
        "bn1": (jax.random.uniform(ks[0], (cin,), minval=0.5, maxval=1.5),
                jax.random.normal(ks[1], (cin,)) * 0.1,
                jax.random.normal(ks[2], (cin,)) * 0.1,
                jax.random.uniform(ks[3], (cin,), minval=0.5, maxval=1.5)),
        "conv1": jax.random.normal(ks[4], (cout, cin, 3, 3)) * 0.1,
        "bn2": (jax.random.uniform(ks[5], (cout,), minval=0.5, maxval=1.5),
                jax.random.normal(ks[6], (cout,)) * 0.1,
                jax.random.normal(ks[7], (cout,)) * 0.1,
                jax.random.uniform(ks[8], (cout,), minval=0.5, maxval=1.5)),
        "conv2": jax.random.normal(ks[9], (cout, cout, 3, 3)) * 0.1,
    }
    if cin != cout:
        p["convs"] = jax.random.normal(ks[10], (cout, cin, 1, 1)) * 0.1
    return jax.tree_util.tree_map(lambda t: t.astype(jnp.float32), p)


# ---------------------------------- main --------------------------------------

if __name__ == "__main__":
    key = jax.random.PRNGKey(0)
    k1, k2, kx1, kx2 = jax.random.split(key, 4)

    # Case 1: in_planes != out_planes, stride 2 (projection shortcut path).
    x1 = jax.random.normal(kx1, (2, 4, 16, 16), dtype=jnp.float32)
    p1 = make_params(k1, cin=4, cout=8)
    y1 = jax.block_until_ready(
        basic_block_pallas(x1, p1, stride=2, equal_in_out=False))
    r1 = basic_block_reference(x1, p1, 2, False)
    np.testing.assert_allclose(np.asarray(y1), np.asarray(r1),
                               rtol=5e-2, atol=5e-2)

    # Case 2: in_planes == out_planes, stride 1 (identity shortcut).
    x2 = jax.random.normal(kx2, (2, 8, 16, 16), dtype=jnp.float32)
    p2 = make_params(k2, cin=8, cout=8)
    y2 = jax.block_until_ready(
        basic_block_pallas(x2, p2, stride=1, equal_in_out=True))
    r2 = basic_block_reference(x2, p2, 1, True)
    np.testing.assert_allclose(np.asarray(y2), np.asarray(r2),
                               rtol=5e-2, atol=5e-2)

    print("KERNEL_OK")
</pallas_src>

<mosaic_0001>
module attributes {stable_mosaic.version = 11 : i64} {
  func.func @_bn_relu_kernel(%arg0: i32, %arg1: memref<512x128xbf16, #tpu.memory_space<vmem>>, %arg2: memref<1x128xf32, #tpu.memory_space<vmem>>, %arg3: memref<1x128xf32, #tpu.memory_space<vmem>>, %arg4: memref<512x128xbf16, #tpu.memory_space<vmem>>) attributes {dimension_semantics = [#tpu.dimension_semantics<parallel>], iteration_bounds = array<i64: 1>, scalar_prefetch = 0 : i64, scratch_operands = 0 : i64, tpu.core_type = #tpu.core_type<tc>, window_params = [{transform_indices = @transform_0, window_bounds = array<i64: 512, 128>}, {pipeline_mode = #tpu.pipeline_mode<synchronous>, transform_indices = @transform_1, window_bounds = array<i64: 1, 128>}, {pipeline_mode = #tpu.pipeline_mode<synchronous>, transform_indices = @transform_2, window_bounds = array<i64: 1, 128>}, {transform_indices = @transform_3, window_bounds = array<i64: 512, 128>}]} {
    %c0 = arith.constant 0 : index
    %c0_0 = arith.constant 0 : index
    %0 = vector.load %arg1[%c0, %c0_0] : memref<512x128xbf16, #tpu.memory_space<vmem>>, vector<512x128xbf16>
    %1 = arith.extf %0 : vector<512x128xbf16> to vector<512x128xf32>
    %c0_1 = arith.constant 0 : index
    %c0_2 = arith.constant 0 : index
    %2 = vector.load %arg2[%c0_1, %c0_2] : memref<1x128xf32, #tpu.memory_space<vmem>>, vector<1x128xf32>
    %3 = vector.broadcast %2 : vector<1x128xf32> to vector<512x128xf32>
    %4 = arith.mulf %1, %3 : vector<512x128xf32>
    %c0_3 = arith.constant 0 : index
    %c0_4 = arith.constant 0 : index
    %5 = vector.load %arg3[%c0_3, %c0_4] : memref<1x128xf32, #tpu.memory_space<vmem>>, vector<1x128xf32>
    %6 = vector.broadcast %5 : vector<1x128xf32> to vector<512x128xf32>
    %7 = arith.addf %4, %6 : vector<512x128xf32>
    %cst = arith.constant 0.000000e+00 : f32
    %8 = vector.broadcast %cst : f32 to vector<512x128xf32>
    %9 = arith.maximumf %7, %8 : vector<512x128xf32>
    %10 = arith.truncf %9 : vector<512x128xf32> to vector<512x128xbf16>
    %c0_5 = arith.constant 0 : index
    %c0_6 = arith.constant 0 : index
    %11 = vector.load %arg4[%c0_5, %c0_6] : memref<512x128xbf16, #tpu.memory_space<vmem>>, vector<512x128xbf16>
    tpu.vector_store %arg4[%c0_5, %c0_6], %10 {strides = array<i32>} : memref<512x128xbf16, #tpu.memory_space<vmem>>, vector<512x128xbf16>,
    return
  }
  func.func @transform_0(%arg0: i32) -> (i32, i32) {
    %c0_i32 = arith.constant 0 : i32
    %c0_i32_0 = arith.constant 0 : i32
    return %arg0, %c0_i32 : i32, i32
  }
  func.func @transform_1(%arg0: i32) -> (i32, i32) {
    %c0_i32 = arith.constant 0 : i32
    %c0_i32_0 = arith.constant 0 : i32
    %c0_i32_1 = arith.constant 0 : i32
    return %c0_i32, %c0_i32_0 : i32, i32
  }
  func.func @transform_2(%arg0: i32) -> (i32, i32) {
    %c0_i32 = arith.constant 0 : i32
    %c0_i32_0 = arith.constant 0 : i32
    %c0_i32_1 = arith.constant 0 : i32
    return %c0_i32, %c0_i32_0 : i32, i32
  }
  func.func @transform_3(%arg0: i32) -> (i32, i32) {
    %c0_i32 = arith.constant 0 : i32
    %c0_i32_0 = arith.constant 0 : i32
    return %arg0, %c0_i32 : i32, i32
  }
}

module attributes {stable_mosaic.version = 11 : i64} {
  func.func @kernel(%arg0: i32, %arg1: memref<1x9x9x128xbf16, #tpu.memory_space<vmem>>, %arg2: memref<1x9x9x128xbf16, #tpu.memory_space<vmem>>, %arg3: memref<1x9x9x128xbf16, #tpu.memory_space<vmem>>, %arg4: memref<1x9x9x128xbf16, #tpu.memory_space<vmem>>, %arg5: memref<1x8x8x128xbf16, #tpu.memory_space<vmem>>, %arg6: memref<9x128x128xbf16, #tpu.memory_space<vmem>>, %arg7: memref<9x128x128xbf16, #tpu.memory_space<vmem>>, %arg8: memref<128x128xbf16, #tpu.memory_space<vmem>>, %arg9: memref<1x128xf32, #tpu.memory_space<vmem>>, %arg10: memref<1x128xf32, #tpu.memory_space<vmem>>, %arg11: memref<1x8x8x128xf32, #tpu.memory_space<vmem>>, %arg12: memref<10x10x128xbf16, #tpu.memory_space<vmem>>) attributes {dimension_semantics = [#tpu.dimension_semantics<parallel>], iteration_bounds = array<i64: 2>, scalar_prefetch = 0 : i64, scratch_operands = 1 : i64, tpu.core_type = #tpu.core_type<tc>, window_params = [{transform_indices = @transform_0, window_bounds = array<i64: 1, 9, 9, 128>}, {transform_indices = @transform_1, window_bounds = array<i64: 1, 9, 9, 128>}, {transform_indices = @transform_2, window_bounds = array<i64: 1, 9, 9, 128>}, {transform_indices = @transform_3, window_bounds = array<i64: 1, 9, 9, 128>}, {transform_indices = @transform_4, window_bounds = array<i64: 1, 8, 8, 128>}, {pipeline_mode = #tpu.pipeline_mode<synchronous>, transform_indices = @transform_5, window_bounds = array<i64: 9, 128, 128>}, {pipeline_mode = #tpu.pipeline_mode<synchronous>, transform_indices = @transform_6, window_bounds = array<i64: 9, 128, 128>}, {pipeline_mode = #tpu.pipeline_mode<synchronous>, transform_indices = @transform_7, window_bounds = array<i64: 128, 128>}, {pipeline_mode = #tpu.pipeline_mode<synchronous>, transform_indices = @transform_8, window_bounds = array<i64: 1, 128>}, {pipeline_mode = #tpu.pipeline_mode<synchronous>, transform_indices = @transform_9, window_bounds = array<i64: 1, 128>}, {transform_indices = @transform_10, window_bounds = array<i64: 1, 8, 8, 128>}]} {
    %cst = arith.constant 0.000000e+00 : f32
    %0 = vector.broadcast %cst : f32 to vector<64x128xf32>
    %c0 = arith.constant 0 : index
    %c0_0 = arith.constant 0 : index
    %c0_1 = arith.constant 0 : index
    %c0_2 = arith.constant 0 : index
    %1 = vector.load %arg1[%c0, %c0_0, %c0_1, %c0_2] : memref<1x9x9x128xbf16, #tpu.memory_space<vmem>>, vector<1x8x8x128xbf16>
    %2 = vector.shape_cast %1 : vector<1x8x8x128xbf16> to vector<8x8x128xbf16>
    %3 = vector.shape_cast %2 : vector<8x8x128xbf16> to vector<64x128xbf16>
    %c0_3 = arith.constant 0 : index
    %c0_4 = arith.constant 0 : index
    %c0_5 = arith.constant 0 : index
    %4 = vector.load %arg6[%c0_3, %c0_4, %c0_5] : memref<9x128x128xbf16, #tpu.memory_space<vmem>>, vector<1x128x128xbf16>
    %5 = vector.shape_cast %4 : vector<1x128x128xbf16> to vector<128x128xbf16>
    %cst_6 = arith.constant dense<0.000000e+00> : vector<64x128xf32>
    %6 = tpu.matmul %3, %5, %cst_6 {dimension_numbers = #tpu.dot_dimension_numbers<[1], [0], [0], [1], [0, 0, 1, 1], [], []>} : vector<64x128xbf16>, vector<128x128xbf16>, vector<64x128xf32> -> vector<64x128xf32>
    %7 = arith.addf %0, %6 : vector<64x128xf32>
    %c0_7 = arith.constant 0 : index
    %c0_8 = arith.constant 0 : index
    %c0_9 = arith.constant 0 : index
    %c0_10 = arith.constant 0 : index
    %8 = vector.load %arg2[%c0_7, %c0_8, %c0_9, %c0_10] : memref<1x9x9x128xbf16, #tpu.memory_space<vmem>>, vector<1x8x8x128xbf16>
    %9 = vector.shape_cast %8 : vector<1x8x8x128xbf16> to vector<8x8x128xbf16>
    %10 = vector.shape_cast %9 : vector<8x8x128xbf16> to vector<64x128xbf16>
    %c1 = arith.constant 1 : index
    %c0_11 = arith.constant 0 : index
    %c0_12 = arith.constant 0 : index
    %11 = vector.load %arg6[%c1, %c0_11, %c0_12] : memref<9x128x128xbf16, #tpu.memory_space<vmem>>, vector<1x128x128xbf16>
    %12 = vector.shape_cast %11 : vector<1x128x128xbf16> to vector<128x128xbf16>
    %cst_13 = arith.constant dense<0.000000e+00> : vector<64x128xf32>
    %13 = tpu.matmul %10, %12, %cst_13 {dimension_numbers = #tpu.dot_dimension_numbers<[1], [0], [0], [1], [0, 0, 1, 1], [], []>} : vector<64x128xbf16>, vector<128x128xbf16>, vector<64x128xf32> -> vector<64x128xf32>
    %14 = arith.addf %7, %13 : vector<64x128xf32>
    %c0_14 = arith.constant 0 : index
    %c0_15 = arith.constant 0 : index
    %c1_16 = arith.constant 1 : index
    %c0_17 = arith.constant 0 : index
    %15 = vector.load %arg1[%c0_14, %c0_15, %c1_16, %c0_17] : memref<1x9x9x128xbf16, #tpu.memory_space<vmem>>, vector<1x8x8x128xbf16>
    %16 = vector.shape_cast %15 : vector<1x8x8x128xbf16> to vector<8x8x128xbf16>
    %17 = vector.shape_cast %16 : vector<8x8x128xbf16> to vector<64x128xbf16>
    %c2 = arith.constant 2 : index
    %c0_18 = arith.constant 0 : index
    %c0_19 = arith.constant 0 : index
    %18 = vector.load %arg6[%c2, %c0_18, %c0_19] : memref<9x128x128xbf16, #tpu.memory_space<vmem>>, vector<1x128x128xbf16>
    %19 = vector.shape_cast %18 : vector<1x128x128xbf16> to vector<128x128xbf16>
    %cst_20 = arith.constant dense<0.000000e+00> : vector<64x128xf32>
    %20 = tpu.matmul %17, %19, %cst_20 {dimension_numbers = #tpu.dot_dimension_numbers<[1], [0], [0], [1], [0, 0, 1, 1], [], []>} : vector<64x128xbf16>, vector<128x128xbf16>, vector<64x128xf32> -> vector<64x128xf32>
    %21 = arith.addf %14, %20 : vector<64x128xf32>
    %c0_21 = arith.constant 0 : index
    %c0_22 = arith.constant 0 : index
    %c0_23 = arith.constant 0 : index
    %c0_24 = arith.constant 0 : index
    %22 = vector.load %arg3[%c0_21, %c0_22, %c0_23, %c0_24] : memref<1x9x9x128xbf16, #tpu.memory_space<vmem>>, vector<1x8x8x128xbf16>
    %23 = vector.shape_cast %22 : vector<1x8x8x128xbf16> to vector<8x8x128xbf16>
    %24 = vector.shape_cast %23 : vector<8x8x128xbf16> to vector<64x128xbf16>
    %c3 = arith.constant 3 : index
    %c0_25 = arith.constant 0 : index
    %c0_26 = arith.constant 0 : index
    %25 = vector.load %arg6[%c3, %c0_25, %c0_26] : memref<9x128x128xbf16, #tpu.memory_space<vmem>>, vector<1x128x128xbf16>
    %26 = vector.shape_cast %25 : vector<1x128x128xbf16> to vector<128x128xbf16>
    %cst_27 = arith.constant dense<0.000000e+00> : vector<64x128xf32>
    %27 = tpu.matmul %24, %26, %cst_27 {dimension_numbers = #tpu.dot_dimension_numbers<[1], [0], [0], [1], [0, 0, 1, 1], [], []>} : vector<64x128xbf16>, vector<128x128xbf16>, vector<64x128xf32> -> vector<64x128xf32>
    %28 = arith.addf %21, %27 : vector<64x128xf32>
    %c0_28 = arith.constant 0 : index
    %c0_29 = arith.constant 0 : index
    %c0_30 = arith.constant 0 : index
    %c0_31 = arith.constant 0 : index
    %29 = vector.load %arg4[%c0_28, %c0_29, %c0_30, %c0_31] : memref<1x9x9x128xbf16, #tpu.memory_space<vmem>>, vector<1x8x8x128xbf16>
    %30 = vector.shape_cast %29 : vector<1x8x8x128xbf16> to vector<8x8x128xbf16>
    %31 = vector.shape_cast %30 : vector<8x8x128xbf16> to vector<64x128xbf16>
    %c4 = arith.constant 4 : index
    %c0_32 = arith.constant 0 : index
    %c0_33 = arith.constant 0 : index
    %32 = vector.load %arg6[%c4, %c0_32, %c0_33] : memref<9x128x128xbf16, #tpu.memory_space<vmem>>, vector<1x128x128xbf16>
    %33 = vector.shape_cast %32 : vector<1x128x128xbf16> to vector<128x128xbf16>
    %cst_34 = arith.constant dense<0.000000e+00> : vector<64x128xf32>
    %34 = tpu.matmul %31, %33, %cst_34 {dimension_numbers = #tpu.dot_dimension_numbers<[1], [0], [0], [1], [0, 0, 1, 1], [], []>} : vector<64x128xbf16>, vector<128x128xbf16>, vector<64x128xf32> -> vector<64x128xf32>
    %35 = arith.addf %28, %34 : vector<64x128xf32>
    %c0_35 = arith.constant 0 : index
    %c0_36 = arith.constant 0 : index
    %c1_37 = arith.constant 1 : index
    %c0_38 = arith.constant 0 : index
    %36 = vector.load %arg3[%c0_35, %c0_36, %c1_37, %c0_38] : memref<1x9x9x128xbf16, #tpu.memory_space<vmem>>, vector<1x8x8x128xbf16>
    %37 = vector.shape_cast %36 : vector<1x8x8x128xbf16> to vector<8x8x128xbf16>
    %38 = vector.shape_cast %37 : vector<8x8x128xbf16> to vector<64x128xbf16>
    %c5 = arith.constant 5 : index
    %c0_39 = arith.constant 0 : index
    %c0_40 = arith.constant 0 : index
    %39 = vector.load %arg6[%c5, %c0_39, %c0_40] : memref<9x128x128xbf16, #tpu.memory_space<vmem>>, vector<1x128x128xbf16>
    %40 = vector.shape_cast %39 : vector<1x128x128xbf16> to vector<128x128xbf16>
    %cst_41 = arith.constant dense<0.000000e+00> : vector<64x128xf32>
    %41 = tpu.matmul %38, %40, %cst_41 {dimension_numbers = #tpu.dot_dimension_numbers<[1], [0], [0], [1], [0, 0, 1, 1], [], []>} : vector<64x128xbf16>, vector<128x128xbf16>, vector<64x128xf32> -> vector<64x128xf32>
    %42 = arith.addf %35, %41 : vector<64x128xf32>
    %c0_42 = arith.constant 0 : index
    %c1_43 = arith.constant 1 : index
    %c0_44 = arith.constant 0 : index
    %c0_45 = arith.constant 0 : index
    %43 = vector.load %arg1[%c0_42, %c1_43, %c0_44, %c0_45] : memref<1x9x9x128xbf16, #tpu.memory_space<vmem>>, vector<1x8x8x128xbf16>
    %44 = vector.shape_cast %43 : vector<1x8x8x128xbf16> to vector<8x8x128xbf16>
    %45 = vector.shape_cast %44 : vector<8x8x128xbf16> to vector<64x128xbf16>
    %c6 = arith.constant 6 : index
    %c0_46 = arith.constant 0 : index
    %c0_47 = arith.constant 0 : index
    %46 = vector.load %arg6[%c6, %c0_46, %c0_47] : memref<9x128x128xbf16, #tpu.memory_space<vmem>>, vector<1x128x128xbf16>
    %47 = vector.shape_cast %46 : vector<1x128x128xbf16> to vector<128x128xbf16>
    %cst_48 = arith.constant dense<0.000000e+00> : vector<64x128xf32>
    %48 = tpu.matmul %45, %47, %cst_48 {dimension_numbers = #tpu.dot_dimension_numbers<[1], [0], [0], [1], [0, 0, 1, 1], [], []>} : vector<64x128xbf16>, vector<128x128xbf16>, vector<64x128xf32> -> vector<64x128xf32>
    %49 = arith.addf %42, %48 : vector<64x128xf32>
    %c0_49 = arith.constant 0 : index
    %c1_50 = arith.constant 1 : index
    %c0_51 = arith.constant 0 : index
    %c0_52 = arith.constant 0 : index
    %50 = vector.load %arg2[%c0_49, %c1_50, %c0_51, %c0_52] : memref<1x9x9x128xbf16, #tpu.memory_space<vmem>>, vector<1x8x8x128xbf16>
    %51 = vector.shape_cast %50 : vector<1x8x8x128xbf16> to vector<8x8x128xbf16>
    %52 = vector.shape_cast %51 : vector<8x8x128xbf16> to vector<64x128xbf16>
    %c7 = arith.constant 7 : index
    %c0_53 = arith.constant 0 : index
    %c0_54 = arith.constant 0 : index
    %53 = vector.load %arg6[%c7, %c0_53, %c0_54] : memref<9x128x128xbf16, #tpu.memory_space<vmem>>, vector<1x128x128xbf16>
    %54 = vector.shape_cast %53 : vector<1x128x128xbf16> to vector<128x128xbf16>
    %cst_55 = arith.constant dense<0.000000e+00> : vector<64x128xf32>
    %55 = tpu.matmul %52, %54, %cst_55 {dimension_numbers = #tpu.dot_dimension_numbers<[1], [0], [0], [1], [0, 0, 1, 1], [], []>} : vector<64x128xbf16>, vector<128x128xbf16>, vector<64x128xf32> -> vector<64x128xf32>
    %56 = arith.addf %49, %55 : vector<64x128xf32>
    %c0_56 = arith.constant 0 : index
    %c1_57 = arith.constant 1 : index
    %c1_58 = arith.constant 1 : index
    %c0_59 = arith.constant 0 : index
    %57 = vector.load %arg1[%c0_56, %c1_57, %c1_58, %c0_59] : memref<1x9x9x128xbf16, #tpu.memory_space<vmem>>, vector<1x8x8x128xbf16>
    %58 = vector.shape_cast %57 : vector<1x8x8x128xbf16> to vector<8x8x128xbf16>
    %59 = vector.shape_cast %58 : vector<8x8x128xbf16> to vector<64x128xbf16>
    %c8 = arith.constant 8 : index
    %c0_60 = arith.constant 0 : index
    %c0_61 = arith.constant 0 : index
    %60 = vector.load %arg6[%c8, %c0_60, %c0_61] : memref<9x128x128xbf16, #tpu.memory_space<vmem>>, vector<1x128x128xbf16>
    %61 = vector.shape_cast %60 : vector<1x128x128xbf16> to vector<128x128xbf16>
    %cst_62 = arith.constant dense<0.000000e+00> : vector<64x128xf32>
    %62 = tpu.matmul %59, %61, %cst_62 {dimension_numbers = #tpu.dot_dimension_numbers<[1], [0], [0], [1], [0, 0, 1, 1], [], []>} : vector<64x128xbf16>, vector<128x128xbf16>, vector<64x128xf32> -> vector<64x128xf32>
    %63 = arith.addf %56, %62 : vector<64x128xf32>
    %c0_63 = arith.constant 0 : index
    %c0_64 = arith.constant 0 : index
    %64 = vector.load %arg9[%c0_63, %c0_64] : memref<1x128xf32, #tpu.memory_space<vmem>>, vector<1x128xf32>
    %65 = vector.broadcast %64 : vector<1x128xf32> to vector<64x128xf32>
    %66 = arith.mulf %63, %65 : vector<64x128xf32>
    %c0_65 = arith.constant 0 : index
    %c0_66 = arith.constant 0 : index
    %67 = vector.load %arg10[%c0_65, %c0_66] : memref<1x128xf32, #tpu.memory_space<vmem>>, vector<1x128xf32>
    %68 = vector.broadcast %67 : vector<1x128xf32> to vector<64x128xf32>
    %69 = arith.addf %66, %68 : vector<64x128xf32>
    %cst_67 = arith.constant 0.000000e+00 : f32
    %70 = vector.broadcast %cst_67 : f32 to vector<64x128xf32>
    %71 = arith.maximumf %69, %70 : vector<64x128xf32>
    %cst_68 = arith.constant 0.000000e+00 : bf16
    %72 = vector.broadcast %cst_68 : bf16 to vector<10x10x128xbf16>
    %c0_69 = arith.constant 0 : index
    %c0_70 = arith.constant 0 : index
    %c0_71 = arith.constant 0 : index
    %73 = vector.load %arg12[%c0_69, %c0_70, %c0_71] : memref<10x10x128xbf16, #tpu.memory_space<vmem>>, vector<10x10x128xbf16>
    tpu.vector_store %arg12[%c0_69, %c0_70, %c0_71], %72 {strides = array<i32>} : memref<10x10x128xbf16, #tpu.memory_space<vmem>>, vector<10x10x128xbf16>,
    %74 = arith.truncf %71 : vector<64x128xf32> to vector<64x128xbf16>
    %75 = vector.shape_cast %74 : vector<64x128xbf16> to vector<8x8x128xbf16>
    %c1_72 = arith.constant 1 : index
    %c1_73 = arith.constant 1 : index
    %c0_74 = arith.constant 0 : index
    %76 = vector.load %arg12[%c1_72, %c1_73, %c0_74] : memref<10x10x128xbf16, #tpu.memory_space<vmem>>, vector<8x8x128xbf16>
    tpu.vector_store %arg12[%c1_72, %c1_73, %c0_74], %75 {strides = array<i32>} : memref<10x10x128xbf16, #tpu.memory_space<vmem>>, vector<8x8x128xbf16>,
    %cst_75 = arith.constant 0.000000e+00 : f32
    %77 = vector.broadcast %cst_75 : f32 to vector<64x128xf32>
    %c0_76 = arith.constant 0 : index
    %c0_77 = arith.constant 0 : index
    %c0_78 = arith.constant 0 : index
    %78 = vector.load %arg12[%c0_76, %c0_77, %c0_78] : memref<10x10x128xbf16, #tpu.memory_space<vmem>>, vector<8x8x128xbf16>
    %79 = vector.shape_cast %78 : vector<8x8x128xbf16> to vector<64x128xbf16>
    %c0_79 = arith.constant 0 : index
    %c0_80 = arith.constant 0 : index
    %c0_81 = arith.constant 0 : index
    %80 = vector.load %arg7[%c0_79, %c0_80, %c0_81] : memref<9x128x128xbf16, #tpu.memory_space<vmem>>, vector<1x128x128xbf16>
    %81 = vector.shape_cast %80 : vector<1x128x128xbf16> to vector<128x128xbf16>
    %cst_82 = arith.constant dense<0.000000e+00> : vector<64x128xf32>
    %82 = tpu.matmul %79, %81, %cst_82 {dimension_numbers = #tpu.dot_dimension_numbers<[1], [0], [0], [1], [0, 0, 1, 1], [], []>} : vector<64x128xbf16>, vector<128x128xbf16>, vector<64x128xf32> -> vector<64x128xf32>
    %83 = arith.addf %77, %82 : vector<64x128xf32>
    %c0_83 = arith.constant 0 : index
    %c1_84 = arith.constant 1 : index
    %c0_85 = arith.constant 0 : index
    %84 = vector.load %arg12[%c0_83, %c1_84, %c0_85] : memref<10x10x128xbf16, #tpu.memory_space<vmem>>, vector<8x8x128xbf16>
    %85 = vector.shape_cast %84 : vector<8x8x128xbf16> to vector<64x128xbf16>
    %c1_86 = arith.constant 1 : index
    %c0_87 = arith.constant 0 : index
    %c0_88 = arith.constant 0 : index
    %86 = vector.load %arg7[%c1_86, %c0_87, %c0_88] : memref<9x128x128xbf16, #tpu.memory_space<vmem>>, vector<1x128x128xbf16>
    %87 = vector.shape_cast %86 : vector<1x128x128xbf16> to vector<128x128xbf16>
    %cst_89 = arith.constant dense<0.000000e+00> : vector<64x128xf32>
    %88 = tpu.matmul %85, %87, %cst_89 {dimension_numbers = #tpu.dot_dimension_numbers<[1], [0], [0], [1], [0, 0, 1, 1], [], []>} : vector<64x128xbf16>, vector<128x128xbf16>, vector<64x128xf32> -> vector<64x128xf32>
    %89 = arith.addf %83, %88 : vector<64x128xf32>
    %c0_90 = arith.constant 0 : index
    %c2_91 = arith.constant 2 : index
    %c0_92 = arith.constant 0 : index
    %90 = vector.load %arg12[%c0_90, %c2_91, %c0_92] : memref<10x10x128xbf16, #tpu.memory_space<vmem>>, vector<8x8x128xbf16>
    %91 = vector.shape_cast %90 : vector<8x8x128xbf16> to vector<64x128xbf16>
    %c2_93 = arith.constant 2 : index
    %c0_94 = arith.constant 0 : index
    %c0_95 = arith.constant 0 : index
    %92 = vector.load %arg7[%c2_93, %c0_94, %c0_95] : memref<9x128x128xbf16, #tpu.memory_space<vmem>>, vector<1x128x128xbf16>
    %93 = vector.shape_cast %92 : vector<1x128x128xbf16> to vector<128x128xbf16>
    %cst_96 = arith.constant dense<0.000000e+00> : vector<64x128xf32>
    %94 = tpu.matmul %91, %93, %cst_96 {dimension_numbers = #tpu.dot_dimension_numbers<[1], [0], [0], [1], [0, 0, 1, 1], [], []>} : vector<64x128xbf16>, vector<128x128xbf16>, vector<64x128xf32> -> vector<64x128xf32>
    %95 = arith.addf %89, %94 : vector<64x128xf32>
    %c1_97 = arith.constant 1 : index
    %c0_98 = arith.constant 0 : index
    %c0_99 = arith.constant 0 : index
    %96 = vector.load %arg12[%c1_97, %c0_98, %c0_99] : memref<10x10x128xbf16, #tpu.memory_space<vmem>>, vector<8x8x128xbf16>
    %97 = vector.shape_cast %96 : vector<8x8x128xbf16> to vector<64x128xbf16>
    %c3_100 = arith.constant 3 : index
    %c0_101 = arith.constant 0 : index
    %c0_102 = arith.constant 0 : index
    %98 = vector.load %arg7[%c3_100, %c0_101, %c0_102] : memref<9x128x128xbf16, #tpu.memory_space<vmem>>, vector<1x128x128xbf16>
    %99 = vector.shape_cast %98 : vector<1x128x128xbf16> to vector<128x128xbf16>
    %cst_103 = arith.constant dense<0.000000e+00> : vector<64x128xf32>
    %100 = tpu.matmul %97, %99, %cst_103 {dimension_numbers = #tpu.dot_dimension_numbers<[1], [0], [0], [1], [0, 0, 1, 1], [], []>} : vector<64x128xbf16>, vector<128x128xbf16>, vector<64x128xf32> -> vector<64x128xf32>
    %101 = arith.addf %95, %100 : vector<64x128xf32>
    %c1_104 = arith.constant 1 : index
    %c1_105 = arith.constant 1 : index
    %c0_106 = arith.constant 0 : index
    %102 = vector.load %arg12[%c1_104, %c1_105, %c0_106] : memref<10x10x128xbf16, #tpu.memory_space<vmem>>, vector<8x8x128xbf16>
    %103 = vector.shape_cast %102 : vector<8x8x128xbf16> to vector<64x128xbf16>
    %c4_107 = arith.constant 4 : index
    %c0_108 = arith.constant 0 : index
    %c0_109 = arith.constant 0 : index
    %104 = vector.load %arg7[%c4_107, %c0_108, %c0_109] : memref<9x128x128xbf16, #tpu.memory_space<vmem>>, vector<1x128x128xbf16>
    %105 = vector.shape_cast %104 : vector<1x128x128xbf16> to vector<128x128xbf16>
    %cst_110 = arith.constant dense<0.000000e+00> : vector<64x128xf32>
    %106 = tpu.matmul %103, %105, %cst_110 {dimension_numbers = #tpu.dot_dimension_numbers<[1], [0], [0], [1], [0, 0, 1, 1], [], []>} : vector<64x128xbf16>, vector<128x128xbf16>, vector<64x128xf32> -> vector<64x128xf32>
    %107 = arith.addf %101, %106 : vector<64x128xf32>
    %c1_111 = arith.constant 1 : index
    %c2_112 = arith.constant 2 : index
    %c0_113 = arith.constant 0 : index
    %108 = vector.load %arg12[%c1_111, %c2_112, %c0_113] : memref<10x10x128xbf16, #tpu.memory_space<vmem>>, vector<8x8x128xbf16>
    %109 = vector.shape_cast %108 : vector<8x8x128xbf16> to vector<64x128xbf16>
    %c5_114 = arith.constant 5 : index
    %c0_115 = arith.constant 0 : index
    %c0_116 = arith.constant 0 : index
    %110 = vector.load %arg7[%c5_114, %c0_115, %c0_116] : memref<9x128x128xbf16, #tpu.memory_space<vmem>>, vector<1x128x128xbf16>
    %111 = vector.shape_cast %110 : vector<1x128x128xbf16> to vector<128x128xbf16>
    %cst_117 = arith.constant dense<0.000000e+00> : vector<64x128xf32>
    %112 = tpu.matmul %109, %111, %cst_117 {dimension_numbers = #tpu.dot_dimension_numbers<[1], [0], [0], [1], [0, 0, 1, 1], [], []>} : vector<64x128xbf16>, vector<128x128xbf16>, vector<64x128xf32> -> vector<64x128xf32>
    %113 = arith.addf %107, %112 : vector<64x128xf32>
    %c2_118 = arith.constant 2 : index
    %c0_119 = arith.constant 0 : index
    %c0_120 = arith.constant 0 : index
    %114 = vector.load %arg12[%c2_118, %c0_119, %c0_120] : memref<10x10x128xbf16, #tpu.memory_space<vmem>>, vector<8x8x128xbf16>
    %115 = vector.shape_cast %114 : vector<8x8x128xbf16> to vector<64x128xbf16>
    %c6_121 = arith.constant 6 : index
    %c0_122 = arith.constant 0 : index
    %c0_123 = arith.constant 0 : index
    %116 = vector.load %arg7[%c6_121, %c0_122, %c0_123] : memref<9x128x128xbf16, #tpu.memory_space<vmem>>, vector<1x128x128xbf16>
    %117 = vector.shape_cast %116 : vector<1x128x128xbf16> to vector<128x128xbf16>
    %cst_124 = arith.constant dense<0.000000e+00> : vector<64x128xf32>
    %118 = tpu.matmul %115, %117, %cst_124 {dimension_numbers = #tpu.dot_dimension_numbers<[1], [0], [0], [1], [0, 0, 1, 1], [], []>} : vector<64x128xbf16>, vector<128x128xbf16>, vector<64x128xf32> -> vector<64x128xf32>
    %119 = arith.addf %113, %118 : vector<64x128xf32>
    %c2_125 = arith.constant 2 : index
    %c1_126 = arith.constant 1 : index
    %c0_127 = arith.constant 0 : index
    %120 = vector.load %arg12[%c2_125, %c1_126, %c0_127] : memref<10x10x128xbf16, #tpu.memory_space<vmem>>, vector<8x8x128xbf16>
    %121 = vector.shape_cast %120 : vector<8x8x128xbf16> to vector<64x128xbf16>
    %c7_128 = arith.constant 7 : index
    %c0_129 = arith.constant 0 : index
    %c0_130 = arith.constant 0 : index
    %122 = vector.load %arg7[%c7_128, %c0_129, %c0_130] : memref<9x128x128xbf16, #tpu.memory_space<vmem>>, vector<1x128x128xbf16>
    %123 = vector.shape_cast %122 : vector<1x128x128xbf16> to vector<128x128xbf16>
    %cst_131 = arith.constant dense<0.000000e+00> : vector<64x128xf32>
    %124 = tpu.matmul %121, %123, %cst_131 {dimension_numbers = #tpu.dot_dimension_numbers<[1], [0], [0], [1], [0, 0, 1, 1], [], []>} : vector<64x128xbf16>, vector<128x128xbf16>, vector<64x128xf32> -> vector<64x128xf32>
    %125 = arith.addf %119, %124 : vector<64x128xf32>
    %c2_132 = arith.constant 2 : index
    %c2_133 = arith.constant 2 : index
    %c0_134 = arith.constant 0 : index
    %126 = vector.load %arg12[%c2_132, %c2_133, %c0_134] : memref<10x10x128xbf16, #tpu.memory_space<vmem>>, vector<8x8x128xbf16>
    %127 = vector.shape_cast %126 : vector<8x8x128xbf16> to vector<64x128xbf16>
    %c8_135 = arith.constant 8 : index
    %c0_136 = arith.constant 0 : index
    %c0_137 = arith.constant 0 : index
    %128 = vector.load %arg7[%c8_135, %c0_136, %c0_137] : memref<9x128x128xbf16, #tpu.memory_space<vmem>>, vector<1x128x128xbf16>
    %129 = vector.shape_cast %128 : vector<1x128x128xbf16> to vector<128x128xbf16>
    %cst_138 = arith.constant dense<0.000000e+00> : vector<64x128xf32>
    %130 = tpu.matmul %127, %129, %cst_138 {dimension_numbers = #tpu.dot_dimension_numbers<[1], [0], [0], [1], [0, 0, 1, 1], [], []>} : vector<64x128xbf16>, vector<128x128xbf16>, vector<64x128xf32> -> vector<64x128xf32>
    %131 = arith.addf %125, %130 : vector<64x128xf32>
    %c0_139 = arith.constant 0 : index
    %c0_140 = arith.constant 0 : index
    %c0_141 = arith.constant 0 : index
    %c0_142 = arith.constant 0 : index
    %132 = vector.load %arg5[%c0_139, %c0_140, %c0_141, %c0_142] : memref<1x8x8x128xbf16, #tpu.memory_space<vmem>>, vector<1x8x8x128xbf16>
    %133 = vector.shape_cast %132 : vector<1x8x8x128xbf16> to vector<8x8x128xbf16>
    %134 = vector.shape_cast %133 : vector<8x8x128xbf16> to vector<64x128xbf16>
    %c0_143 = arith.constant 0 : index
    %c0_144 = arith.constant 0 : index
    %135 = vector.load %arg8[%c0_143, %c0_144] : memref<128x128xbf16, #tpu.memory_space<vmem>>, vector<128x128xbf16>
    %cst_145 = arith.constant dense<0.000000e+00> : vector<64x128xf32>
    %136 = tpu.matmul %134, %135, %cst_145 {dimension_numbers = #tpu.dot_dimension_numbers<[1], [0], [0], [1], [0, 0, 1, 1], [], []>} : vector<64x128xbf16>, vector<128x128xbf16>, vector<64x128xf32> -> vector<64x128xf32>
    %137 = arith.addf %131, %136 : vector<64x128xf32>
    %138 = vector.shape_cast %137 : vector<64x128xf32> to vector<8x8x128xf32>
    %c0_146 = arith.constant 0 : index
    %c0_147 = arith.constant 0 : index
    %c0_148 = arith.constant 0 : index
    %c0_149 = arith.constant 0 : index
    %139 = vector.load %arg11[%c0_146, %c0_147, %c0_148, %c0_149] : memref<1x8x8x128xf32, #tpu.memory_space<vmem>>, vector<1x8x8x128xf32>
    %140 = vector.shape_cast %139 : vector<1x8x8x128xf32> to vector<8x8x128xf32>
    %141 = vector.shape_cast %138 : vector<8x8x128xf32> to vector<1x8x8x128xf32>
    tpu.vector_store %arg11[%c0_146, %c0_147, %c0_148, %c0_149], %141 {strides = array<i32>} : memref<1x8x8x128xf32, #tpu.memory_space<vmem>>, vector<1x8x8x128xf32>,
    return
  }
  func.func @transform_0(%arg0: i32) -> (i32, i32, i32, i32) {
    %c0_i32 = arith.constant 0 : i32
    %c0_i32_0 = arith.constant 0 : i32
    %c0_i32_1 = arith.constant 0 : i32
    %c0_i32_2 = arith.constant 0 : i32
    return %arg0, %c0_i32, %c0_i32_0, %c0_i32_1 : i32, i32, i32, i32
  }
  func.func @transform_1(%arg0: i32) -> (i32, i32, i32, i32) {
    %c0_i32 = arith.constant 0 : i32
    %c0_i32_0 = arith.constant 0 : i32
    %c0_i32_1 = arith.constant 0 : i32
    %c0_i32_2 = arith.constant 0 : i32
    return %arg0, %c0_i32, %c0_i32_0, %c0_i32_1 : i32, i32, i32, i32
  }
  func.func @transform_2(%arg0: i32) -> (i32, i32, i32, i32) {
    %c0_i32 = arith.constant 0 : i32
    %c0_i32_0 = arith.constant 0 : i32
    %c0_i32_1 = arith.constant 0 : i32
    %c0_i32_2 = arith.constant 0 : i32
    return %arg0, %c0_i32, %c0_i32_0, %c0_i32_1 : i32, i32, i32, i32
  }
  func.func @transform_3(%arg0: i32) -> (i32, i32, i32, i32) {
    %c0_i32 = arith.constant 0 : i32
    %c0_i32_0 = arith.constant 0 : i32
    %c0_i32_1 = arith.constant 0 : i32
    %c0_i32_2 = arith.constant 0 : i32
    return %arg0, %c0_i32, %c0_i32_0, %c0_i32_1 : i32, i32, i32, i32
  }
  func.func @transform_4(%arg0: i32) -> (i32, i32, i32, i32) {
    %c0_i32 = arith.constant 0 : i32
    %c0_i32_0 = arith.constant 0 : i32
    %c0_i32_1 = arith.constant 0 : i32
    %c0_i32_2 = arith.constant 0 : i32
    return %arg0, %c0_i32, %c0_i32_0, %c0_i32_1 : i32, i32, i32, i32
  }
  func.func @transform_5(%arg0: i32) -> (i32, i32, i32) {
    %c0_i32 = arith.constant 0 : i32
    %c0_i32_0 = arith.constant 0 : i32
    %c0_i32_1 = arith.constant 0 : i32
    %c0_i32_2 = arith.constant 0 : i32
    return %c0_i32, %c0_i32_0, %c0_i32_1 : i32, i32, i32
  }
  func.func @transform_6(%arg0: i32) -> (i32, i32, i32) {
    %c0_i32 = arith.constant 0 : i32
    %c0_i32_0 = arith.constant 0 : i32
    %c0_i32_1 = arith.constant 0 : i32
    %c0_i32_2 = arith.constant 0 : i32
    return %c0_i32, %c0_i32_0, %c0_i32_1 : i32, i32, i32
  }
  func.func @transform_7(%arg0: i32) -> (i32, i32) {
    %c0_i32 = arith.constant 0 : i32
    %c0_i32_0 = arith.constant 0 : i32
    %c0_i32_1 = arith.constant 0 : i32
    return %c0_i32, %c0_i32_0 : i32, i32
  }
  func.func @transform_8(%arg0: i32) -> (i32, i32) {
    %c0_i32 = arith.constant 0 : i32
    %c0_i32_0 = arith.constant 0 : i32
    %c0_i32_1 = arith.constant 0 : i32
    return %c0_i32, %c0_i32_0 : i32, i32
  }
  func.func @transform_9(%arg0: i32) -> (i32, i32) {
    %c0_i32 = arith.constant 0 : i32
    %c0_i32_0 = arith.constant 0 : i32
    %c0_i32_1 = arith.constant 0 : i32
    return %c0_i32, %c0_i32_0 : i32, i32
  }
  func.func @transform_10(%arg0: i32) -> (i32, i32, i32, i32) {
    %c0_i32 = arith.constant 0 : i32
    %c0_i32_0 = arith.constant 0 : i32
    %c0_i32_1 = arith.constant 0 : i32
    %c0_i32_2 = arith.constant 0 : i32
    return %arg0, %c0_i32, %c0_i32_0, %c0_i32_1 : i32, i32, i32, i32
  }
}

</mosaic_0001>

<bundles_post_ra>
// kernel: basic_block_pallas.2
= control target key start
LH: loop header
LB: loop body
LE: loop exit
PB: predicated region body
PF: predicated region fallthrough
CT: control target
= control target key end

     0   :  { %s1502_s0 = inlined_call_operand.vmem [shape: bf16[512,128], index: 0, kind: input, shape index: {}]   ;;  %s1503_s1 = inlined_call_operand.vmem [shape: f32[1,128], index: 1, kind: input, shape index: {}]   ;;  %s1504_s2 = inlined_call_operand.vmem [shape: f32[1,128], index: 2, kind: input, shape index: {}]   ;;  %s1505_s3 = inlined_call_operand.vmem [shape: bf16[512,128], index: 3, kind: output, shape index: {}]  }
   0x1   :  { %v803_v0 = vld [vmem:[%s1502_s0] sm:$0xff]   ;;  %v1090_v4 = vld [vmem:[%s1502_s0 + $0x8] sm:$0xff]   ;;  %v1091_v5 = vld [vmem:[%s1502_s0 + $0x10] sm:$0xff]  }
   0x2   :  { %v1178_v1 = vld [vmem:[%s1503_s1] ss:$0 sm:$0xff]  ;;  %v804_v2 = vunpack.c.l.bf16 %v803_v0  ;;  %v805_v3 = vunpack.c.h.bf16 %v803_v0  ;;  %v1092_v6 = vld [vmem:[%s1502_s0 + $0x18] sm:$0xff]   ;;  %v808_v8 = vunpack.c.l.bf16 %v1090_v4  ;;  %v809_v9 = vunpack.c.h.bf16 %v1090_v4  ;;  %v1094_v33 = vld [vmem:[%s1502_s0 + $0x28] sm:$0xff]  }
   0x3   :  { %v1192_v7 = vld [vmem:[%s1504_s2] ss:$0 sm:$0xff]  ;;  %v812_v10 = vunpack.c.l.bf16 %v1091_v5  ;;  %v813_v11 = vunpack.c.h.bf16 %v1091_v5  ;;  %v816_v14 = vunpack.c.l.bf16 %v1092_v6  ;;  %v817_v15 = vunpack.c.h.bf16 %v1092_v6  ;;  %v1095_v38 = vld [vmem:[%s1502_s0 + $0x30] sm:$0xff]   ;;  %v1096_v43 = vld [vmem:[%s1502_s0 + $0x38] sm:$0xff]  }
   0x4   :  { %v149_v12 = vmul.f32 %v804_v2, %v1178_v1  ;;  %v150_v13 = vmul.f32 %v805_v3, %v1178_v1  ;;  %v151_v16 = vmul.f32 %v808_v8, %v1178_v1  ;;  %v152_v17 = vmul.f32 %v809_v9, %v1178_v1  ;;  %v1093_v28 = vld [vmem:[%s1502_s0 + $0x20] sm:$0xff]  }
   0x5   :  { %v153_v18 = vmul.f32 %v812_v10, %v1178_v1  ;;  %v154_v19 = vmul.f32 %v813_v11, %v1178_v1  ;;  %v155_v22 = vmul.f32 %v816_v14, %v1178_v1  ;;  %v156_v23 = vmul.f32 %v817_v15, %v1178_v1  ;;  %v1097_v0 = vld [vmem:[%s1502_s0 + $0x40] sm:$0xff]   ;;  %v1098_v11 = vld [vmem:[%s1502_s0 + $0x48] sm:$0xff]  }
   0x6   :  { %v220_v20 = vadd.f32 %v1192_v7, %v149_v12  ;;  %v221_v21 = vadd.f32 %v1192_v7, %v150_v13  ;;  %v222_v24 = vadd.f32 %v1192_v7, %v151_v16  ;;  %v223_v25 = vadd.f32 %v1192_v7, %v152_v17  ;;  %v1099_v16 = vld [vmem:[%s1502_s0 + $0x50] sm:$0xff]  }
   0x7   :  { %v224_v26 = vadd.f32 %v1192_v7, %v153_v18  ;;  %v225_v27 = vadd.f32 %v1192_v7, %v154_v19  ;;  %v226_v31 = vadd.f32 %v1192_v7, %v155_v22  ;;  %v227_v32 = vadd.f32 %v1192_v7, %v156_v23 }
   0x8   :  { %v284_v29 = vmax.f32 %v220_v20, 0.0  ;;  %v285_v30 = vmax.f32 %v221_v21, 0.0  ;;  %v286_v34 = vmax.f32 %v222_v24, 0.0  ;;  %v287_v35 = vmax.f32 %v223_v25, 0.0  ;;  %v1100_v25 = vld [vmem:[%s1502_s0 + $0x58] sm:$0xff]  }
   0x9   :  { %v288_v36 = vmax.f32 %v224_v26, 0.0  ;;  %v289_v37 = vmax.f32 %v225_v27, 0.0  ;;  %v290_v40 = vmax.f32 %v226_v31, 0.0  ;;  %v291_v41 = vmax.f32 %v227_v32, 0.0 }
   0xa   :  { %v933_v39 = vpack.c.bf16 %v285_v30, %v284_v29  ;;  %v820_v42 = vunpack.c.l.bf16 %v1093_v28  ;;  %v938_v44 = vpack.c.bf16 %v287_v35, %v286_v34  ;;  %v821_v46 = vunpack.c.h.bf16 %v1093_v28 }
   0xb   :  { %v943_v45 = vpack.c.bf16 %v289_v37, %v288_v36  ;;  %v824_v47 = vunpack.c.l.bf16 %v1094_v33  ;;  %v948_v48 = vpack.c.bf16 %v291_v41, %v290_v40  ;;  %v825_v50 = vunpack.c.h.bf16 %v1094_v33 }
   0xc   :  { %934 = vst [vmem:[%s1505_s3] sm:$0xff] %v933_v39   ;;  %v157_v49 = vmul.f32 %v820_v42, %v1178_v1  ;;  %v828_v51 = vunpack.c.l.bf16 %v1095_v38  ;;  %1121 = vst [vmem:[%s1505_s3 + $0x8] sm:$0xff] %v938_v44   ;;  %v158_v52 = vmul.f32 %v821_v46, %v1178_v1  ;;  %v829_v54 = vunpack.c.h.bf16 %v1095_v38  ;;  %v1101_v38 = vld [vmem:[%s1502_s0 + $0x60] sm:$0xff]  }
   0xd   :  { %1122 = vst [vmem:[%s1505_s3 + $0x10] sm:$0xff] %v943_v45   ;;  %v159_v53 = vmul.f32 %v824_v47, %v1178_v1  ;;  %v832_v55 = vunpack.c.l.bf16 %v1096_v43  ;;  %1123 = vst [vmem:[%s1505_s3 + $0x18] sm:$0xff] %v948_v48   ;;  %v160_v57 = vmul.f32 %v825_v50, %v1178_v1  ;;  %v833_v59 = vunpack.c.h.bf16 %v1096_v43 }
   0xe   :  { %v228_v56 = vadd.f32 %v1192_v7, %v157_v49  ;;  %v161_v58 = vmul.f32 %v828_v51, %v1178_v1  ;;  %v229_v60 = vadd.f32 %v1192_v7, %v158_v52  ;;  %v162_v62 = vmul.f32 %v829_v54, %v1178_v1  ;;  %v1102_v51 = vld [vmem:[%s1502_s0 + $0x68] sm:$0xff]  }
   0xf   :  { %v230_v61 = vadd.f32 %v1192_v7, %v159_v53  ;;  %v163_v63 = vmul.f32 %v832_v55, %v1178_v1  ;;  %v231_v3 = vadd.f32 %v1192_v7, %v160_v57  ;;  %v164_v5 = vmul.f32 %v833_v59, %v1178_v1 }
  0x10   :  { %v292_v2 = vmax.f32 %v228_v56, 0.0  ;;  %v232_v4 = vadd.f32 %v1192_v7, %v161_v58  ;;  %v293_v6 = vmax.f32 %v229_v60, 0.0  ;;  %v233_v9 = vadd.f32 %v1192_v7, %v162_v62  ;;  %v1103_v60 = vld [vmem:[%s1502_s0 + $0x70] sm:$0xff]  }
  0x11   :  { %v294_v8 = vmax.f32 %v230_v61, 0.0  ;;  %v234_v10 = vadd.f32 %v1192_v7, %v163_v63  ;;  %v295_v12 = vmax.f32 %v231_v3, 0.0  ;;  %v235_v14 = vadd.f32 %v1192_v7, %v164_v5 }
  0x12   :  { %v296_v13 = vmax.f32 %v232_v4, 0.0  ;;  %v836_v15 = vunpack.c.l.bf16 %v1097_v0  ;;  %v953_v17 = vpack.c.bf16 %v293_v6, %v292_v2  ;;  %v297_v18 = vmax.f32 %v233_v9, 0.0  ;;  %v1104_v2 = vld [vmem:[%s1502_s0 + $0x78] sm:$0xff]  }
  0x13   :  { %v298_v19 = vmax.f32 %v234_v10, 0.0  ;;  %v837_v20 = vunpack.c.h.bf16 %v1097_v0  ;;  %v958_v21 = vpack.c.bf16 %v295_v12, %v294_v8  ;;  %v299_v22 = vmax.f32 %v235_v14, 0.0  ;;  %v1105_v12 = vld [vmem:[%s1502_s0 + $0x80] sm:$0xff]  }
  0x14   :  { %v165_v23 = vmul.f32 %v836_v15, %v1178_v1  ;;  %v840_v24 = vunpack.c.l.bf16 %v1098_v11  ;;  %1124 = vst [vmem:[%s1505_s3 + $0x20] sm:$0xff] %v953_v17   ;;  %v963_v26 = vpack.c.bf16 %v297_v18, %v296_v13  ;;  %v841_v28 = vunpack.c.h.bf16 %v1098_v11 }
  0x15   :  { %v166_v27 = vmul.f32 %v837_v20, %v1178_v1  ;;  %v844_v29 = vunpack.c.l.bf16 %v1099_v16  ;;  %1125 = vst [vmem:[%s1505_s3 + $0x28] sm:$0xff] %v958_v21   ;;  %v968_v30 = vpack.c.bf16 %v299_v22, %v298_v19  ;;  %v845_v33 = vunpack.c.h.bf16 %v1099_v16 }
  0x16   :  { %v236_v31 = vadd.f32 %v1192_v7, %v165_v23  ;;  %v167_v32 = vmul.f32 %v840_v24, %v1178_v1  ;;  %1126 = vst [vmem:[%s1505_s3 + $0x30] sm:$0xff] %v963_v26   ;;  %v168_v35 = vmul.f32 %v841_v28, %v1178_v1  ;;  %v848_v37 = vunpack.c.l.bf16 %v1100_v25 }
  0x17   :  { %v237_v34 = vadd.f32 %v1192_v7, %v166_v27  ;;  %v169_v36 = vmul.f32 %v844_v29, %v1178_v1  ;;  %1127 = vst [vmem:[%s1505_s3 + $0x38] sm:$0xff] %v968_v30   ;;  %v170_v41 = vmul.f32 %v845_v33, %v1178_v1  ;;  %v849_v42 = vunpack.c.h.bf16 %v1100_v25  ;;  %v1106_v29 = vld [vmem:[%s1502_s0 + $0x88] sm:$0xff]  }
  0x18   :  { %v300_v39 = vmax.f32 %v236_v31, 0.0  ;;  %v238_v40 = vadd.f32 %v1192_v7, %v167_v32  ;;  %v239_v44 = vadd.f32 %v1192_v7, %v168_v35  ;;  %v171_v46 = vmul.f32 %v848_v37, %v1178_v1 }
  0x19   :  { %v301_v43 = vmax.f32 %v237_v34, 0.0  ;;  %v240_v45 = vadd.f32 %v1192_v7, %v169_v36  ;;  %v241_v48 = vadd.f32 %v1192_v7, %v170_v41  ;;  %v172_v49 = vmul.f32 %v849_v42, %v1178_v1  ;;  %v1107_v34 = vld [vmem:[%s1502_s0 + $0x90] sm:$0xff]  }
  0x1a   :  { %v302_v47 = vmax.f32 %v238_v40, 0.0  ;;  %v852_v50 = vunpack.c.l.bf16 %v1101_v38  ;;  %v303_v53 = vmax.f32 %v239_v44, 0.0  ;;  %v242_v55 = vadd.f32 %v1192_v7, %v171_v46 }
  0x1b   :  { %v973_v52 = vpack.c.bf16 %v301_v43, %v300_v39  ;;  %v304_v54 = vmax.f32 %v240_v45, 0.0  ;;  %v305_v56 = vmax.f32 %v241_v48, 0.0  ;;  %v243_v57 = vadd.f32 %v1192_v7, %v172_v49  ;;  %v1108_v43 = vld [vmem:[%s1502_s0 + $0x98] sm:$0xff]  }
  0x1c   :  { %v853_v58 = vunpack.c.h.bf16 %v1101_v38  ;;  %v173_v59 = vmul.f32 %v852_v50, %v1178_v1  ;;  %v978_v61 = vpack.c.bf16 %v303_v53, %v302_v47  ;;  %v306_v62 = vmax.f32 %v242_v55, 0.0 }
  0x1d   :  { %1128 = vst [vmem:[%s1505_s3 + $0x40] sm:$0xff] %v973_v52   ;;  %v856_v63 = vunpack.c.l.bf16 %v1102_v51  ;;  %v857_v0 = vunpack.c.h.bf16 %v1102_v51  ;;  %v983_v3 = vpack.c.bf16 %v305_v56, %v304_v54  ;;  %v307_v4 = vmax.f32 %v243_v57, 0.0  ;;  %v1109_v56 = vld [vmem:[%s1502_s0 + $0xa0] sm:$0xff]  }
  0x1e   :  { %v174_v5 = vmul.f32 %v853_v58, %v1178_v1  ;;  %v244_v6 = vadd.f32 %v1192_v7, %v173_v59  ;;  %1129 = vst [vmem:[%s1505_s3 + $0x48] sm:$0xff] %v978_v61   ;;  %v860_v10 = vunpack.c.l.bf16 %v1103_v60  ;;  %v861_v11 = vunpack.c.h.bf16 %v1103_v60 }
  0x1f   :  { %v175_v8 = vmul.f32 %v856_v63, %v1178_v1  ;;  %v176_v9 = vmul.f32 %v857_v0, %v1178_v1  ;;  %1130 = vst [vmem:[%s1505_s3 + $0x50] sm:$0xff] %v983_v3   ;;  %v988_v13 = vpack.c.bf16 %v307_v4, %v306_v62  ;;  %v864_v16 = vunpack.c.l.bf16 %v1104_v2 }
  0x20   :  { %v245_v14 = vadd.f32 %v1192_v7, %v174_v5  ;;  %v308_v15 = vmax.f32 %v244_v6, 0.0  ;;  %v177_v19 = vmul.f32 %v860_v10, %v1178_v1  ;;  %v178_v20 = vmul.f32 %v861_v11, %v1178_v1 }
  0x21   :  { %v246_v17 = vadd.f32 %v1192_v7, %v175_v8  ;;  %v247_v18 = vadd.f32 %v1192_v7, %v176_v9  ;;  %1131 = vst [vmem:[%s1505_s3 + $0x58] sm:$0xff] %v988_v13   ;;  %v865_v22 = vunpack.c.h.bf16 %v1104_v2  ;;  %v179_v23 = vmul.f32 %v864_v16, %v1178_v1  ;;  %v1110_v2 = vld [vmem:[%s1502_s0 + $0xa8] sm:$0xff]   ;;  %v1111_v16 = vld [vmem:[%s1502_s0 + $0xb0] sm:$0xff]  }
  0x22   :  { %v309_v21 = vmax.f32 %v245_v14, 0.0  ;;  %v868_v24 = vunpack.c.l.bf16 %v1105_v12  ;;  %v248_v27 = vadd.f32 %v1192_v7, %v177_v19  ;;  %v249_v28 = vadd.f32 %v1192_v7, %v178_v20 }
  0x23   :  { %v310_v25 = vmax.f32 %v246_v17, 0.0  ;;  %v311_v26 = vmax.f32 %v247_v18, 0.0  ;;  %v180_v31 = vmul.f32 %v865_v22, %v1178_v1  ;;  %v250_v32 = vadd.f32 %v1192_v7, %v179_v23 }
  0x24   :  { %v993_v30 = vpack.c.bf16 %v309_v21, %v308_v15  ;;  %v869_v33 = vunpack.c.h.bf16 %v1105_v12  ;;  %v312_v36 = vmax.f32 %v248_v27, 0.0  ;;  %v313_v37 = vmax.f32 %v249_v28, 0.0  ;;  %v1112_v21 = vld [vmem:[%s1502_s0 + $0xb8] sm:$0xff]  }
  0x25   :  { %v998_v35 = vpack.c.bf16 %v311_v26, %v310_v25  ;;  %v181_v38 = vmul.f32 %v868_v24, %v1178_v1  ;;  %v251_v39 = vadd.f32 %v1192_v7, %v180_v31  ;;  %v314_v40 = vmax.f32 %v250_v32, 0.0 }
  0x26   :  { %1132 = vst [vmem:[%s1505_s3 + $0x60] sm:$0xff] %v993_v30   ;;  %v182_v41 = vmul.f32 %v869_v33, %v1178_v1  ;;  %v872_v42 = vunpack.c.l.bf16 %v1106_v29  ;;  %v1003_v44 = vpack.c.bf16 %v313_v37, %v312_v36  ;;  %v873_v46 = vunpack.c.h.bf16 %v1106_v29 }
  0x27   :  { %1133 = vst [vmem:[%s1505_s3 + $0x68] sm:$0xff] %v998_v35   ;;  %v252_v45 = vadd.f32 %v1192_v7, %v181_v38  ;;  %v876_v47 = vunpack.c.l.bf16 %v1107_v34  ;;  %v315_v48 = vmax.f32 %v251_v39, 0.0  ;;  %v877_v51 = vunpack.c.h.bf16 %v1107_v34  ;;  %v1113_v34 = vld [vmem:[%s1502_s0 + $0xc0] sm:$0xff]  }
  0x28   :  { %v253_v49 = vadd.f32 %v1192_v7, %v182_v41  ;;  %v183_v50 = vmul.f32 %v872_v42, %v1178_v1  ;;  %1134 = vst [vmem:[%s1505_s3 + $0x70] sm:$0xff] %v1003_v44   ;;  %v184_v53 = vmul.f32 %v873_v46, %v1178_v1  ;;  %v880_v55 = vunpack.c.l.bf16 %v1108_v43 }
  0x29   :  { %v316_v52 = vmax.f32 %v252_v45, 0.0  ;;  %v185_v54 = vmul.f32 %v876_v47, %v1178_v1  ;;  %v1008_v57 = vpack.c.bf16 %v315_v48, %v314_v40  ;;  %v186_v60 = vmul.f32 %v877_v51, %v1178_v1  ;;  %v1114_v47 = vld [vmem:[%s1502_s0 + $0xc8] sm:$0xff]  }
  0x2a   :  { %v317_v58 = vmax.f32 %v253_v49, 0.0  ;;  %v254_v59 = vadd.f32 %v1192_v7, %v183_v50  ;;  %v255_v61 = vadd.f32 %v1192_v7, %v184_v53  ;;  %v881_v63 = vunpack.c.h.bf16 %v1108_v43 }
  0x2b   :  { %v256_v62 = vadd.f32 %v1192_v7, %v185_v54  ;;  %v187_v0 = vmul.f32 %v880_v55, %v1178_v1  ;;  %1135 = vst [vmem:[%s1505_s3 + $0x78] sm:$0xff] %v1008_v57   ;;  %v257_v5 = vadd.f32 %v1192_v7, %v186_v60  ;;  %v884_v6 = vunpack.c.l.bf16 %v1109_v56 }
  0x2c   :  { %v1013_v3 = vpack.c.bf16 %v317_v58, %v316_v52  ;;  %v318_v4 = vmax.f32 %v254_v59, 0.0  ;;  %v319_v8 = vmax.f32 %v255_v61, 0.0  ;;  %v188_v10 = vmul.f32 %v881_v63, %v1178_v1  ;;  %v1115_v52 = vld [vmem:[%s1502_s0 + $0xd0] sm:$0xff]   ;;  %v1116_v61 = vld [vmem:[%s1502_s0 + $0xd8] sm:$0xff]  }
  0x2d   :  { %v320_v9 = vmax.f32 %v256_v62, 0.0  ;;  %v258_v11 = vadd.f32 %v1192_v7, %v187_v0  ;;  %v321_v12 = vmax.f32 %v257_v5, 0.0  ;;  %v885_v13 = vunpack.c.h.bf16 %v1109_v56 }
  0x2e   :  { %1136 = vst [vmem:[%s1505_s3 + $0x80] sm:$0xff] %v1013_v3   ;;  %v189_v14 = vmul.f32 %v884_v6, %v1178_v1  ;;  %v888_v15 = vunpack.c.l.bf16 %v1110_v2  ;;  %v1018_v17 = vpack.c.bf16 %v319_v8, %v318_v4  ;;  %v259_v18 = vadd.f32 %v1192_v7, %v188_v10 }
  0x2f   :  { %v322_v19 = vmax.f32 %v258_v11, 0.0  ;;  %v889_v20 = vunpack.c.h.bf16 %v1110_v2  ;;  %v1023_v22 = vpack.c.bf16 %v321_v12, %v320_v9  ;;  %v190_v23 = vmul.f32 %v885_v13, %v1178_v1  ;;  %v1117_v12 = vld [vmem:[%s1502_s0 + $0xe0] sm:$0xff]  }
  0x30   :  { %v260_v24 = vadd.f32 %v1192_v7, %v189_v14  ;;  %v191_v25 = vmul.f32 %v888_v15, %v1178_v1  ;;  %1137 = vst [vmem:[%s1505_s3 + $0x88] sm:$0xff] %v1018_v17   ;;  %v323_v26 = vmax.f32 %v259_v18, 0.0  ;;  %v892_v28 = vunpack.c.l.bf16 %v1111_v16 }
  0x31   :  { %v192_v27 = vmul.f32 %v889_v20, %v1178_v1  ;;  %v893_v29 = vunpack.c.h.bf16 %v1111_v16  ;;  %1138 = vst [vmem:[%s1505_s3 + $0x90] sm:$0xff] %v1023_v22   ;;  %v261_v30 = vadd.f32 %v1192_v7, %v190_v23  ;;  %v896_v33 = vunpack.c.l.bf16 %v1112_v21 }
  0x32   :  { %v324_v31 = vmax.f32 %v260_v24, 0.0  ;;  %v262_v32 = vadd.f32 %v1192_v7, %v191_v25  ;;  %v1028_v35 = vpack.c.bf16 %v323_v26, %v322_v19  ;;  %v193_v37 = vmul.f32 %v892_v28, %v1178_v1 }
  0x33   :  { %v263_v36 = vadd.f32 %v1192_v7, %v192_v27  ;;  %v194_v38 = vmul.f32 %v893_v29, %v1178_v1  ;;  %v325_v39 = vmax.f32 %v261_v30, 0.0  ;;  %v897_v41 = vunpack.c.h.bf16 %v1112_v21  ;;  %v1118_v21 = vld [vmem:[%s1502_s0 + $0xe8] sm:$0xff]  }
  0x34   :  { %v326_v40 = vmax.f32 %v262_v32, 0.0  ;;  %v195_v42 = vmul.f32 %v896_v33, %v1178_v1  ;;  %1139 = vst [vmem:[%s1505_s3 + $0x98] sm:$0xff] %v1028_v35   ;;  %v264_v44 = vadd.f32 %v1192_v7, %v193_v37  ;;  %v900_v46 = vunpack.c.l.bf16 %v1113_v34 }
  0x35   :  { %v327_v43 = vmax.f32 %v263_v36, 0.0  ;;  %v265_v45 = vadd.f32 %v1192_v7, %v194_v38  ;;  %v1033_v48 = vpack.c.bf16 %v325_v39, %v324_v31  ;;  %v196_v49 = vmul.f32 %v897_v41, %v1178_v1  ;;  %v1120_v39 = vld [vmem:[%s1502_s0 + $0xf8] sm:$0xff]  }
  0x36   :  { %v266_v50 = vadd.f32 %v1192_v7, %v195_v42  ;;  %v901_v51 = vunpack.c.h.bf16 %v1113_v34  ;;  %v328_v54 = vmax.f32 %v264_v44, 0.0  ;;  %v197_v56 = vmul.f32 %v900_v46, %v1178_v1  ;;  %v1119_v34 = vld [vmem:[%s1502_s0 + $0xf0] sm:$0xff]  }
  0x37   :  { %v1038_v53 = vpack.c.bf16 %v327_v43, %v326_v40  ;;  %v329_v55 = vmax.f32 %v265_v45, 0.0  ;;  %1140 = vst [vmem:[%s1505_s3 + $0xa0] sm:$0xff] %v1033_v48   ;;  %v267_v57 = vadd.f32 %v1192_v7, %v196_v49  ;;  %v904_v60 = vunpack.c.l.bf16 %v1114_v47 }
  0x38   :  { %v330_v58 = vmax.f32 %v266_v50, 0.0  ;;  %v198_v59 = vmul.f32 %v901_v51, %v1178_v1  ;;  %v268_v63 = vadd.f32 %v1192_v7, %v197_v56  ;;  %v905_v0 = vunpack.c.h.bf16 %v1114_v47 }
  0x39   :  { %1141 = vst [vmem:[%s1505_s3 + $0xa8] sm:$0xff] %v1038_v53   ;;  %v1043_v62 = vpack.c.bf16 %v329_v55, %v328_v54  ;;  %v908_v2 = vunpack.c.l.bf16 %v1115_v52  ;;  %v331_v3 = vmax.f32 %v267_v57, 0.0  ;;  %v199_v5 = vmul.f32 %v904_v60, %v1178_v1 }
  0x3a   :  { %v269_v4 = vadd.f32 %v1192_v7, %v198_v59  ;;  %v909_v6 = vunpack.c.h.bf16 %v1115_v52  ;;  %v332_v8 = vmax.f32 %v268_v63, 0.0  ;;  %v200_v9 = vmul.f32 %v905_v0, %v1178_v1 }
  0x3b   :  { %1142 = vst [vmem:[%s1505_s3 + $0xb0] sm:$0xff] %v1043_v62   ;;  %v201_v10 = vmul.f32 %v908_v2, %v1178_v1  ;;  %v912_v11 = vunpack.c.l.bf16 %v1116_v61  ;;  %v1048_v13 = vpack.c.bf16 %v331_v3, %v330_v58  ;;  %v270_v15 = vadd.f32 %v1192_v7, %v199_v5 }
  0x3c   :  { %v333_v14 = vmax.f32 %v269_v4, 0.0  ;;  %v202_v16 = vmul.f32 %v909_v6, %v1178_v1  ;;  %v271_v17 = vadd.f32 %v1192_v7, %v200_v9  ;;  %v913_v19 = vunpack.c.h.bf16 %v1116_v61 }
  0x3d   :  { %v272_v18 = vadd.f32 %v1192_v7, %v201_v10  ;;  %v203_v20 = vmul.f32 %v912_v11, %v1178_v1  ;;  %1143 = vst [vmem:[%s1505_s3 + $0xb8] sm:$0xff] %v1048_v13   ;;  %v334_v23 = vmax.f32 %v270_v15, 0.0  ;;  %v916_v25 = vunpack.c.l.bf16 %v1117_v12 }
  0x3e   :  { %v1053_v22 = vpack.c.bf16 %v333_v14, %v332_v8  ;;  %v273_v24 = vadd.f32 %v1192_v7, %v202_v16  ;;  %v335_v26 = vmax.f32 %v271_v17, 0.0  ;;  %v204_v28 = vmul.f32 %v913_v19, %v1178_v1 }
  0x3f   :  { %v336_v27 = vmax.f32 %v272_v18, 0.0  ;;  %v274_v29 = vadd.f32 %v1192_v7, %v203_v20  ;;  %v917_v31 = vunpack.c.h.bf16 %v1117_v12  ;;  %v205_v32 = vmul.f32 %v916_v25, %v1178_v1 }
  0x40   :  { %1144 = vst [vmem:[%s1505_s3 + $0xc0] sm:$0xff] %v1053_v22   ;;  %v337_v30 = vmax.f32 %v273_v24, 0.0  ;;  %v920_v33 = vunpack.c.l.bf16 %v1118_v21  ;;  %v1058_v35 = vpack.c.bf16 %v335_v26, %v334_v23  ;;  %v275_v36 = vadd.f32 %v1192_v7, %v204_v28 }
  0x41   :  { %v338_v37 = vmax.f32 %v274_v29, 0.0  ;;  %v921_v38 = vunpack.c.h.bf16 %v1118_v21  ;;  %v206_v41 = vmul.f32 %v917_v31, %v1178_v1  ;;  %v276_v42 = vadd.f32 %v1192_v7, %v205_v32 }
  0x42   :  { %v1063_v40 = vpack.c.bf16 %v337_v30, %v336_v27  ;;  %v207_v43 = vmul.f32 %v920_v33, %v1178_v1  ;;  %1145 = vst [vmem:[%s1505_s3 + $0xc8] sm:$0xff] %v1058_v35   ;;  %v339_v44 = vmax.f32 %v275_v36, 0.0  ;;  %v924_v46 = vunpack.c.l.bf16 %v1119_v34 }
  0x43   :  { %v208_v45 = vmul.f32 %v921_v38, %v1178_v1  ;;  %v925_v47 = vunpack.c.h.bf16 %v1119_v34  ;;  %v277_v48 = vadd.f32 %v1192_v7, %v206_v41  ;;  %v340_v49 = vmax.f32 %v276_v42, 0.0 }
  0x44   :  { %1146 = vst [vmem:[%s1505_s3 + $0xd0] sm:$0xff] %v1063_v40   ;;  %v278_v50 = vadd.f32 %v1192_v7, %v207_v43  ;;  %v928_v51 = vunpack.c.l.bf16 %v1120_v39  ;;  %v1068_v52 = vpack.c.bf16 %v339_v44, %v338_v37  ;;  %v209_v54 = vmul.f32 %v924_v46, %v1178_v1 }
  0x45   :  { %v279_v53 = vadd.f32 %v1192_v7, %v208_v45  ;;  %v210_v55 = vmul.f32 %v925_v47, %v1178_v1  ;;  %v341_v56 = vmax.f32 %v277_v48, 0.0  ;;  %v929_v58 = vunpack.c.h.bf16 %v1120_v39 }
  0x46   :  { %v342_v57 = vmax.f32 %v278_v50, 0.0  ;;  %v211_v59 = vmul.f32 %v928_v51, %v1178_v1  ;;  %1147 = vst [vmem:[%s1505_s3 + $0xd8] sm:$0xff] %v1068_v52   ;;  %v280_v61 = vadd.f32 %v1192_v7, %v209_v54 }
  0x47   :  { %v343_v60 = vmax.f32 %v279_v53, 0.0  ;;  %v281_v62 = vadd.f32 %v1192_v7, %v210_v55  ;;  %v1073_v63 = vpack.c.bf16 %v341_v56, %v340_v49  ;;  %v212_v0 = vmul.f32 %v929_v58, %v1178_v1 }
  0x48   :  { %v282_v2 = vadd.f32 %v1192_v7, %v211_v59  ;;  %v344_v4 = vmax.f32 %v280_v61, 0.0 }
  0x49   :  { %v1078_v3 = vpack.c.bf16 %v343_v60, %v342_v57  ;;  %v345_v5 = vmax.f32 %v281_v62, 0.0  ;;  %1148 = vst [vmem:[%s1505_s3 + $0xe0] sm:$0xff] %v1073_v63   ;;  %v283_v6 = vadd.f32 %v1192_v7, %v212_v0 }
  0x4a   :  { %v346_v8 = vmax.f32 %v282_v2, 0.0 }
  0x4b   :  { %1149 = vst [vmem:[%s1505_s3 + $0xe8] sm:$0xff] %v1078_v3   ;;  %v1083_v9 = vpack.c.bf16 %v345_v5, %v344_v4  ;;  %v347_v10 = vmax.f32 %v283_v6, 0.0 }
  0x4d   :  { %1150 = vst [vmem:[%s1505_s3 + $0xf0] sm:$0xff] %v1083_v9   ;;  %v1088_v1 = vpack.c.bf16 %v347_v10, %v346_v8 }
  0x4f   :  { %1151 = vst [vmem:[%s1505_s3 + $0xf8] sm:$0xff] %v1088_v1  }

// kernel: basic_block_pallas.3
= control target key start
LH: loop header
LB: loop body
LE: loop exit
PB: predicated region body
PF: predicated region fallthrough
CT: control target
= control target key end

     0   :  { %s6434_s13 = smov 0   ;;  %s7465_s0 = inlined_call_operand.vmem [shape: bf16[2,9,9,128], index: 0, kind: input, shape index: {}]   ;;  %s7466_s1 = inlined_call_operand.vmem [shape: bf16[2,9,9,128], index: 1, kind: input, shape index: {}]   ;;  %s7467_s2 = inlined_call_operand.vmem [shape: bf16[2,9,9,128], index: 2, kind: input, shape index: {}]   ;;  %s7468_s3 = inlined_call_operand.vmem [shape: bf16[2,9,9,128], index: 3, kind: input, shape index: {}]   ;;  %s7469_s4 = inlined_call_operand.vmem [shape: bf16[2,8,8,128], index: 4, kind: input, shape index: {}]   ;;  %s7470_s5 = inlined_call_operand.vmem [shape: bf16[9,128,128], index: 5, kind: input, shape index: {}]   ;;  %s7471_s6 = inlined_call_operand.vmem [shape: bf16[9,128,128], index: 6, kind: input, shape index: {}]   ;;  %s7472_s7 = inlined_call_operand.vmem [shape: bf16[128,128], index: 7, kind: input, shape index: {}]   ;;  %s7473_s8 = inlined_call_operand.vmem [shape: f32[1,128], index: 8, kind: input, shape index: {}]   ;;  %s7474_s9 = inlined_call_operand.vmem [shape: f32[1,128], index: 9, kind: input, shape index: {}]   ;;  %s7475_s10 = inlined_call_operand.vmem [shape: f32[2,8,8,128], index: 10, kind: output, shape index: {}]  }
   0x1 LB: > { %s4757_s14 = sadd.s32 4294967295, %s6376_s13   ;;  %p4761_p0 = scmp.ge.s32.totalorder %s6376_s13, 1  ;;  %s6376_s13 = sphi %s6434_s13, %s20_s13  }
   0x2   : > { %p352_p1 = scmp.lt.s32.totalorder %s6376_s13, 3 }
   0x4   : > { %p353_p2 = pnand %p4761_p0, %p352_p1 }
   0x5   : > { %v6178_v0 = vld [vmem:[%s7470_s5 + $0x40] sm:$0xff] (!%p353_p2)   ;;  %p410_p3 = scmp.lt.s32.totalorder (!%p353_p2), %s4757_s14, 1  ;;  %v6179_v1 = vld [vmem:[%s7470_s5 + $0x48] sm:$0xff] (!%p353_p2)   ;;  %v6180_v2 = vld [vmem:[%s7470_s5 + $0x50] sm:$0xff] (!%p353_p2)   ;;  %vm780_vm0 = vsmask.f32 (!%p353_p2), 3328 }
   0x6   : > { %356 = sbr.rel (%p353_p2) target bundleno = 1052 (0x41c), region = 60  ;;  %5560 = vmatprep.subr.bf16.mxu0 (!%p353_p2), %v6178_v0  ;;  %v6181_v3 = vld [vmem:[%s7470_s5 + $0x58] sm:$0xff] (!%p353_p2)   ;;  %v6182_v5 = vld [vmem:[%s7470_s5 + $0x60] sm:$0xff] (!%p353_p2)   ;;  %v6183_v6 = vld [vmem:[%s7470_s5 + $0x68] sm:$0xff] (!%p353_p2)   ;;  %vm781_vm1 = vsmask.f32 (!%p353_p2), 7440 }
   0x7   : > { %5561 = vmatpush3.bf16.msra.mxu0 (!%p353_p2), %v6178_v0  ;;  %v6184_v7 = vld [vmem:[%s7470_s5 + $0x70] sm:$0xff] (!%p353_p2)   ;;  %v6185_v8 = vld [vmem:[%s7470_s5 + $0x78] sm:$0xff] (!%p353_p2)   ;;  %v6187_v9 = vld [vmem:[%s7470_s5] sm:$0xff] (!%p353_p2)   ;;  %vm2458_vm3 = vcmask (!%p353_p2), 1043456   ;;  %vm2459_vm4 = vsmask.f32 (!%p353_p2), 7938 }
   0x8   : > { %5562 = vmatprep.subr.bf16.mxu0 (!%p353_p2), %v6179_v1  ;;  %v6189_v12 = vld [vmem:[%s7470_s5 + $0x8] sm:$0xff] (!%p353_p2)   ;;  %v6190_v13 = vld [vmem:[%s7470_s5 + $0x10] sm:$0xff] (!%p353_p2)   ;;  %v6191_v16 = vld [vmem:[%s7470_s5 + $0x18] sm:$0xff] (!%p353_p2)   ;;  %vm2464_vm5 = vcmask (!%p353_p2), 1040384   ;;  %vm2465_vm6 = vsmask.f32 (!%p353_p2), 256 }
   0x9   : > { %v6192_v17 = vld [vmem:[%s7470_s5 + $0x20] sm:$0xff] (!%p353_p2)   ;;  %v6193_v18 = vld [vmem:[%s7470_s5 + $0x28] sm:$0xff] (!%p353_p2)   ;;  %v6195_v23 = vld [vmem:[%s7470_s5 + $0x30] sm:$0xff] (!%p353_p2)   ;;  %vm2963_vm9 = vcmask (!%p353_p2), 1042432   ;;  %vm2964_vm10 = vcmask (!%p353_p2), 1046532  }
   0xa   : > { %v6197_v27 = vld [vmem:[%s7470_s5 + $0x38] sm:$0xff] (!%p353_p2)   ;;  %v6199_v33 = vld [vmem:[%s7470_s5 + $0x80] sm:$0xff] (!%p353_p2)   ;;  %v6201_v40 = vld [vmem:[%s7470_s5 + $0x88] sm:$0xff] (!%p353_p2)  }
   0xb   : > { %5563 = vmatpush3.bf16.msra.mxu0 (!%p353_p2), %v6179_v1  ;;  %vm6538_vm2 = vmor (!%p353_p2), %vm780_vm0, %vm781_vm1  ;;  %v6202_v50 = vld [vmem:[%s7470_s5 + $0x90] sm:$0xff] (!%p353_p2)   ;;  %v6203_v54 = vld [vmem:[%s7470_s5 + $0x98] sm:$0xff] (!%p353_p2)  }
   0xc   : > { %5564 = vmatprep.subr.bf16.mxu0 (!%p353_p2), %v6180_v2  ;;  %v6204_v0 = vld [vmem:[%s7470_s5 + $0xa0] sm:$0xff] (!%p353_p2)   ;;  %vm6877_vm7 = vmand (!%p353_p2), %vm2458_vm3, %vm2459_vm4 }
   0xd   : > { %s7485_s14 = smov (!%p410_p3, %s4757_s14), 1  ;;  %vm6884_vm8 = vmand %vm2464_vm5, %vm2465_vm6  ;;  %v6358_v46 = vld [vmem:[%s7471_s6 + $0x220] sm:$0xff]  }
   0xe   : > { %s6454_s21 = smul.u32 72, %s7485_s14  ;;  %vm7008_vm11 = vmor %vm2963_vm9, %vm2964_vm10  ;;  %s5323_s27 = sshll.u32 %s7485_s14, 6 }
   0xf   : > { %5565 = vmatpush3.bf16.msra.mxu0 %v6180_v2 }
  0x10   : > { %s6460_s24 = scalar_lea.vmem %s7466_s1, %s6454_s21  ;;  %5566 = vmatprep.subr.bf16.mxu0 %v6181_v3  ;;  %s6476_s15 = scalar_lea.vmem %s7465_s0, %s6454_s21 }
  0x11   : > { %v6186_v4 = vld [vmem:[%s6460_s24] ss:$8 sps:$4 sm:$0xff]   ;;  %v6188_v10 = vld [vmem:[%s6460_s24 + $0x10] ss:$8 sps:$4 sm:$0xff]   ;;  %s6515_s22 = scalar_lea.vmem %s7467_s2, %s6454_s21  ;;  %v765_v26 = vld [vmem:[%s6476_s15 + $0x4] sm:$0x1]  ;;  %s6535_s12 = scalar_lea.vmem %s7468_s3, %s6454_s21 }
  0x12   : > { %5576 = vmatprep.mubr.bf16.mxu0 %v6186_v4  ;;  %v6194_v11 = vld [vmem:[%s6460_s24 + $0x20] ss:$8 sps:$4 sm:$0xff]   ;;  %v6196_v14 = vld [vmem:[%s6460_s24 + $0x30] ss:$8 sps:$4 sm:$0xff]   ;;  %v767_v28 = vld [vmem:[%s6476_s15 + $0xc] sm:$0x1] }
  0x13   : > { %5567 = vmatpush3.bf16.msra.mxu0 %v6181_v3  ;;  %v6198_v15 = vld [vmem:[%s6476_s15] ss:$8 sps:$4 sm:$0xff]   ;;  %v793_v34 = vshll.u32 %v765_v26, 16  ;;  %v807_v35 = vshll.u32 %v767_v28, 16  ;;  %v6200_v36 = vld [vmem:[%s6476_s15 + $0x10] ss:$8 sps:$4 sm:$0xff]  }
  0x14   : > { %5568 = vmatprep.subr.bf16.mxu0 %v6182_v5  ;;  %v764_v19 = vld [vmem:[%s6476_s15] sm:$0xf]  ;;  %v766_v20 = vld [vmem:[%s6476_s15 + $0x8] sm:$0xf]  ;;  %v768_v41 = vld [vmem:[%s6476_s15 + $0x10] sm:$0xf] }
  0x15   : > { %v784_v21 = vshrl.u32 %v764_v19, 16  ;;  %v787_v22 = vshll.u32 %v764_v19, 16  ;;  %v798_v24 = vshrl.u32 %v766_v20, 16  ;;  %v801_v25 = vshll.u32 %v766_v20, 16  ;;  %v6206_v39 = vld [vmem:[%s6476_s15 + $0x20] ss:$8 sps:$4 sm:$0xff]  }
  0x16   : > { %v795_v42 = vrot.slane %v793_v34, 5  ;;  %v809_v43 = vrot.slane %v807_v35, 5  ;;  %v770_v47 = vld [vmem:[%s6476_s15 + $0x18] sm:$0xf]  ;;  %v812_v48 = vshrl.u32 %v768_v41, 16  ;;  %v815_v49 = vshll.u32 %v768_v41, 16 }
  0x17   : > { %5569 = vmatpush3.bf16.msra.mxu0 %v6182_v5  ;;  %v786_v29 = vrot.slane %v784_v21, 4  ;;  %v789_v30 = vrot.slane %v787_v22, 5  ;;  %v800_v31 = vrot.slane %v798_v24, 4  ;;  %v803_v32 = vrot.slane %v801_v25, 5  ;;  %v6208_v53 = vld [vmem:[%s6476_s15 + $0x30] ss:$8 sps:$4 sm:$0xff]  }
  0x18   : > { %5570 = vmatprep.subr.bf16.mxu0 %v6183_v6  ;;  %v826_v55 = vshrl.u32 %v770_v47, 16  ;;  %v829_v56 = vshll.u32 %v770_v47, 16  ;;  %v814_v58 = vrot.slane %v812_v48, 4  ;;  %v817_v59 = vrot.slane %v815_v49, 5  ;;  %v772_v60 = vld [vmem:[%s6476_s15 + $0x20] sm:$0xf] }
  0x19   : > { %v790_v37 = vor.u32 %v789_v30, %v786_v29  ;;  %v804_v38 = vor.u32 %v803_v32, %v800_v31  ;;  %v769_v61 = vld [vmem:[%s6476_s15 + $0x14] sm:$0x1]  ;;  %v771_v62 = vld [vmem:[%s6476_s15 + $0x1c] sm:$0x1]  ;;  %v774_v63 = vld [vmem:[%s6476_s15 + $0x28] sm:$0xf] }
  0x1a   : > { %v828_v1 = vrot.slane %v826_v55, 4  ;;  %v831_v2 = vrot.slane %v829_v56, 5  ;;  %v840_v3 = vshrl.u32 %v772_v60, 16  ;;  %v843_v4 = vshll.u32 %v772_v60, 16  ;;  %v6207_v28 = vld [vmem:[%s7470_s5 + $0xb0] sm:$0xff]   ;;  %v6211_v60 = vld [vmem:[%s7470_s5 + $0xc8] sm:$0xff]  }
  0x1b   : > { %5571 = vmatpush3.bf16.msra.mxu0 %v6183_v6  ;;  %v791_v44 = vrot.slane %v790_v37, 4  ;;  %v805_v45 = vrot.slane %v804_v38, 4  ;;  %v854_v5 = vshrl.u32 %v774_v63, 16  ;;  %v857_v6 = vshll.u32 %v774_v63, 16  ;;  %v777_v35 = vld [vmem:[%s6476_s15 + $0x34] sm:$0x1] }
  0x1c   : > { %5572 = vmatprep.subr.bf16.mxu0 %v6184_v7  ;;  %v779_v37 = vld [vmem:[%s6476_s15 + $0x3c] sm:$0x1] }
  0x1d   : > { %v796_v51 = vsel %vm6538_vm2, %v791_v44, %v795_v42  ;;  %v810_v52 = vsel %vm6538_vm2, %v805_v45, %v809_v43  ;;  %v859_v19 = vrot.slane %v857_v6, 5  ;;  %v877_v45 = vshll.u32 %v777_v35, 16  ;;  %v6217_v6 = vld [vmem:[%s7470_s5 + $0xf8] sm:$0xff]  }
  0x1e   : > { %v4826_v57 = vcombine.low %v796_v51, %v810_v52  ;;  %v6210_v51 = vld [vmem:[%s7470_s5 + $0xc0] sm:$0xff]  }
  0x1f   : > { %5573 = vmatpush3.bf16.msra.mxu0 %v6184_v7  ;;  %v6205_v7 = vld [vmem:[%s7470_s5 + $0xa8] sm:$0xff]   ;;  %v879_v55 = vrot.slane %v877_v45, 5  ;;  %v6231_v45 = vld [vmem:[%s7470_s5 + $0x140] sm:$0xff]  }
  0x20   : > { %5574 = vmatprep.subr.bf16.mxu0 %v6185_v8 }
  0x23   : > { %5575 = vmatpush3.bf16.msra.mxu0 %v6185_v8  ;;  %v821_v8 = vshll.u32 %v769_v61, 16  ;;  %v6212_v61 = vld [vmem:[%s7470_s5 + $0xd0] sm:$0xff]  }
  0x24   : > { %5584 = vmatprep.subr.bf16.mxu0 %v6187_v9 }
  0x25   : > { %v823_v26 = vrot.slane %v821_v8, 5  ;;  %v6220_v8 = vld [vmem:[%s6515_s22 + $0x10] ss:$8 sps:$4 sm:$0xff]  }
  0x26   : > { %5577 = vmatmul.mubr.bf16.vlgmr.msra.gmra.mrb[0].mxu0 %v6188_v10  ;;  %v773_v10 = vld [vmem:[%s6476_s15 + $0x24] sm:$0x1] }
  0x27   : > { %5585 = vmatpush3.bf16.msra.mxu0 %v6187_v9  ;;  %5580 = vmatprep.mubr.bf16.mxu0 %v6194_v11  ;;  %v835_v9 = vshll.u32 %v771_v62, 16  ;;  %v775_v11 = vld [vmem:[%s6476_s15 + $0x2c] sm:$0x1]  ;;  %v849_v20 = vshll.u32 %v773_v10, 16 }
  0x28   : > { %5586 = vmatprep.subr.bf16.mxu0 %v6189_v12  ;;  %v863_v21 = vshll.u32 %v775_v11, 16  ;;  %v6221_v10 = vld [vmem:[%s7470_s5 + $0x108] sm:$0xff]   ;;  %v6222_v11 = vld [vmem:[%s7470_s5 + $0x110] sm:$0xff]  }
  0x2a   : > { %v865_v34 = vrot.slane %v863_v21, 5  ;;  %v6227_v21 = vld [vmem:[%s7470_s5 + $0x130] sm:$0xff]  }
  0x2b   : > { %5587 = vmatpush3.bf16.msra.mxu0 %v6189_v12  ;;  %v818_v12 = vor.u32 %v817_v59, %v814_v58 }
  0x2c   : > { %5588 = vmatprep.subr.bf16.mxu0 %v6190_v13 }
  0x2d   : > { %v819_v29 = vrot.slane %v818_v12, 4  ;;  %v6228_v12 = vld [vmem:[%s6515_s22 + $0x30] ss:$8 sps:$4 sm:$0xff]  }
  0x2e   : > { %5581 = vmatmul.mubr.bf16.gmra.mrb[4].mxu0 %v6196_v14  ;;  %v776_v14 = vld [vmem:[%s6476_s15 + $0x30] sm:$0xf] }
  0x2f   : > { %5589 = vmatpush3.bf16.msra.mxu0 %v6190_v13  ;;  %5600 = vmatprep.mubr.bf16.mxu0 %v6198_v15  ;;  %v832_v13 = vor.u32 %v831_v2, %v828_v1  ;;  %v778_v15 = vld [vmem:[%s6476_s15 + $0x38] sm:$0xf]  ;;  %v868_v22 = vshrl.u32 %v776_v14, 16  ;;  %v824_v44 = vsel %vm6538_vm2, %v819_v29, %v823_v26  ;;  %v6218_v2 = vld [vmem:[%s6515_s22] ss:$8 sps:$4 sm:$0xff]  }
  0x30   : > { %5590 = vmatprep.subr.bf16.mxu0 %v6191_v16  ;;  %v882_v24 = vshrl.u32 %v778_v15, 16  ;;  %v885_v25 = vshll.u32 %v778_v15, 16  ;;  %v6224_v15 = vld [vmem:[%s7470_s5 + $0x120] sm:$0xff]   ;;  %v1395_v29 = vld [vmem:[%s6515_s22 + $0x18] sm:$0xf] }
  0x31   : > { %v833_v30 = vrot.slane %v832_v13, 4  ;;  %v870_v38 = vrot.slane %v868_v22, 4  ;;  %v6223_v13 = vld [vmem:[%s7470_s5 + $0x118] sm:$0xff]   ;;  %v1390_v26 = vld [vmem:[%s6515_s22 + $0x4] sm:$0x1] }
  0x32   : > { %v887_v41 = vrot.slane %v885_v25, 5  ;;  %v1415_v35 = vshll.u32 %v1390_v26, 16  ;;  %v6235_v26 = vld [vmem:[%s7470_s5 + $0x158] sm:$0xff]  }
  0x33   : > { %5591 = vmatpush3.bf16.msra.mxu0 %v6191_v16  ;;  %v842_v16 = vrot.slane %v840_v3, 4  ;;  %v6214_v3 = vld [vmem:[%s7470_s5 + $0xe0] sm:$0xff]  }
  0x34   : > { %5592 = vmatprep.subr.bf16.mxu0 %v6192_v17 }
  0x37   : > { %5593 = vmatpush3.bf16.msra.mxu0 %v6192_v17  ;;  %v845_v17 = vrot.slane %v843_v4, 5  ;;  %v6215_v4 = vld [vmem:[%s7470_s5 + $0xe8] sm:$0xff]  }
  0x38   : > { %5594 = vmatprep.subr.bf16.mxu0 %v6193_v18 }
  0x39   : > { %v846_v31 = vor.u32 %v845_v17, %v842_v16  ;;  %v1389_v16 = vld [vmem:[%s6515_s22] sm:$0xf]  ;;  %v6225_v17 = vld [vmem:[%s7470_s5 + $0x128] sm:$0xff]  }
  0x3b   : > { %5595 = vmatpush3.bf16.msra.mxu0 %v6193_v18  ;;  %v856_v18 = vrot.slane %v854_v5, 4  ;;  %v847_v42 = vrot.slane %v846_v31, 4  ;;  %v6216_v5 = vld [vmem:[%s7470_s5 + $0xf0] sm:$0xff]  }
  0x3c   : > { %5596 = vmatprep.subr.bf16.mxu0 %v6195_v23 }
  0x3d   : > { %v860_v32 = vor.u32 %v859_v19, %v856_v18  ;;  %v1391_v18 = vld [vmem:[%s6515_s22 + $0x8] sm:$0xf]  ;;  %v1406_v19 = vshrl.u32 %v1389_v16, 16 }
  0x3e   : > { %v1420_v22 = vshrl.u32 %v1391_v18, 16 }
  0x3f   : > { %5597 = vmatpush3.bf16.msra.mxu0 %v6195_v23  ;;  %v871_v23 = vshll.u32 %v776_v14, 16  ;;  %v861_v43 = vrot.slane %v860_v32, 4  ;;  %v6230_v14 = vld [vmem:[%s6535_s12] ss:$8 sps:$4 sm:$0xff]  }
  0x40   : > { %5598 = vmatprep.subr.bf16.mxu0 %v6197_v27  ;;  %v1422_v31 = vrot.slane %v1420_v22, 4 }
  0x43   : > { %5599 = vmatpush3.bf16.msra.mxu0 %v6197_v27  ;;  %v837_v27 = vrot.slane %v835_v9, 5  ;;  %v6226_v9 = vld [vmem:[%s6515_s22 + $0x20] ss:$8 sps:$4 sm:$0xff]  }
  0x44   : > { %5608 = vmatprep.subr.bf16.mxu0 %v6199_v33 }
  0x45   : > { %v838_v47 = vsel %vm6538_vm2, %v833_v30, %v837_v27  ;;  %v6229_v27 = vld [vmem:[%s7470_s5 + $0x138] sm:$0xff]   ;;  %v1392_v30 = vld [vmem:[%s6515_s22 + $0xc] sm:$0x1] }
  0x46   : > { %5601 = vmatmul.mubr.bf16.vlgmr.msra.gmra.mrb[0].mxu0 %v6200_v36  ;;  %v6209_v36 = vld [vmem:[%s7470_s5 + $0xb8] sm:$0xff]  }
  0x47   : > { %5609 = vmatpush3.bf16.msra.mxu0 %v6199_v33  ;;  %5604 = vmatprep.mubr.bf16.mxu0 %v6206_v39  ;;  %v851_v33 = vrot.slane %v849_v20, 5  ;;  %v873_v39 = vrot.slane %v871_v23, 5  ;;  %v1409_v20 = vshll.u32 %v1389_v16, 16  ;;  %v1423_v23 = vshll.u32 %v1391_v18, 16  ;;  %v6240_v18 = vld [vmem:[%s6535_s12 + $0x30] ss:$8 sps:$4 sm:$0xff]  }
  0x48   : > { %5610 = vmatprep.subr.bf16.mxu0 %v6201_v40 }
  0x49   : > { %v874_v48 = vor.u32 %v873_v39, %v870_v38  ;;  %v852_v52 = vsel %vm6538_vm2, %v847_v42, %v851_v33  ;;  %v1411_v25 = vrot.slane %v1409_v20, 5  ;;  %v1425_v32 = vrot.slane %v1423_v23, 5  ;;  %v1397_v33 = vld [vmem:[%s6515_s22 + $0x20] sm:$0xf]  ;;  %v1396_v38 = vld [vmem:[%s6515_s22 + $0x1c] sm:$0x1] }
  0x4a   : > { %v1451_v42 = vshll.u32 %v1395_v29, 16  ;;  %v1404_v23 = vld [vmem:[%s6515_s22 + $0x3c] sm:$0x1] }
  0x4b   : > { %5611 = vmatpush3.bf16.msra.mxu0 %v6201_v40  ;;  %v884_v40 = vrot.slane %v882_v24, 4  ;;  %v1408_v24 = vrot.slane %v1406_v19, 4 }
  0x4c   : > { %5612 = vmatprep.subr.bf16.mxu0 %v6202_v50 }
  0x4d   : > { %v888_v49 = vor.u32 %v887_v41, %v884_v40  ;;  %v1448_v41 = vshrl.u32 %v1395_v29, 16 }
  0x4e   : > { %5605 = vmatmul.mubr.bf16.gmra.mrb[4].mxu0 %v6208_v53  ;;  %v866_v53 = vsel %vm6538_vm2, %v861_v43, %v865_v34  ;;  %v1412_v34 = vor.u32 %v1411_v25, %v1408_v24  ;;  %v1462_v43 = vshrl.u32 %v1397_v33, 16 }
  0x4f   : > { %5613 = vmatpush3.bf16.msra.mxu0 %v6202_v50  ;;  %5624 = vmatprep.mubr.bf16.mxu0 %v4826_v57  ;;  %v891_v50 = vshll.u32 %v779_v37, 16  ;;  %v4828_v56 = vcombine.low %v852_v52, %v866_v53  ;;  %v875_v57 = vrot.slane %v874_v48, 4  ;;  %v889_v58 = vrot.slane %v888_v49, 4  ;;  %v1399_v37 = vld [vmem:[%s6515_s22 + $0x28] sm:$0xf] }
  0x50   : > { %5614 = vmatprep.subr.bf16.mxu0 %v6203_v54  ;;  %v1426_v48 = vor.u32 %v1425_v32, %v1422_v31  ;;  %v1429_v49 = vshll.u32 %v1392_v30, 16  ;;  %v6238_v52 = vld [vmem:[%s6535_s12 + $0x20] ss:$8 sps:$4 sm:$0xff]   ;;  %v1413_v53 = vrot.slane %v1412_v34, 4 }
  0x51   : > { %v893_v59 = vrot.slane %v891_v50, 5  ;;  %v880_v62 = vsel %vm6538_vm2, %v875_v57, %v879_v55  ;;  %v1476_v50 = vshrl.u32 %v1399_v37, 16  ;;  %v6233_v57 = vld [vmem:[%s7470_s5 + $0x148] sm:$0xff]  }
  0x53   : > { %5615 = vmatpush3.bf16.msra.mxu0 %v6203_v54  ;;  %v4827_v54 = vcombine.low %v824_v44, %v838_v47  ;;  %v894_v63 = vsel %vm6538_vm2, %v889_v58, %v893_v59  ;;  %v1465_v44 = vshll.u32 %v1397_v33, 16  ;;  %v6232_v47 = vld [vmem:[%s6535_s12 + $0x10] ss:$8 sps:$4 sm:$0xff]   ;;  %s5322_s12 = sshll.u32 %s7485_s14, 5 }
  0x54   : > { %5616 = vmatprep.subr.bf16.mxu0 %v6204_v0  ;;  %v4829_v1 = vcombine.low %v880_v62, %v894_v63  ;;  %v1398_v62 = vld [vmem:[%s6515_s22 + $0x24] sm:$0x1]  ;;  %v1400_v63 = vld [vmem:[%s6515_s22 + $0x2c] sm:$0x1]  ;;  %s7254_s16 = scalar_lea.vmem %s7469_s4, %s5322_s12  ;;  %s439_s12 = scalar_lea.vmem %s7475_s10, %s5323_s27 }
  0x57   : > { %5617 = vmatpush3.bf16.msra.mxu0 %v6204_v0  ;;  %v6213_v0 = vld [vmem:[%s7470_s5 + $0xd8] sm:$0xff]  }
  0x58   : > { %5618 = vmatprep.subr.bf16.mxu0 %v6205_v7 }
  0x5b   : > { %5619 = vmatpush3.bf16.msra.mxu0 %v6205_v7  ;;  %v6219_v7 = vld [vmem:[%s7470_s5 + $0x100] sm:$0xff]  }
  0x5c   : > { %5620 = vmatprep.subr.bf16.mxu0 %v6207_v28 }
  0x5f   : > { %5621 = vmatpush3.bf16.msra.mxu0 %v6207_v28  ;;  %v1393_v28 = vld [vmem:[%s6515_s22 + $0x10] sm:$0xf] }
  0x60   : > { %5622 = vmatprep.subr.bf16.mxu0 %v6209_v36  ;;  %v1434_v39 = vshrl.u32 %v1393_v28, 16  ;;  %v1437_v40 = vshll.u32 %v1393_v28, 16 }
  0x62   : > { %v1436_v58 = vrot.slane %v1434_v39, 4  ;;  %v1439_v59 = vrot.slane %v1437_v40, 5  ;;  %v6236_v40 = vld [vmem:[%s7470_s5 + $0x160] sm:$0xff]  }
  0x63   : > { %5623 = vmatpush3.bf16.msra.mxu0 %v6209_v36  ;;  %v1394_v36 = vld [vmem:[%s6515_s22 + $0x14] sm:$0x1] }
  0x64   : > { %5632 = vmatprep.subr.bf16.mxu0 %v6210_v51  ;;  %v1443_v55 = vshll.u32 %v1394_v36, 16 }
  0x66   : > { %5625 = vmatmul.mubr.bf16.vlgmr.msra.gmra.mrb[0].mxu0 %v4827_v54  ;;  %v1417_v54 = vrot.slane %v1415_v35, 5 }
  0x67   : > { %5633 = vmatpush3.bf16.msra.mxu0 %v6210_v51  ;;  %5628 = vmatprep.mubr.bf16.mxu0 %v4828_v56  ;;  %v1479_v51 = vshll.u32 %v1399_v37, 16  ;;  %v1457_v56 = vshll.u32 %v1396_v38, 16  ;;  %v1513_v37 = vshll.u32 %v1404_v23, 16 }
  0x68   : > { %5634 = vmatprep.subr.bf16.mxu0 %v6211_v60 }
  0x69   : > { %v1459_v16 = vrot.slane %v1457_v56, 5 }
  0x6b   : > { %5635 = vmatpush3.bf16.msra.mxu0 %v6211_v60  ;;  %v1450_v60 = vrot.slane %v1448_v41, 4 }
  0x6c   : > { %5636 = vmatprep.subr.bf16.mxu0 %v6212_v61 }
  0x6e   : > { %5629 = vmatmul.mubr.bf16.gmra.mrb[4].mxu0 %v4829_v1  ;;  %v1467_v1 = vrot.slane %v1465_v44, 5  ;;  %v6239_v44 = vld [vmem:[%s7470_s5 + $0x170] sm:$0xff]  }
  0x6f   : > { %5637 = vmatpush3.bf16.msra.mxu0 %v6212_v61  ;;  %5648 = vmatprep.mubr.bf16.mxu0 %v6218_v2  ;;  %v1453_v61 = vrot.slane %v1451_v42, 5  ;;  %v1427_v2 = vrot.slane %v1426_v48, 4  ;;  %v1515_v42 = vrot.slane %v1513_v37, 5 }
  0x70   : > { %5638 = vmatprep.subr.bf16.mxu0 %v6213_v0 }
  0x73   : > { %5639 = vmatpush3.bf16.msra.mxu0 %v6213_v0  ;;  %v1464_v0 = vrot.slane %v1462_v43, 4  ;;  %v6237_v43 = vld [vmem:[%s7470_s5 + $0x168] sm:$0xff]  }
  0x74   : > { %5640 = vmatprep.subr.bf16.mxu0 %v6214_v3 }
  0x77   : > { %5641 = vmatpush3.bf16.msra.mxu0 %v6214_v3  ;;  %v1431_v3 = vrot.slane %v1429_v49, 5 }
  0x78   : > { %5642 = vmatprep.subr.bf16.mxu0 %v6215_v4 }
  0x79   : > { %v1432_v19 = vsel %vm6538_vm2, %v1427_v2, %v1431_v3  ;;  %v6247_v2 = vld [vmem:[%s7470_s5 + $0x1a8] sm:$0xff]   ;;  %v6248_v3 = vld [vmem:[%s7470_s5 + $0x1b0] sm:$0xff]  }
  0x7b   : > { %5643 = vmatpush3.bf16.msra.mxu0 %v6215_v4  ;;  %v1478_v4 = vrot.slane %v1476_v50, 4 }
  0x7c   : > { %5644 = vmatprep.subr.bf16.mxu0 %v6216_v5 }
  0x7f   : > { %5645 = vmatpush3.bf16.msra.mxu0 %v6216_v5  ;;  %v1481_v5 = vrot.slane %v1479_v51, 5 }
  0x80   : > { %5646 = vmatprep.subr.bf16.mxu0 %v6217_v6 }
  0x81   : > { %v1482_v20 = vor.u32 %v1481_v5, %v1478_v4  ;;  %v6249_v4 = vld [vmem:[%s7470_s5 + $0x1b8] sm:$0xff]   ;;  %v6251_v5 = vld [vmem:[%s7470_s5 + $0x1c0] sm:$0xff]  }
  0x83   : > { %5647 = vmatpush3.bf16.msra.mxu0 %v6217_v6  ;;  %v1401_v6 = vld [vmem:[%s6515_s22 + $0x30] sm:$0xf]  ;;  %v1483_v34 = vrot.slane %v1482_v20, 4 }
  0x84   : > { %5656 = vmatprep.subr.bf16.mxu0 %v6219_v7  ;;  %v1493_v22 = vshll.u32 %v1401_v6, 16 }
  0x86   : > { %5649 = vmatmul.mubr.bf16.vlgmr.msra.gmra.mrb[0].mxu0 %v6220_v8  ;;  %v1454_v8 = vor.u32 %v1453_v61, %v1450_v60  ;;  %v1495_v36 = vrot.slane %v1493_v22, 5  ;;  %v6244_v61 = vld [vmem:[%s7470_s5 + $0x190] sm:$0xff]   ;;  %v6261_v22 = vld [vmem:[%s7470_s5 + $0x1f8] sm:$0xff]  }
  0x87   : > { %5657 = vmatpush3.bf16.msra.mxu0 %v6219_v7  ;;  %5652 = vmatprep.mubr.bf16.mxu0 %v6226_v9  ;;  %v1440_v7 = vor.u32 %v1439_v59, %v1436_v58  ;;  %v1471_v9 = vshll.u32 %v1398_v62, 16  ;;  %v6243_v58 = vld [vmem:[%s7470_s5 + $0x188] sm:$0xff]  }
  0x88   : > { %5658 = vmatprep.subr.bf16.mxu0 %v6221_v10  ;;  %v1455_v28 = vrot.slane %v1454_v8, 4  ;;  %v6253_v8 = vld [vmem:[%s7470_s5 + $0x1c8] sm:$0xff]  }
  0x89   : > { %v1473_v29 = vrot.slane %v1471_v9, 5  ;;  %v6254_v9 = vld [vmem:[%s7470_s5 + $0x1d0] sm:$0xff]  }
  0x8a   : > { %v1460_v49 = vsel %vm6538_vm2, %v1455_v28, %v1459_v16  ;;  %v4996_v16 = vld [vmem:[%s6476_s15 + $0x10] sm:$0xf]  ;;  %v4997_v28 = vld [vmem:[%s6476_s15 + $0x14] sm:$0x1] }
  0x8b   : > { %5659 = vmatpush3.bf16.msra.mxu0 %v6221_v10  ;;  %v1485_v10 = vshll.u32 %v1400_v63, 16  ;;  %v6250_v63 = vld [vmem:[%s6476_s15 + $0x8] ss:$8 sps:$4 sm:$0xff]   ;;  %v2044_v20 = vshrl.u32 %v4996_v16, 16 }
  0x8c   : > { %5660 = vmatprep.subr.bf16.mxu0 %v6222_v11 }
  0x8d   : > { %v1487_v30 = vrot.slane %v1485_v10, 5  ;;  %v6260_v10 = vld [vmem:[%s6476_s15 + $0x38] ss:$8 sps:$4 sm:$0xff]  }
  0x8e   : > { %5653 = vmatmul.mubr.bf16.gmra.mrb[4].mxu0 %v6228_v12  ;;  %v1403_v12 = vld [vmem:[%s6515_s22 + $0x38] sm:$0xf] }
  0x8f   : > { %5661 = vmatpush3.bf16.msra.mxu0 %v6222_v11  ;;  %5672 = vmatprep.mubr.bf16.mxu0 %v6230_v14  ;;  %v1402_v11 = vld [vmem:[%s6515_s22 + $0x34] sm:$0x1]  ;;  %v1418_v14 = vsel %vm6538_vm2, %v1413_v53, %v1417_v54  ;;  %v1504_v25 = vshrl.u32 %v1403_v12, 16  ;;  %v1507_v33 = vshll.u32 %v1403_v12, 16  ;;  %v1488_v53 = vsel %vm6538_vm2, %v1483_v34, %v1487_v30  ;;  %v6255_v12 = vld [vmem:[%s7470_s5 + $0x1d8] sm:$0xff]  }
  0x90   : > { %5662 = vmatprep.subr.bf16.mxu0 %v6223_v13  ;;  %v1499_v24 = vshll.u32 %v1402_v11, 16  ;;  %v4910_v31 = vcombine.low %v1418_v14, %v1432_v19  ;;  %v6262_v11 = vld [vmem:[%s6460_s24 + $0x8] ss:$8 sps:$4 sm:$0xff]   ;;  %v6264_v34 = vld [vmem:[%s6460_s24 + $0x18] ss:$8 sps:$4 sm:$0xff]  }
  0x91   : > { %v1506_v39 = vrot.slane %v1504_v25, 4  ;;  %v1509_v41 = vrot.slane %v1507_v33, 5  ;;  %v6257_v14 = vld [vmem:[%s7470_s5 + $0x1e8] sm:$0xff]   ;;  %v2046_v25 = vrot.slane %v2044_v20, 4  ;;  %v2053_v33 = vshll.u32 %v4997_v28, 16  ;;  %v6272_v20 = vld [vmem:[%s7470_s5 + $0x230] sm:$0xff]  }
  0x92   : > { %v1501_v38 = vrot.slane %v1499_v24, 5 }
  0x93   : > { %5663 = vmatpush3.bf16.msra.mxu0 %v6223_v13  ;;  %v6234_v13 = vld [vmem:[%s7470_s5 + $0x150] sm:$0xff]   ;;  %v1510_v51 = vor.u32 %v1509_v41, %v1506_v39 }
  0x94   : > { %5664 = vmatprep.subr.bf16.mxu0 %v6224_v15  ;;  %v6266_v41 = vld [vmem:[%s7470_s5 + $0x210] sm:$0xff]  }
  0x97   : > { %5665 = vmatpush3.bf16.msra.mxu0 %v6224_v15  ;;  %v1445_v15 = vrot.slane %v1443_v55, 5 }
  0x98   : > { %5666 = vmatprep.subr.bf16.mxu0 %v6225_v17 }
  0x9b   : > { %5667 = vmatpush3.bf16.msra.mxu0 %v6225_v17  ;;  %v1468_v17 = vor.u32 %v1467_v1, %v1464_v0  ;;  %v6245_v0 = vld [vmem:[%s7470_s5 + $0x198] sm:$0xff]   ;;  %v6246_v1 = vld [vmem:[%s7470_s5 + $0x1a0] sm:$0xff]  }
  0x9c   : > { %5668 = vmatprep.subr.bf16.mxu0 %v6227_v21 }
  0x9d   : > { %v1469_v32 = vrot.slane %v1468_v17, 4  ;;  %v6259_v17 = vld [vmem:[%s7470_s5 + $0x1f0] sm:$0xff]  }
  0x9f   : > { %5669 = vmatpush3.bf16.msra.mxu0 %v6227_v21  ;;  %v1490_v21 = vshrl.u32 %v1401_v6, 16  ;;  %v6252_v6 = vld [vmem:[%s6476_s15 + $0x18] ss:$8 sps:$4 sm:$0xff]  }
  0xa0   : > { %5670 = vmatprep.subr.bf16.mxu0 %v6229_v27 }
  0xa1   : > { %v1492_v35 = vrot.slane %v1490_v21, 4  ;;  %v2047_v21 = vshll.u32 %v4996_v16, 16 }
  0xa3   : > { %5671 = vmatpush3.bf16.msra.mxu0 %v6229_v27  ;;  %v1441_v27 = vrot.slane %v1440_v7, 4  ;;  %v1496_v50 = vor.u32 %v1495_v36, %v1492_v35  ;;  %v6258_v7 = vld [vmem:[%s6476_s15 + $0x28] ss:$8 sps:$4 sm:$0xff]  }
  0xa4   : > { %5680 = vmatprep.subr.bf16.mxu0 %v6231_v45  ;;  %v6270_v35 = vld [vmem:[%s6460_s24 + $0x28] ss:$8 sps:$4 sm:$0xff]  }
  0xa5   : > { %v1446_v48 = vsel %vm6538_vm2, %v1441_v27, %v1445_v15  ;;  %v1497_v56 = vrot.slane %v1496_v50, 4  ;;  %v4994_v15 = vld [vmem:[%s6476_s15 + $0x8] sm:$0xf]  ;;  %v4995_v27 = vld [vmem:[%s6476_s15 + $0xc] sm:$0x1] }
  0xa6   : > { %5673 = vmatmul.mubr.bf16.vlgmr.msra.gmra.mrb[0].mxu0 %v6232_v47  ;;  %v6242_v47 = vld [vmem:[%s7470_s5 + $0x180] sm:$0xff]   ;;  %v4911_v54 = vcombine.low %v1446_v48, %v1460_v49  ;;  %v2033_v19 = vshll.u32 %v4994_v15, 16  ;;  %v6265_v36 = vld [vmem:[%s7470_s5 + $0x208] sm:$0xff]   ;;  %v6267_v49 = vld [vmem:[%s7470_s5 + $0x218] sm:$0xff]  }
  0xa7   : > { %5681 = vmatpush3.bf16.msra.mxu0 %v6231_v45  ;;  %5676 = vmatprep.mubr.bf16.mxu0 %v6238_v52  ;;  %v6241_v45 = vld [vmem:[%s7470_s5 + $0x178] sm:$0xff]   ;;  %v1474_v52 = vsel %vm6538_vm2, %v1469_v32, %v1473_v29  ;;  %v1502_v59 = vsel %vm6538_vm2, %v1497_v56, %v1501_v38  ;;  %v6263_v29 = vld [vmem:[%s7470_s5 + $0x200] sm:$0xff]   ;;  %v5002_v50 = vld [vmem:[%s6476_s15 + $0x28] sm:$0xf] }
  0xa8   : > { %5682 = vmatprep.subr.bf16.mxu0 %v6233_v57  ;;  %v4912_v55 = vcombine.low %v1474_v52, %v1488_v53  ;;  %v2035_v24 = vrot.slane %v2033_v19, 5  ;;  %v5000_v48 = vld [vmem:[%s6476_s15 + $0x20] sm:$0xf] }
  0xa9   : > { %v6268_v56 = vld [vmem:[%s7470_s5 + $0x220] sm:$0xff]  }
  0xab   : > { %5683 = vmatpush3.bf16.msra.mxu0 %v6233_v57  ;;  %v1511_v57 = vrot.slane %v1510_v51, 4  ;;  %v5004_v51 = vld [vmem:[%s6476_s15 + $0x30] sm:$0xf] }
  0xac   : > { %5684 = vmatprep.subr.bf16.mxu0 %v6234_v13 }
  0xad   : > { %v1516_v60 = vsel %vm6538_vm2, %v1511_v57, %v1515_v42  ;;  %v2086_v57 = vshrl.u32 %v5002_v50, 16 }
  0xae   : > { %5677 = vmatmul.mubr.bf16.gmra.mrb[4].mxu0 %v6240_v18  ;;  %v4913_v62 = vcombine.low %v1502_v59, %v1516_v60  ;;  %v2030_v18 = vshrl.u32 %v4994_v15, 16  ;;  %v2100_v59 = vshrl.u32 %v5004_v51, 16  ;;  %v2103_v60 = vshll.u32 %v5004_v51, 16 }
  0xaf   : > { %5685 = vmatpush3.bf16.msra.mxu0 %v6234_v13  ;;  %5696 = vmatprep.mubr.bf16.mxu0 %v4910_v31  ;;  %v6256_v13 = vld [vmem:[%s7470_s5 + $0x1e0] sm:$0xff]   ;;  %v2039_v31 = vshll.u32 %v4995_v27, 16 }
  0xb0   : > { %5686 = vmatprep.subr.bf16.mxu0 %v6235_v26  ;;  %v2032_v23 = vrot.slane %v2030_v18, 4 }
  0xb1   : > { %v2041_v38 = vrot.slane %v2039_v31, 5 }
  0xb2   : > { %v2036_v30 = vor.u32 %v2035_v24, %v2032_v23 }
  0xb3   : > { %5687 = vmatpush3.bf16.msra.mxu0 %v6235_v26  ;;  %v2049_v26 = vrot.slane %v2047_v21, 5 }
  0xb4   : > { %5688 = vmatprep.subr.bf16.mxu0 %v6236_v40  ;;  %v2037_v37 = vrot.slane %v2036_v30, 4  ;;  %v5007_v30 = vld [vmem:[%s6476_s15 + $0x3c] sm:$0x1] }
  0xb5   : > { %v2050_v32 = vor.u32 %v2049_v26, %v2046_v25  ;;  %v6273_v25 = vld [vmem:[%s7470_s5 + $0x238] sm:$0xff]  }
  0xb6   : > { %v2042_v42 = vsel %vm6538_vm2, %v2037_v37, %v2041_v38 }
  0xb7   : > { %5689 = vmatpush3.bf16.msra.mxu0 %v6236_v40  ;;  %v2051_v39 = vrot.slane %v2050_v32, 4  ;;  %v2055_v40 = vrot.slane %v2053_v33, 5 }
  0xb8   : > { %5690 = vmatprep.subr.bf16.mxu0 %v6237_v43 }
  0xbb   : > { %5691 = vmatpush3.bf16.msra.mxu0 %v6237_v43  ;;  %v2056_v43 = vsel %vm6538_vm2, %v2051_v39, %v2055_v40  ;;  %v5009_v39 = vld [vmem:[%s6476_s15 + $0x44] sm:$0x1] }
  0xbc   : > { %5692 = vmatprep.subr.bf16.mxu0 %v6239_v44 }
  0xbf   : > { %5693 = vmatpush3.bf16.msra.mxu0 %v6239_v44  ;;  %v6271_v44 = vld [vmem:[%s6460_s24 + $0x38] ss:$8 sps:$4 sm:$0xff]  }
  0xc0   : > { %5694 = vmatprep.subr.bf16.mxu0 %v6241_v45 }
  0xc3   : > { %5695 = vmatpush3.bf16.msra.mxu0 %v6241_v45  ;;  %v5026_v45 = vcombine.low %v2042_v42, %v2056_v43 }
  0xc4   : > { %5704 = vmatprep.subr.bf16.mxu0 %v6242_v47 }
  0xc6   : > { %5697 = vmatmul.mubr.bf16.vlgmr.msra.gmra.mrb[0].mxu0 %v4911_v54  ;;  %v2072_v54 = vshrl.u32 %v5000_v48, 16 }
  0xc7   : > { %5705 = vmatpush3.bf16.msra.mxu0 %v6242_v47  ;;  %5700 = vmatprep.mubr.bf16.mxu0 %v4912_v55  ;;  %v4998_v47 = vld [vmem:[%s6476_s15 + $0x18] sm:$0xf]  ;;  %v2075_v55 = vshll.u32 %v5000_v48, 16 }
  0xc8   : > { %5706 = vmatprep.subr.bf16.mxu0 %v6243_v58  ;;  %v2058_v52 = vshrl.u32 %v4998_v47, 16  ;;  %v2061_v53 = vshll.u32 %v4998_v47, 16 }
  0xcb   : > { %5707 = vmatpush3.bf16.msra.mxu0 %v6243_v58  ;;  %v2089_v58 = vshll.u32 %v5002_v50, 16 }
  0xcc   : > { %5708 = vmatprep.subr.bf16.mxu0 %v6244_v61 }
  0xce   : > { %5701 = vmatmul.mubr.bf16.gmra.mrb[4].mxu0 %v4913_v62  ;;  %v2060_v62 = vrot.slane %v2058_v52, 4 }
  0xcf   : > { %5709 = vmatpush3.bf16.msra.mxu0 %v6244_v61  ;;  %5720 = vmatprep.mubr.bf16.mxu0 %v6250_v63  ;;  %v6269_v61 = vld [vmem:[%s7470_s5 + $0x228] sm:$0xff]   ;;  %v2063_v63 = vrot.slane %v2061_v53, 5 }
  0xd0   : > { %5710 = vmatprep.subr.bf16.mxu0 %v6245_v0 }
  0xd3   : > { %5711 = vmatpush3.bf16.msra.mxu0 %v6245_v0  ;;  %v2074_v0 = vrot.slane %v2072_v54, 4 }
  0xd4   : > { %5712 = vmatprep.subr.bf16.mxu0 %v6246_v1 }
  0xd7   : > { %5713 = vmatpush3.bf16.msra.mxu0 %v6246_v1  ;;  %v2077_v1 = vrot.slane %v2075_v55, 5 }
  0xd8   : > { %5714 = vmatprep.subr.bf16.mxu0 %v6247_v2 }
  0xdb   : > { %5715 = vmatpush3.bf16.msra.mxu0 %v6247_v2  ;;  %v4999_v2 = vld [vmem:[%s6476_s15 + $0x1c] sm:$0x1] }
  0xdc   : > { %5716 = vmatprep.subr.bf16.mxu0 %v6248_v3 }
  0xdf   : > { %5717 = vmatpush3.bf16.msra.mxu0 %v6248_v3  ;;  %v5001_v3 = vld [vmem:[%s6476_s15 + $0x24] sm:$0x1] }
  0xe0   : > { %5718 = vmatprep.subr.bf16.mxu0 %v6249_v4  ;;  %v2081_v15 = vshll.u32 %v5001_v3, 16  ;;  %v6839_v3 = vld [vmem:[%s7471_s6] sm:$0xff]  }
  0xe3   : > { %5719 = vmatpush3.bf16.msra.mxu0 %v6249_v4  ;;  %v5006_v4 = vld [vmem:[%s6476_s15 + $0x38] sm:$0xf] }
  0xe4   : > { %5728 = vmatprep.subr.bf16.mxu0 %v6251_v5  ;;  %v2114_v16 = vshrl.u32 %v5006_v4, 16 }
  0xe6   : > { %5721 = vmatmul.mubr.bf16.vlgmr.msra.gmra.mrb[0].mxu0 %v6252_v6  ;;  %v2091_v6 = vrot.slane %v2089_v58, 5  ;;  %v2116_v31 = vrot.slane %v2114_v16, 4  ;;  %v6274_v58 = vld [vmem:[%s7471_s6 + $0x40] sm:$0xff]  }
  0xe7   : > { %5729 = vmatpush3.bf16.msra.mxu0 %v6251_v5  ;;  %5724 = vmatprep.mubr.bf16.mxu0 %v6258_v7  ;;  %v2088_v5 = vrot.slane %v2086_v57, 4  ;;  %v2102_v7 = vrot.slane %v2100_v59, 4  ;;  %v6378_v59 = vmov 0  }
  0xe8   : > { %5730 = vmatprep.subr.bf16.mxu0 %v6253_v8  ;;  %5776 = vmatprep.subr.bf16.mxu1 %v6274_v58  ;;  %2339 = vst [vmem:[#allocation2 + $0x18] sm:$0xf] %v6378_v59  ;;  %2340 = vst [vmem:[#allocation2 + $0x1c] sm:$0x1] %v6378_v59 }
  0xe9   : > { %v2092_v21 = vor.u32 %v2091_v6, %v2088_v5  ;;  %2333 = vst [vmem:[#allocation2] sm:$0xf] %v6378_v59  ;;  %2334 = vst [vmem:[#allocation2 + $0x4] sm:$0x1] %v6378_v59  ;;  %5777 = vmatpush3.bf16.msra.mxu1 %v6274_v58  ;;  %v6847_v5 = vld [vmem:[%s7473_s8] ss:$0 sm:$0xff] }
  0xea   : > { %2335 = vst [vmem:[#allocation2 + $0x8] sm:$0xf] %v6378_v59  ;;  %2336 = vst [vmem:[#allocation2 + $0xc] sm:$0x1] %v6378_v59 }
  0xeb   : > { %5731 = vmatpush3.bf16.msra.mxu0 %v6253_v8  ;;  %v2105_v8 = vrot.slane %v2103_v60, 5  ;;  %2337 = vst [vmem:[#allocation2 + $0x10] sm:$0xf] %v6378_v59  ;;  %2338 = vst [vmem:[#allocation2 + $0x14] sm:$0x1] %v6378_v59  ;;  %v6275_v60 = vld [vmem:[%s7471_s6 + $0x48] sm:$0xff]  }
  0xec   : > { %5732 = vmatprep.subr.bf16.mxu0 %v6254_v9  ;;  %2341 = vst [vmem:[#allocation2 + $0x20] sm:$0xf] %v6378_v59  ;;  %2342 = vst [vmem:[#allocation2 + $0x24] sm:$0x1] %v6378_v59  ;;  %5778 = vmatprep.subr.bf16.mxu1 %v6275_v60 }
  0xed   : > { %v2106_v23 = vor.u32 %v2105_v8, %v2102_v7  ;;  %2343 = vst [vmem:[#allocation2 + $0x28] sm:$0xf] %v6378_v59  ;;  %2344 = vst [vmem:[#allocation2 + $0x2c] sm:$0x1] %v6378_v59  ;;  %5779 = vmatpush3.bf16.msra.mxu1 %v6275_v60  ;;  %v6852_v7 = vld [vmem:[%s7474_s9] ss:$0 sm:$0xff] }
  0xee   : > { %5725 = vmatmul.mubr.bf16.gmra.mrb[4].mxu0 %v6260_v10  ;;  %v5003_v10 = vld [vmem:[%s6476_s15 + $0x2c] sm:$0x1]  ;;  %2345 = vst [vmem:[#allocation2 + $0x30] sm:$0xf] %v6378_v59  ;;  %2346 = vst [vmem:[#allocation2 + $0x34] sm:$0x1] %v6378_v59 }
  0xef   : > { %5733 = vmatpush3.bf16.msra.mxu0 %v6254_v9  ;;  %5744 = vmatprep.mubr.bf16.mxu0 %v6262_v11  ;;  %v5008_v9 = vld [vmem:[%s6476_s15 + $0x40] sm:$0xf]  ;;  %v5005_v11 = vld [vmem:[%s6476_s15 + $0x34] sm:$0x1]  ;;  %v2107_v37 = vrot.slane %v2106_v23, 4 }
  0xf0   : > { %5734 = vmatprep.subr.bf16.mxu0 %v6255_v12  ;;  %v2128_v18 = vshrl.u32 %v5008_v9, 16  ;;  %v2131_v19 = vshll.u32 %v5008_v9, 16  ;;  %v2109_v24 = vshll.u32 %v5005_v11, 16  ;;  %2347 = vst [vmem:[#allocation2 + $0x38] sm:$0xf] %v6378_v59 }
  0xf1   : > { %2348 = vst [vmem:[#allocation2 + $0x3c] sm:$0x1] %v6378_v59  ;;  %2349 = vst [vmem:[#allocation2 + $0x40] sm:$0xf] %v6378_v59 }
  0xf2   : > { %v2130_v33 = vrot.slane %v2128_v18, 4  ;;  %v2111_v38 = vrot.slane %v2109_v24, 5  ;;  %2350 = vst [vmem:[#allocation2 + $0x44] sm:$0x1] %v6378_v59  ;;  %2351 = vst [vmem:[#allocation2 + $0x48] sm:$0xf] %v6378_v59 }
  0xf3   : > { %5735 = vmatpush3.bf16.msra.mxu0 %v6255_v12  ;;  %v2064_v12 = vor.u32 %v2063_v63, %v2060_v62  ;;  %2352 = vst [vmem:[#allocation2 + $0x4c] sm:$0x1] %v6378_v59  ;;  %v6277_v62 = vld [vmem:[%s7471_s6 + $0x58] sm:$0xff]   ;;  %v6278_v63 = vld [vmem:[%s7471_s6 + $0x60] sm:$0xff]  }
  0xf4   : > { %5736 = vmatprep.subr.bf16.mxu0 %v6256_v13  ;;  %v2112_v48 = vsel %vm6538_vm2, %v2107_v37, %v2111_v38  ;;  %v2476_v38 = vld [vmem:[#allocation2 + $0x18] sm:$0xf] }
  0xf5   : > { %v2065_v26 = vrot.slane %v2064_v12, 4 }
  0xf7   : > { %5737 = vmatpush3.bf16.msra.mxu0 %v6256_v13  ;;  %v2067_v13 = vshll.u32 %v4999_v2, 16  ;;  %v6281_v2 = vld [vmem:[%s7471_s6 + $0x78] sm:$0xff]  }
  0xf8   : > { %5738 = vmatprep.subr.bf16.mxu0 %v6257_v14 }
  0xf9   : > { %v2069_v27 = vrot.slane %v2067_v13, 5 }
  0xfb   : > { %5739 = vmatpush3.bf16.msra.mxu0 %v6257_v14  ;;  %v2078_v14 = vor.u32 %v2077_v1, %v2074_v0  ;;  %v2070_v40 = vsel %vm6538_vm2, %v2065_v26, %v2069_v27  ;;  %v6279_v0 = vld [vmem:[%s7471_s6 + $0x68] sm:$0xff]   ;;  %v6280_v1 = vld [vmem:[%s7471_s6 + $0x70] sm:$0xff]   ;;  %v6868_v27 = vld [vmem:[#allocation2 + $0x4] sm:$0x1] }
  0xfc   : > { %5740 = vmatprep.subr.bf16.mxu0 %v6259_v17 }
  0xfd   : > { %v2079_v28 = vrot.slane %v2078_v14, 4 }
  0xff   : > { %5741 = vmatpush3.bf16.msra.mxu0 %v6259_v17  ;;  %v2117_v17 = vshll.u32 %v5006_v4, 16  ;;  %v6842_v4 = vld [vmem:[#allocation2] sm:$0xf] }
 0x100   : > { %5742 = vmatprep.subr.bf16.mxu0 %v6261_v22  ;;  %v2545_v8 = vshrl.u32 %v6842_v4, 16  ;;  %v2548_v9 = vshll.u32 %v6842_v4, 16 }
 0x101   : > { %v2119_v32 = vrot.slane %v2117_v17, 5 }
 0x103   : > { %5743 = vmatpush3.bf16.msra.mxu0 %v6261_v22  ;;  %v2095_v22 = vshll.u32 %v5003_v10, 16  ;;  %v2120_v43 = vor.u32 %v2119_v32, %v2116_v31  ;;  %v2554_v32 = vshll.u32 %v6868_v27, 16 }
 0x104   : > { %5752 = vmatprep.subr.bf16.mxu0 %v6263_v29 }
 0x105   : > { %v2121_v52 = vrot.slane %v2120_v43, 4 }
 0x106   : > { %5745 = vmatmul.mubr.bf16.vlgmr.msra.gmra.mrb[0].mxu0 %v6264_v34  ;;  %v2133_v34 = vrot.slane %v2131_v19, 5  ;;  %v6862_v19 = vrot.slane %v2545_v8, 4 }
 0x107   : > { %5753 = vmatpush3.bf16.msra.mxu0 %v6263_v29  ;;  %5748 = vmatprep.mubr.bf16.mxu0 %v6270_v35  ;;  %v2083_v29 = vrot.slane %v2081_v15, 5  ;;  %v2093_v35 = vrot.slane %v2092_v21, 4 }
 0x108   : > { %5754 = vmatprep.subr.bf16.mxu0 %v6265_v36 }
 0x109   : > { %v2084_v42 = vsel %vm6538_vm2, %v2079_v28, %v2083_v29 }
 0x10b   : > { %5755 = vmatpush3.bf16.msra.mxu0 %v6265_v36  ;;  %v2097_v36 = vrot.slane %v2095_v22, 5 }
 0x10c   : > { %5756 = vmatprep.subr.bf16.mxu0 %v6266_v41 }
 0x10d   : > { %v2098_v47 = vsel %vm6538_vm2, %v2093_v35, %v2097_v36 }
 0x10e   : > { %5749 = vmatmul.mubr.bf16.gmra.mrb[4].mxu0 %v6271_v44  ;;  %v2134_v44 = vor.u32 %v2133_v34, %v2130_v33  ;;  %v5028_v51 = vcombine.low %v2098_v47, %v2112_v48  ;;  %v2461_v48 = vld [vmem:[#allocation2 + $0x8] sm:$0xf] }
 0x10f   : > { %5757 = vmatpush3.bf16.msra.mxu0 %v6266_v41  ;;  %5768 = vmatprep.mubr.bf16.mxu0 %v5026_v45  ;;  %v2123_v41 = vshll.u32 %v5007_v30, 16  ;;  %v2137_v45 = vshll.u32 %v5009_v39, 16  ;;  %v2479_v39 = vld [vmem:[#allocation2 + $0x1c] sm:$0x1] }
 0x110   : > { %5758 = vmatprep.subr.bf16.mxu0 %v6267_v49  ;;  %v2135_v53 = vrot.slane %v2134_v44, 4 }
 0x111   : > { %v2125_v50 = vrot.slane %v2123_v41, 5  ;;  %v2139_v54 = vrot.slane %v2137_v45, 5 }
 0x113   : > { %5759 = vmatpush3.bf16.msra.mxu0 %v6267_v49  ;;  %v5027_v49 = vcombine.low %v2070_v40, %v2084_v42  ;;  %v2126_v55 = vsel %vm6538_vm2, %v2121_v52, %v2125_v50 }
 0x114   : > { %5760 = vmatprep.subr.bf16.mxu0 %v6268_v56 }
 0x117   : > { %5761 = vmatpush3.bf16.msra.mxu0 %v6268_v56  ;;  %v2140_v56 = vsel %vm6538_vm2, %v2135_v53, %v2139_v54 }
 0x118   : > { %5762 = vmatprep.subr.bf16.mxu0 %v6269_v61  ;;  %v5029_v57 = vcombine.low %v2126_v55, %v2140_v56  ;;  %v2467_v55 = vld [vmem:[#allocation2 + $0xc] sm:$0x1] }
 0x11b   : > { %5763 = vmatpush3.bf16.msra.mxu0 %v6269_v61  ;;  %v6276_v61 = vld [vmem:[%s7471_s6 + $0x50] sm:$0xff]  }
 0x11c   : > { %5764 = vmatprep.subr.bf16.mxu0 %v6272_v20  ;;  %5780 = vmatprep.subr.bf16.mxu1 %v6276_v61 }
 0x11d   : > { %5781 = vmatpush3.bf16.msra.mxu1 %v6276_v61 }
 0x11e   : > { %5782 = vmatprep.subr.bf16.mxu1 %v6277_v62 }
 0x11f   : > { %5765 = vmatpush3.bf16.msra.mxu0 %v6272_v20  ;;  %v6864_v20 = vrot.slane %v2548_v9, 5 }
 0x120   : > { %5766 = vmatprep.subr.bf16.mxu0 %v6273_v25 }
 0x121   : > { %5783 = vmatpush3.bf16.msra.mxu1 %v6277_v62  ;;  %v2551_v31 = vor.u32 %v6864_v20, %v6862_v19  ;;  %v2482_v62 = vld [vmem:[#allocation2 + $0x20] sm:$0xf] }
 0x122   : > { %5784 = vmatprep.subr.bf16.mxu1 %v6278_v63 }
 0x123   : > { %5767 = vmatpush3.bf16.msra.mxu0 %v6273_v25 }
 0x125   : > { %5785 = vmatpush3.bf16.msra.mxu1 %v6278_v63 }
 0x126   : > { %5769 = vmatmul.mubr.bf16.vlgmr.msra.gmra.mrb[0].mxu0 %v5027_v49  ;;  %5786 = vmatprep.subr.bf16.mxu1 %v6279_v0 }
 0x127   : > { %5772 = vmatprep.mubr.bf16.mxu0 %v5028_v51 }
 0x129   : > { %5787 = vmatpush3.bf16.msra.mxu1 %v6279_v0 }
 0x12a   : > { %5788 = vmatprep.subr.bf16.mxu1 %v6280_v1 }
 0x12d   : > { %5789 = vmatpush3.bf16.msra.mxu1 %v6280_v1 }
 0x12e   : > { %5773 = vmatmul.mubr.bf16.gmra.mrb[4].mxu0 %v5029_v57  ;;  %5790 = vmatprep.subr.bf16.mxu1 %v6281_v2 }
 0x131   : > { %5791 = vmatpush3.bf16.msra.mxu1 %v6281_v2  ;;  %v2485_v2 = vld [vmem:[#allocation2 + $0x24] sm:$0x1] }
 0x132   : > { %5800 = vmatprep.subr.bf16.mxu1 %v6839_v3 }
 0x1f9   : > { %v5770_v6 = vpop.f32.mrb[0].mxu0 }
 0x1fa   : > { %v2304_v10 = vmul.f32 %v5770_v6, %v6847_v5  ;;  %v2256_v11 = vpop.f32.mrb[1].mxu0 }
 0x1fb   : > { %v2302_v12 = vmul.f32 %v6847_v5, %v2256_v11  ;;  %v5771_v13 = vpop.f32.mrb[2].mxu0 }
 0x1fc   : > { %v2319_v14 = vadd.f32 %v6852_v7, %v2304_v10  ;;  %v2305_v15 = vmul.f32 %v5771_v13, %v6847_v5  ;;  %v2259_v16 = vpop.f32.mrb[3].mxu0  ;;  %v2470_v13 = vld [vmem:[#allocation2 + $0x10] sm:$0xf] }
 0x1fd   : > { %v2317_v17 = vadd.f32 %v6852_v7, %v2302_v12  ;;  %v2303_v18 = vmul.f32 %v6847_v5, %v2259_v16 }
 0x1fe   : > { %v2327_v21 = vmax.f32 %v2319_v14, 0.0  ;;  %v2320_v22 = vadd.f32 %v6852_v7, %v2305_v15  ;;  %v2473_v14 = vld [vmem:[#allocation2 + $0x14] sm:$0x1] }
 0x1ff   : > { %v2325_v23 = vmax.f32 %v2317_v17, 0.0  ;;  %v2318_v24 = vadd.f32 %v6852_v7, %v2303_v18 }
 0x200   : > { %v5326_v25 = vpack.c.bf16 %v2327_v21, %v2327_v21  ;;  %v2328_v26 = vmax.f32 %v2320_v22, 0.0 }
 0x201   : > { %v5324_v28 = vpack.c.bf16 %v2325_v23, %v2325_v23  ;;  %v2326_v29 = vmax.f32 %v2318_v24, 0.0  ;;  %v5774_v30 = vpop.f32.mrb[4].mxu0 }
 0x202   : > { %v2394_v33 = vshrl.u32 %v5326_v25, 16  ;;  %v2397_v34 = vshll.u32 %v5326_v25, 16  ;;  %v5327_v35 = vpack.c.bf16 %v2328_v26, %v2328_v26  ;;  %v2308_v36 = vmul.f32 %v5774_v30, %v6847_v5  ;;  %v2272_v37 = vpop.f32.mrb[5].mxu0 }
 0x203   : > { %v2378_v40 = vshrl.u32 %v5324_v28, 16  ;;  %v2381_v41 = vshll.u32 %v5324_v28, 16  ;;  %v5325_v42 = vpack.c.bf16 %v2326_v29, %v2326_v29  ;;  %v2306_v43 = vmul.f32 %v6847_v5, %v2272_v37  ;;  %v5775_v44 = vpop.f32.mrb[6].mxu0 }
 0x204   : > { %v2396_v45 = vrot.slane %v2394_v33, 7  ;;  %v2402_v49 = vshrl.u32 %v5327_v35, 16  ;;  %v2405_v50 = vshll.u32 %v5327_v35, 16  ;;  %v2323_v51 = vadd.f32 %v6852_v7, %v2308_v36  ;;  %v2275_v52 = vpop.f32.mrb[7].mxu0 }
 0x205   : > { %v2380_v54 = vrot.slane %v2378_v40, 7  ;;  %v2386_v56 = vshrl.u32 %v5325_v42, 16  ;;  %v2389_v57 = vshll.u32 %v5325_v42, 16  ;;  %v2321_v58 = vadd.f32 %v6852_v7, %v2306_v43  ;;  %v2503_v40 = vld [vmem:[#allocation2 + $0x3c] sm:$0x1] }
 0x206   : > { %v2399_v59 = vor.u32 %v2397_v34, %v2396_v45  ;;  %v2400_v60 = vrot.slane %v2396_v45, 4  ;;  %v2404_v61 = vrot.slane %v2402_v49, 7  ;;  %v2331_v63 = vmax.f32 %v2323_v51, 0.0  ;;  %v2500_v34 = vld [vmem:[#allocation2 + $0x38] sm:$0xf] }
 0x207   : > { %v2383_v0 = vor.u32 %v2381_v41, %v2380_v54  ;;  %v2384_v1 = vrot.slane %v2380_v54, 4  ;;  %v2388_v6 = vrot.slane %v2386_v56, 7  ;;  %v2329_v8 = vmax.f32 %v2321_v58, 0.0  ;;  %v2488_v43 = vld [vmem:[#allocation2 + $0x28] sm:$0xf] }
 0x208   : > { %v2477_v9 = vsel %vm6877_vm7, %v2399_v59, %v2476_v38  ;;  %v2480_v10 = vsel %vm6884_vm8, %v2400_v60, %v2479_v39  ;;  %v2407_v11 = vor.u32 %v2405_v50, %v2404_v61  ;;  %v2408_v12 = vrot.slane %v2404_v61, 4 }
 0x209   : > { %2478 = vst [vmem:[#allocation2 + $0x18] sm:$0xf] %v2477_v9  ;;  %2481 = vst [vmem:[#allocation2 + $0x1c] sm:$0x1] %v2480_v10  ;;  %v2462_v15 = vsel %vm6877_vm7, %v2383_v0, %v2461_v48  ;;  %v2468_v16 = vsel %vm6884_vm8, %v2384_v1, %v2467_v55  ;;  %v2391_v17 = vor.u32 %v2389_v57, %v2388_v6  ;;  %v2392_v18 = vrot.slane %v2388_v6, 4 }
 0x20a   : > { %2463 = vst [vmem:[#allocation2 + $0x8] sm:$0xf] %v2462_v15  ;;  %2469 = vst [vmem:[#allocation2 + $0xc] sm:$0x1] %v2468_v16  ;;  %v2483_v21 = vsel %vm6877_vm7, %v2407_v11, %v2482_v62  ;;  %v2486_v22 = vsel %vm6884_vm8, %v2408_v12, %v2485_v2  ;;  %v5330_v23 = vpack.c.bf16 %v2331_v63, %v2331_v63  ;;  %v6912_v37 = vrot.slane %v2551_v31, 4 }
 0x20b   : > { %v5328_v24 = vpack.c.bf16 %v2329_v8, %v2329_v8  ;;  %2484 = vst [vmem:[#allocation2 + $0x20] sm:$0xf] %v2483_v21  ;;  %2487 = vst [vmem:[#allocation2 + $0x24] sm:$0x1] %v2486_v22  ;;  %v2471_v25 = vsel %vm6877_vm7, %v2391_v17, %v2470_v13  ;;  %v2474_v26 = vsel %vm6884_vm8, %v2392_v18, %v2473_v14  ;;  %v6916_v38 = vrot.slane %v2554_v32, 5 }
 0x20c   : > { %v2309_v28 = vmul.f32 %v5775_v44, %v6847_v5  ;;  %v2307_v29 = vmul.f32 %v6847_v5, %v2275_v52  ;;  %2472 = vst [vmem:[#allocation2 + $0x10] sm:$0xf] %v2471_v25  ;;  %2475 = vst [vmem:[#allocation2 + $0x14] sm:$0x1] %v2474_v26  ;;  %v2426_v30 = vshrl.u32 %v5330_v23, 16  ;;  %v2429_v5 = vshll.u32 %v5330_v23, 16 }
 0x20d   : > { %v2410_v33 = vshrl.u32 %v5328_v24, 16  ;;  %v2413_v42 = vshll.u32 %v5328_v24, 16  ;;  %v2491_v44 = vld [vmem:[#allocation2 + $0x2c] sm:$0x1]  ;;  %v2557_v54 = vsel %vm6538_vm2, %v6912_v37, %v6916_v38  ;;  %v2506_v0 = vld [vmem:[#allocation2 + $0x40] sm:$0xf] }
 0x20e   : > { %v2324_v35 = vadd.f32 %v6852_v7, %v2309_v28  ;;  %v2322_v36 = vadd.f32 %v6852_v7, %v2307_v29  ;;  %v2428_v39 = vrot.slane %v2426_v30, 7  ;;  %v2509_v1 = vld [vmem:[#allocation2 + $0x44] sm:$0x1]  ;;  %v2494_v6 = vld [vmem:[#allocation2 + $0x30] sm:$0xf] }
 0x20f   : > { %v2412_v41 = vrot.slane %v2410_v33, 7  ;;  %v2497_v14 = vld [vmem:[#allocation2 + $0x34] sm:$0x1] }
 0x210   : > { %v2332_v45 = vmax.f32 %v2324_v35, 0.0  ;;  %v2330_v48 = vmax.f32 %v2322_v36, 0.0  ;;  %v2431_v49 = vor.u32 %v2429_v5, %v2428_v39  ;;  %v2432_v7 = vrot.slane %v2428_v39, 4  ;;  %v6918_v19 = vld [vmem:[#allocation2 + $0x18] sm:$0xf] }
 0x211   : > { %v2415_v50 = vor.u32 %v2413_v42, %v2412_v41  ;;  %v2416_v51 = vrot.slane %v2412_v41, 4  ;;  %v6920_v52 = vld [vmem:[#allocation2 + $0x8] sm:$0xf]  ;;  %v6922_v32 = vld [vmem:[#allocation2 + $0xc] sm:$0x1]  ;;  %v2587_v63 = vshrl.u32 %v6918_v19, 16 }
 0x212   : > { %v5331_v20 = vpack.c.bf16 %v2332_v45, %v2332_v45  ;;  %v5329_v31 = vpack.c.bf16 %v2330_v48, %v2330_v48  ;;  %v2501_v55 = vsel %vm6877_vm7, %v2431_v49, %v2500_v34  ;;  %v2504_v56 = vsel %vm6884_vm8, %v2432_v7, %v2503_v40  ;;  %v6946_v21 = vld [vmem:[#allocation2 + $0x1c] sm:$0x1]  ;;  %v6950_v29 = vld [vmem:[#allocation2 + $0x20] sm:$0xf] }
 0x213   : > { %v2489_v57 = vsel %vm6877_vm7, %v2415_v50, %v2488_v43  ;;  %v2492_v58 = vsel %vm6884_vm8, %v2416_v51, %v2491_v44  ;;  %2502 = vst [vmem:[#allocation2 + $0x38] sm:$0xf] %v2501_v55  ;;  %2505 = vst [vmem:[#allocation2 + $0x3c] sm:$0x1] %v2504_v56  ;;  %v6936_v62 = vld [vmem:[#allocation2 + $0x10] sm:$0xf] }
 0x214   : > { %2490 = vst [vmem:[#allocation2 + $0x28] sm:$0xf] %v2489_v57  ;;  %2493 = vst [vmem:[#allocation2 + $0x2c] sm:$0x1] %v2492_v58  ;;  %v2434_v59 = vshrl.u32 %v5331_v20, 16  ;;  %v2437_v60 = vshll.u32 %v5331_v20, 16 }
 0x215   : > { %v2418_v61 = vshrl.u32 %v5329_v31, 16  ;;  %v2421_v2 = vshll.u32 %v5329_v31, 16  ;;  %v2559_v8 = vshrl.u32 %v6920_v52, 16  ;;  %v2562_v9 = vshll.u32 %v6920_v52, 16  ;;  %v6942_v11 = vld [vmem:[#allocation2 + $0x14] sm:$0x1] }
 0x216   : > { %v2568_v10 = vshll.u32 %v6922_v32, 16  ;;  %v2436_v12 = vrot.slane %v2434_v59, 7  ;;  %v2573_v15 = vshrl.u32 %v6936_v62, 16  ;;  %v2576_v16 = vshll.u32 %v6936_v62, 16  ;;  %v6966_v51 = vld [vmem:[#allocation2 + $0x24] sm:$0x1] }
 0x217   : > { %v2420_v13 = vrot.slane %v2418_v61, 7  ;;  %v2561_v17 = vrot.slane %v2559_v8, 4  ;;  %v2564_v18 = vrot.slane %v2562_v9, 5  ;;  %v2582_v22 = vshll.u32 %v6942_v11, 16 }
 0x218   : > { %v2590_v23 = vshll.u32 %v6918_v19, 16  ;;  %v2439_v24 = vor.u32 %v2437_v60, %v2436_v12  ;;  %v2440_v25 = vrot.slane %v2436_v12, 4  ;;  %v2570_v33 = vrot.slane %v2568_v10, 5 }
 0x219   : > { %v2423_v26 = vor.u32 %v2421_v2, %v2420_v13  ;;  %v2424_v28 = vrot.slane %v2420_v13, 4  ;;  %v2565_v30 = vor.u32 %v2564_v18, %v2561_v17  ;;  %v2575_v34 = vrot.slane %v2573_v15, 4 }
 0x21a   : > { %v2578_v35 = vrot.slane %v2576_v16, 5  ;;  %v2507_v36 = vsel %vm6877_vm7, %v2439_v24, %v2506_v0  ;;  %v2510_v39 = vsel %vm6884_vm8, %v2440_v25, %v2509_v1  ;;  %v2589_v43 = vrot.slane %v2587_v63, 4  ;;  %v6969_v31 = vld [vmem:[#allocation2 + $0x38] sm:$0xf]  ;;  %v6283_v0 = vld [vmem:[%s7471_s6 + $0x8] sm:$0xff]  }
 0x21b   : > { %v2495_v5 = vsel %vm6877_vm7, %v2423_v26, %v2494_v6  ;;  %v2498_v40 = vsel %vm6884_vm8, %v2424_v28, %v2497_v14  ;;  %2508 = vst [vmem:[#allocation2 + $0x40] sm:$0xf] %v2507_v36  ;;  %2511 = vst [vmem:[#allocation2 + $0x44] sm:$0x1] %v2510_v39  ;;  %v2566_v41 = vrot.slane %v2565_v30, 4  ;;  %v2592_v44 = vrot.slane %v2590_v23, 5 }
 0x21c   : > { %2496 = vst [vmem:[#allocation2 + $0x30] sm:$0xf] %v2495_v5  ;;  %2499 = vst [vmem:[#allocation2 + $0x34] sm:$0x1] %v2498_v40  ;;  %v2579_v42 = vor.u32 %v2578_v35, %v2575_v34  ;;  %v2584_v45 = vrot.slane %v2582_v22, 5  ;;  %v2596_v48 = vshll.u32 %v6946_v21, 16 }
 0x21d   : > { %v6961_v49 = vld [vmem:[#allocation2 + $0x28] sm:$0xf]  ;;  %v2601_v7 = vshrl.u32 %v6950_v29, 16  ;;  %v2571_v47 = vsel %vm6538_vm2, %v2566_v41, %v2570_v33  ;;  %v2593_v50 = vor.u32 %v2592_v44, %v2589_v43  ;;  %v2604_v20 = vshll.u32 %v6950_v29, 16  ;;  %v6978_v60 = vld [vmem:[#allocation2 + $0x2c] sm:$0x1] }
 0x21e   : > { %v2580_v53 = vrot.slane %v2579_v42, 4  ;;  %v5064_v55 = vcombine.low %v2557_v54, %v2571_v47  ;;  %v2598_v56 = vrot.slane %v2596_v48, 5  ;;  %v2615_v63 = vshrl.u32 %v6961_v49, 16  ;;  %v6986_v54 = vld [vmem:[#allocation2 + $0x3c] sm:$0x1]  ;;  %v6284_v40 = vld [vmem:[%s7471_s6 + $0x10] sm:$0xff]  }
 0x21f   : > { %v2603_v57 = vrot.slane %v2601_v7, 4  ;;  %v2594_v59 = vrot.slane %v2593_v50, 4  ;;  %v2606_v61 = vrot.slane %v2604_v20, 5  ;;  %v2610_v37 = vshll.u32 %v6966_v51, 16  ;;  %v2941_v23 = vld [vmem:[#allocation2 + $0x10] sm:$0xe] }
 0x220   : > { %v2585_v58 = vsel %vm6538_vm2, %v2580_v53, %v2584_v45  ;;  %5792 = vmatprep.mubr.bf16.mxu1 %v5064_v55  ;;  %v2618_v38 = vshll.u32 %v6961_v49, 16  ;;  %v2643_v1 = vshrl.u32 %v6969_v31, 16  ;;  %v2617_v8 = vrot.slane %v2615_v63, 4  ;;  %v2942_v36 = vld [vmem:[#allocation2 + $0x18] sm:$0xe] }
 0x221   : > { %v2599_v2 = vsel %vm6538_vm2, %v2594_v59, %v2598_v56  ;;  %v2607_v6 = vor.u32 %v2606_v61, %v2603_v57  ;;  %v2646_v9 = vshll.u32 %v6969_v31, 16  ;;  %v2624_v13 = vshll.u32 %v6978_v60, 16  ;;  %v6286_v55 = vld [vmem:[%s7471_s6 + $0x18] sm:$0xff]  }
 0x222   : > { %v5065_v10 = vcombine.low %v2585_v58, %v2599_v2  ;;  %v2620_v12 = vrot.slane %v2618_v38, 5  ;;  %v2976_v16 = vrot.slane %v6942_v11, 5  ;;  %v2612_v24 = vrot.slane %v2610_v37, 5  ;;  %v2946_v58 = vld [vmem:[#allocation2 + $0x38] sm:$0xe] }
 0x223   : > { %v6993_v14 = vld [vmem:[#allocation2 + $0x30] sm:$0xf]  ;;  %v2542_v15 = vld [vmem:[#allocation2 + $0x34] sm:$0x1]  ;;  %v2608_v17 = vrot.slane %v2607_v6, 4  ;;  %v2645_v26 = vrot.slane %v2643_v1, 4  ;;  %v5076_v1 = vcombine.low %v6842_v4, %v6920_v52 }
 0x224   : > { %v2629_v18 = vshrl.u32 %v6993_v14, 16  ;;  %v2632_v22 = vshll.u32 %v6993_v14, 16  ;;  %5793 = vmatmul.mubr.bf16.vlgmr.msra.gmra.mrb[0].mxu1 %v5065_v10  ;;  %v2621_v25 = vor.u32 %v2620_v12, %v2617_v8  ;;  %v2648_v28 = vrot.slane %v2646_v9, 5  ;;  %v2945_v20 = vld [vmem:[#allocation2 + $0x30] sm:$0xe]  ;;  %v6287_v8 = vld [vmem:[%s7471_s6 + $0x20] sm:$0xff]  }
 0x225   : > { %5801 = vmatpush3.bf16.msra.mxu1 %v6839_v3  ;;  %v2638_v34 = vshll.u32 %v2542_v15, 16  ;;  %v2652_v35 = vshll.u32 %v6986_v54, 16  ;;  %v2980_v11 = vrot.slane %v6946_v21, 5  ;;  %v2626_v5 = vrot.slane %v2624_v13, 5  ;;  %v6288_v52 = vld [vmem:[%s7471_s6 + $0x28] sm:$0xff]   ;;  %v6290_v12 = vld [vmem:[%s7471_s6 + $0x38] sm:$0xff]  }
 0x226   : > { %v2631_v30 = vrot.slane %v2629_v18, 4  ;;  %v2634_v33 = vrot.slane %v2632_v22, 5  ;;  %5802 = vmatprep.subr.bf16.mxu1 %v6283_v0  ;;  %v2622_v39 = vrot.slane %v2621_v25, 4  ;;  %v2649_v41 = vor.u32 %v2648_v28, %v2645_v26  ;;  %v6292_v13 = vld [vmem:[%s7471_s6 + $0x80] sm:$0xff]   ;;  %v6294_v18 = vld [vmem:[%s7471_s6 + $0x88] sm:$0xff]   ;;  %v6369_v43 = vld [vmem:[%s7254_s16 + $0x18] sm:$0xff]  }
 0x227   : > { %v2613_v42 = vsel %vm6538_vm2, %v2608_v17, %v2612_v24  ;;  %v5090_v45 = vrot.slane %v2941_v23, 9  ;;  %v5091_v48 = vrot.slane %v2942_v36, 9  ;;  %v2640_v53 = vrot.slane %v2638_v34, 5  ;;  %v6298_v28 = vld [vmem:[%s7471_s6 + $0xa0] sm:$0xff]  }
 0x228   : > { %v2635_v3 = vor.u32 %v2634_v33, %v2631_v30  ;;  %v2627_v21 = vsel %vm6538_vm2, %v2622_v39, %v2626_v5  ;;  %v2650_v44 = vrot.slane %v2649_v41, 4  ;;  %v2654_v50 = vrot.slane %v2652_v35, 5  ;;  %v2944_v30 = vld [vmem:[#allocation2 + $0x28] sm:$0xe]  ;;  %v6301_v33 = vld [vmem:[%s7471_s6 + $0xb8] sm:$0xff]  }
 0x229   : > { %5803 = vmatpush3.bf16.msra.mxu1 %v6283_v0  ;;  %v5066_v7 = vcombine.low %v2613_v42, %v2627_v21  ;;  %v7019_v56 = vsel %vm7008_vm11, %v5090_v45, %v2976_v16  ;;  %v7023_v57 = vsel %vm7008_vm11, %v5091_v48, %v2980_v11  ;;  %v5094_v37 = vrot.slane %v2945_v20, 9  ;;  %v2940_v16 = vld [vmem:[#allocation2 + $0x8] sm:$0xe]  ;;  %v2943_v34 = vld [vmem:[#allocation2 + $0x20] sm:$0xe]  ;;  %v6310_v20 = vld [vmem:[%s7471_s6 + $0xf8] sm:$0xff]  }
 0x22a   : > { %v2636_v47 = vrot.slane %v2635_v3, 4  ;;  %5804 = vmatprep.subr.bf16.mxu1 %v6284_v40  ;;  %v2655_v61 = vsel %vm6538_vm2, %v2650_v44, %v2654_v50  ;;  %v5113_v63 = vcombine.low %v7019_v56, %v7023_v57  ;;  %v2992_v38 = vrot.slane %v2542_v15, 5  ;;  %v2939_v15 = vld [vmem:[#allocation2] sm:$0xe]  ;;  %v6306_v3 = vld [vmem:[%s7471_s6 + $0xd8] sm:$0xff]   ;;  %v6308_v45 = vld [vmem:[%s7471_s6 + $0xe8] sm:$0xff]  }
 0x22b   : > { %5796 = vmatprep.mubr.bf16.mxu1 %v5066_v7  ;;  %v5095_v2 = vrot.slane %v2946_v58, 9  ;;  %v2996_v6 = vrot.slane %v6986_v54, 5  ;;  %v6289_v54 = vld [vmem:[%s7471_s6 + $0x30] sm:$0xff]   ;;  %v5077_v17 = vcombine.low %v6936_v62, %v6918_v19  ;;  %v5078_v22 = vcombine.low %v6950_v29, %v6961_v49  ;;  %v6302_v11 = vld [vmem:[%s7471_s6 + $0xc0] sm:$0xff]  }
 0x22c   : > { %v2641_v59 = vsel %vm6538_vm2, %v2636_v47, %v2640_v53  ;;  %v7039_v9 = vsel %vm7008_vm11, %v5094_v37, %v2992_v38  ;;  %v2968_v23 = vrot.slane %v6868_v27, 5  ;;  %v2972_v24 = vrot.slane %v6922_v32, 5  ;;  %v6296_v19 = vld [vmem:[%s7471_s6 + $0x90] sm:$0xff]   ;;  %v6297_v32 = vld [vmem:[%s7471_s6 + $0x98] sm:$0xff]   ;;  %v6307_v44 = vld [vmem:[%s7471_s6 + $0xe0] sm:$0xff]  }
 0x22d   : > { %v5067_v0 = vcombine.low %v2641_v59, %v2655_v61  ;;  %5805 = vmatpush3.bf16.msra.mxu1 %v6284_v40  ;;  %v7043_v10 = vsel %vm7008_vm11, %v5095_v2, %v2996_v6  ;;  %v5088_v25 = vrot.slane %v2939_v15, 9  ;;  %v5089_v26 = vrot.slane %v2940_v16, 9  ;;  %v6305_v21 = vld [vmem:[#allocation2 + $0x8] ss:$8 sps:$4 sm:$0xff]   ;;  %v6312_v59 = vld [vmem:[%s7471_s6 + $0x100] sm:$0xff]  }
 0x22e   : > { %5806 = vmatprep.subr.bf16.mxu1 %v6286_v55  ;;  %v5115_v4 = vcombine.low %v7039_v9, %v7043_v10  ;;  %v5079_v27 = vcombine.low %v6993_v14, %v6969_v31  ;;  %v6299_v31 = vld [vmem:[%s7471_s6 + $0xa8] sm:$0xff]   ;;  %v6300_v14 = vld [vmem:[%s7471_s6 + $0xb0] sm:$0xff]   ;;  %v5093_v35 = vrot.slane %v2944_v30, 9  ;;  %v2988_v36 = vrot.slane %v6978_v60, 5 }
 0x22f   : > { %5797 = vmatmul.mubr.bf16.gmra.mrb[4].mxu1 %v5067_v0  ;;  %v2969_v62 = vsel %vm7008_vm11, %v5088_v25, %v2968_v23  ;;  %v2973_v29 = vsel %vm7008_vm11, %v5089_v26, %v2972_v24  ;;  %v5092_v39 = vrot.slane %v2943_v34, 9  ;;  %v2984_v5 = vrot.slane %v6966_v51, 5  ;;  %v6303_v60 = vld [vmem:[%s7471_s6 + $0xc8] sm:$0xff]   ;;  %v6304_v51 = vld [vmem:[%s7471_s6 + $0xd0] sm:$0xff]   ;;  %v6317_v23 = vld [vmem:[%s7471_s6 + $0x118] sm:$0xff]  }
 0x230   : > { %5816 = vmatprep.mubr.bf16.mxu1 %v5076_v1  ;;  %v5112_v49 = vcombine.low %v2969_v62, %v2973_v29  ;;  %v2989_v40 = vsel %vm7008_vm11, %v5093_v35, %v2988_v36  ;;  %v3324_v48 = vld [vmem:[#allocation2 + $0x10] sm:$0xf]  ;;  %v3322_v47 = vld [vmem:[#allocation2 + $0x8] sm:$0xf]  ;;  %v7131_v0 = vld [vmem:[#allocation2 + $0x14] sm:$0x1] }
 0x231   : > { %5807 = vmatpush3.bf16.msra.mxu1 %v6286_v55  ;;  %v2985_v41 = vsel %vm7008_vm11, %v5092_v39, %v2984_v5  ;;  %v6309_v7 = vld [vmem:[%s7471_s6 + $0xf0] sm:$0xff]   ;;  %v3353_v53 = vshrl.u32 %v3324_v48, 16  ;;  %v3356_v50 = vshll.u32 %v3324_v48, 16  ;;  %v3339_v55 = vshrl.u32 %v3322_v47, 16  ;;  %v7133_v38 = vld [vmem:[#allocation2 + $0xc] sm:$0x1] }
 0x232   : > { %5808 = vmatprep.subr.bf16.mxu1 %v6287_v8  ;;  %v5114_v42 = vcombine.low %v2985_v41, %v2989_v40  ;;  %v3342_v56 = vshll.u32 %v3322_v47, 16  ;;  %v6311_v1 = vld [vmem:[#allocation2 + $0x18] ss:$8 sps:$4 sm:$0xff]   ;;  %v6314_v2 = vld [vmem:[%s7471_s6 + $0x108] sm:$0xff]   ;;  %v3348_v10 = vshll.u32 %v7133_v38, 16 }
 0x233   : > { %v3355_v57 = vrot.slane %v3353_v53, 4  ;;  %v3358_v58 = vrot.slane %v3356_v50, 5  ;;  %v3341_v61 = vrot.slane %v3339_v55, 4  ;;  %v6313_v9 = vld [vmem:[#allocation2 + $0x28] ss:$8 sps:$4 sm:$0xff]   ;;  %v6318_v29 = vld [vmem:[%s7471_s6 + $0x120] sm:$0xff]  }
 0x234   : > { %v7152_v15 = vld [vmem:[%s7472_s7 + $0x8] sm:$0xff]   ;;  %v3350_v16 = vrot.slane %v3348_v10, 5  ;;  %v3328_v25 = vld [vmem:[#allocation2 + $0x20] sm:$0xf]  ;;  %v3326_v26 = vld [vmem:[#allocation2 + $0x18] sm:$0xf] }
 0x235   : > { %5809 = vmatpush3.bf16.msra.mxu1 %v6287_v8  ;;  %v3359_v37 = vor.u32 %v3358_v58, %v3355_v57  ;;  %v3362_v8 = vshll.u32 %v7131_v0, 16  ;;  %v3332_v62 = vld [vmem:[#allocation2 + $0x30] sm:$0xf]  ;;  %v6319_v34 = vld [vmem:[%s7471_s6 + $0x128] sm:$0xff]   ;;  %v7186_v5 = vld [vmem:[%s7472_s7 + $0x20] sm:$0xff]  }
 0x236   : > { %5810 = vmatprep.subr.bf16.mxu1 %v6288_v52  ;;  %v3409_v30 = vshrl.u32 %v3332_v62, 16  ;;  %v7200_v53 = vld [vmem:[%s7472_s7 + $0x28] sm:$0xff]  }
 0x237   : > { %v7206_v58 = vld [vmem:[#allocation2 + $0x2c] sm:$0x1] }
 0x239   : > { %5811 = vmatpush3.bf16.msra.mxu1 %v6288_v52  ;;  %v7143_v52 = vld [vmem:[%s7472_s7] sm:$0xff]  }
 0x23a   : > { %5812 = vmatprep.subr.bf16.mxu1 %v6289_v54  ;;  %5992 = vmatprep.subr.bf16.mxu0 %v7143_v52 }
 0x23b   : > { %5993 = vmatpush3.bf16.msra.mxu0 %v7143_v52 }
 0x23c   : > { %5994 = vmatprep.subr.bf16.mxu0 %v7152_v15 }
 0x23d   : > { %5813 = vmatpush3.bf16.msra.mxu1 %v6289_v54  ;;  %v6316_v54 = vld [vmem:[%s7471_s6 + $0x110] sm:$0xff]  }
 0x23e   : > { %5814 = vmatprep.subr.bf16.mxu1 %v6290_v12 }
 0x23f   : > { %5995 = vmatpush3.bf16.msra.mxu0 %v7152_v15 }
 0x241   : > { %5815 = vmatpush3.bf16.msra.mxu1 %v6290_v12 }
 0x242   : > { %5824 = vmatprep.subr.bf16.mxu1 %v6292_v13 }
 0x244   : > { %5817 = vmatmul.mubr.bf16.vlgmr.msra.gmra.mrb[0].mxu1 %v5077_v17 }
 0x245   : > { %5820 = vmatprep.mubr.bf16.mxu1 %v5078_v22  ;;  %5825 = vmatpush3.bf16.msra.mxu1 %v6292_v13  ;;  %v3364_v13 = vrot.slane %v3362_v8, 5 }
 0x246   : > { %5826 = vmatprep.subr.bf16.mxu1 %v6294_v18 }
 0x249   : > { %5827 = vmatpush3.bf16.msra.mxu1 %v6294_v18  ;;  %v6315_v18 = vld [vmem:[#allocation2 + $0x38] ss:$8 sps:$4 sm:$0xff]  }
 0x24a   : > { %5828 = vmatprep.subr.bf16.mxu1 %v6296_v19 }
 0x24c   : > { %5821 = vmatmul.mubr.bf16.gmra.mrb[4].mxu1 %v5079_v27  ;;  %v3381_v27 = vshrl.u32 %v3328_v25, 16 }
 0x24d   : > { %5829 = vmatpush3.bf16.msra.mxu1 %v6296_v19  ;;  %5840 = vmatprep.mubr.bf16.mxu1 %v5112_v49  ;;  %v7167_v19 = vld [vmem:[%s7472_s7 + $0x10] sm:$0xff]   ;;  %v7176_v49 = vld [vmem:[%s7472_s7 + $0x18] sm:$0xff]  }
 0x24e   : > { %5830 = vmatprep.subr.bf16.mxu1 %v6297_v32  ;;  %5996 = vmatprep.subr.bf16.mxu0 %v7167_v19  ;;  %v3383_v35 = vrot.slane %v3381_v27, 4 }
 0x24f   : > { %5997 = vmatpush3.bf16.msra.mxu0 %v7167_v19 }
 0x250   : > { %5998 = vmatprep.subr.bf16.mxu0 %v7176_v49 }
 0x251   : > { %5831 = vmatpush3.bf16.msra.mxu1 %v6297_v32  ;;  %v3384_v32 = vshll.u32 %v3328_v25, 16 }
 0x252   : > { %5832 = vmatprep.subr.bf16.mxu1 %v6298_v28 }
 0x253   : > { %v3386_v36 = vrot.slane %v3384_v32, 5  ;;  %5999 = vmatpush3.bf16.msra.mxu0 %v7176_v49  ;;  %v7235_v32 = vld [vmem:[%s7472_s7 + $0x38] sm:$0xff]  }
 0x254   : > { %6000 = vmatprep.subr.bf16.mxu0 %v7186_v5 }
 0x255   : > { %5833 = vmatpush3.bf16.msra.mxu1 %v6298_v28  ;;  %v3367_v28 = vshrl.u32 %v3326_v26, 16  ;;  %v3387_v48 = vor.u32 %v3386_v36, %v3383_v35 }
 0x256   : > { %5834 = vmatprep.subr.bf16.mxu1 %v6299_v31 }
 0x257   : > { %v3369_v40 = vrot.slane %v3367_v28, 4  ;;  %6001 = vmatpush3.bf16.msra.mxu0 %v7186_v5 }
 0x258   : > { %6002 = vmatprep.subr.bf16.mxu0 %v7200_v53 }
 0x259   : > { %5835 = vmatpush3.bf16.msra.mxu1 %v6299_v31  ;;  %v3370_v31 = vshll.u32 %v3326_v26, 16 }
 0x25a   : > { %5836 = vmatprep.subr.bf16.mxu1 %v6300_v14 }
 0x25b   : > { %v3372_v41 = vrot.slane %v3370_v31, 5  ;;  %6003 = vmatpush3.bf16.msra.mxu0 %v7200_v53  ;;  %v3605_v31 = vld [vmem:[#allocation2 + $0x10] sm:$0xe] }
 0x25d   : > { %5837 = vmatpush3.bf16.msra.mxu1 %v6300_v14  ;;  %v3330_v14 = vld [vmem:[#allocation2 + $0x28] sm:$0xf]  ;;  %v3373_v50 = vor.u32 %v3372_v41, %v3369_v40 }
 0x25e   : > { %5838 = vmatprep.subr.bf16.mxu1 %v6301_v33  ;;  %v3398_v39 = vshll.u32 %v3330_v14, 16  ;;  %v3604_v41 = vld [vmem:[#allocation2 + $0x8] sm:$0xe] }
 0x25f   : > { %v3374_v10 = vrot.slane %v3373_v50, 4  ;;  %v3630_v50 = vrot.slane %v7133_v38, 5  ;;  %v6325_v38 = vld [vmem:[%s7471_s6 + $0x158] sm:$0xff]  }
 0x260   : > { %v3400_v47 = vrot.slane %v3398_v39, 5  ;;  %v6323_v39 = vld [vmem:[%s7471_s6 + $0x148] sm:$0xff]  }
 0x261   : > { %5839 = vmatpush3.bf16.msra.mxu1 %v6301_v33  ;;  %v3412_v33 = vshll.u32 %v3332_v62, 16 }
 0x262   : > { %5848 = vmatprep.subr.bf16.mxu1 %v6302_v11 }
 0x264   : > { %5841 = vmatmul.mubr.bf16.vlgmr.msra.gmra.mrb[0].mxu1 %v5113_v63  ;;  %v3344_v63 = vrot.slane %v3342_v56, 5 }
 0x265   : > { %5844 = vmatprep.mubr.bf16.mxu1 %v5114_v42  ;;  %5849 = vmatpush3.bf16.msra.mxu1 %v6302_v11  ;;  %v3395_v11 = vshrl.u32 %v3330_v14, 16  ;;  %v3414_v42 = vrot.slane %v3412_v33, 5 }
 0x266   : > { %5850 = vmatprep.subr.bf16.mxu1 %v6303_v60  ;;  %v3345_v6 = vor.u32 %v3344_v63, %v3341_v61 }
 0x268   : > { %v3346_v12 = vrot.slane %v3345_v6, 4 }
 0x269   : > { %5851 = vmatpush3.bf16.msra.mxu1 %v6303_v60  ;;  %v3411_v60 = vrot.slane %v3409_v30, 4 }
 0x26a   : > { %5852 = vmatprep.subr.bf16.mxu1 %v6304_v51  ;;  %v3351_v22 = vsel %vm6538_vm2, %v3346_v12, %v3350_v16 }
 0x26c   : > { %5845 = vmatmul.mubr.bf16.gmra.mrb[4].mxu1 %v5115_v4  ;;  %v3360_v4 = vrot.slane %v3359_v37, 4 }
 0x26d   : > { %5853 = vmatpush3.bf16.msra.mxu1 %v6304_v51  ;;  %5864 = vmatprep.mubr.bf16.mxu1 %v6305_v21  ;;  %v3336_v51 = vld [vmem:[#allocation2 + $0x40] sm:$0xf]  ;;  %v3334_v21 = vld [vmem:[#allocation2 + $0x38] sm:$0xf] }
 0x26e   : > { %5854 = vmatprep.subr.bf16.mxu1 %v6306_v3  ;;  %v3365_v17 = vsel %vm6538_vm2, %v3360_v4, %v3364_v13  ;;  %v3437_v55 = vshrl.u32 %v3336_v51, 16  ;;  %v3440_v56 = vshll.u32 %v3336_v51, 16  ;;  %v3423_v61 = vshrl.u32 %v3334_v21, 16 }
 0x26f   : > { %v5168_v24 = vcombine.low %v3351_v22, %v3365_v17  ;;  %v3426_v63 = vshll.u32 %v3334_v21, 16  ;;  %v3404_v4 = vshll.u32 %v7206_v58, 16 }
 0x270   : > { %v3439_v12 = vrot.slane %v3437_v55, 4  ;;  %v3442_v13 = vrot.slane %v3440_v56, 5 }
 0x271   : > { %5855 = vmatpush3.bf16.msra.mxu1 %v6306_v3  ;;  %v7190_v3 = vld [vmem:[#allocation2 + $0x24] sm:$0x1]  ;;  %v3428_v22 = vrot.slane %v3426_v63, 5  ;;  %v3406_v30 = vrot.slane %v3404_v4, 5  ;;  %v6329_v4 = vld [vmem:[%s7471_s6 + $0x178] sm:$0xff]  }
 0x272   : > { %5856 = vmatprep.subr.bf16.mxu1 %v6307_v44  ;;  %v3390_v57 = vshll.u32 %v7190_v3, 16  ;;  %v3443_v28 = vor.u32 %v3442_v13, %v3439_v12  ;;  %v3606_v12 = vld [vmem:[#allocation2 + $0x18] sm:$0xe] }
 0x274   : > { %v3392_v16 = vrot.slane %v3390_v57, 5  ;;  %v3444_v21 = vrot.slane %v3443_v28, 4  ;;  %v3611_v28 = vld [vmem:[#allocation2 + $0x40] sm:$0xe] }
 0x275   : > { %5857 = vmatpush3.bf16.msra.mxu1 %v6307_v44  ;;  %v6320_v44 = vld [vmem:[%s7471_s6 + $0x130] sm:$0xff]  }
 0x276   : > { %5858 = vmatprep.subr.bf16.mxu1 %v6308_v45 }
 0x279   : > { %5859 = vmatpush3.bf16.msra.mxu1 %v6308_v45  ;;  %v7195_v45 = vld [vmem:[#allocation2 + $0x1c] sm:$0x1] }
 0x27a   : > { %5860 = vmatprep.subr.bf16.mxu1 %v6309_v7  ;;  %v3376_v37 = vshll.u32 %v7195_v45, 16 }
 0x27d   : > { %5861 = vmatpush3.bf16.msra.mxu1 %v6309_v7  ;;  %v3397_v7 = vrot.slane %v3395_v11, 4 }
 0x27e   : > { %5862 = vmatprep.subr.bf16.mxu1 %v6310_v20 }
 0x27f   : > { %v3401_v6 = vor.u32 %v3400_v47, %v3397_v7  ;;  %v6367_v7 = vld [vmem:[%s7254_s16 + $0x8] sm:$0xff]   ;;  %v5180_v47 = vrot.slane %v3604_v41, 9 }
 0x281   : > { %5863 = vmatpush3.bf16.msra.mxu1 %v6310_v20  ;;  %v7202_v20 = vld [vmem:[#allocation2 + $0x34] sm:$0x1]  ;;  %v3402_v26 = vrot.slane %v3401_v6, 4  ;;  %v3631_v63 = vsel %vm7008_vm11, %v5180_v47, %v3630_v50 }
 0x282   : > { %5872 = vmatprep.subr.bf16.mxu1 %v6312_v59  ;;  %v3418_v8 = vshll.u32 %v7202_v20, 16  ;;  %v6328_v6 = vld [vmem:[%s7471_s6 + $0x170] sm:$0xff]  }
 0x283   : > { %v3407_v11 = vsel %vm6538_vm2, %v3402_v26, %v3406_v30 }
 0x284   : > { %5865 = vmatmul.mubr.bf16.vlgmr.msra.gmra.mrb[0].mxu1 %v6311_v1  ;;  %v6321_v1 = vld [vmem:[%s7471_s6 + $0x138] sm:$0xff]   ;;  %v3420_v62 = vrot.slane %v3418_v8, 5  ;;  %v3607_v8 = vld [vmem:[#allocation2 + $0x20] sm:$0xe] }
 0x285   : > { %5868 = vmatprep.mubr.bf16.mxu1 %v6313_v9  ;;  %5873 = vmatpush3.bf16.msra.mxu1 %v6312_v59  ;;  %v3415_v59 = vor.u32 %v3414_v42, %v3411_v60  ;;  %v7217_v9 = vld [vmem:[%s7472_s7 + $0x30] sm:$0xff]   ;;  %v5181_v60 = vrot.slane %v3605_v31, 9  ;;  %v3634_v42 = vrot.slane %v7131_v0, 5  ;;  %v5183_v13 = vrot.slane %v3607_v8, 9 }
 0x286   : > { %5874 = vmatprep.subr.bf16.mxu1 %v6314_v2  ;;  %6004 = vmatprep.subr.bf16.mxu0 %v7217_v9  ;;  %v6324_v0 = vld [vmem:[%s7471_s6 + $0x150] sm:$0xff]  }
 0x287   : > { %v3416_v17 = vrot.slane %v3415_v59, 4  ;;  %6005 = vmatpush3.bf16.msra.mxu0 %v7217_v9  ;;  %v3635_v57 = vsel %vm7008_vm11, %v5181_v60, %v3634_v42  ;;  %v6333_v60 = vld [vmem:[#allocation2 + $0x10] ss:$8 sps:$4 sm:$0xff]   ;;  %v6336_v42 = vld [vmem:[%s7471_s6 + $0x1a8] sm:$0xff]  }
 0x288   : > { %6006 = vmatprep.subr.bf16.mxu0 %v7235_v32 }
 0x289   : > { %5875 = vmatpush3.bf16.msra.mxu1 %v6314_v2  ;;  %v3388_v2 = vrot.slane %v3387_v48, 4  ;;  %v3421_v33 = vsel %vm6538_vm2, %v3416_v17, %v3420_v62  ;;  %v3608_v17 = vld [vmem:[#allocation2 + $0x28] sm:$0xe]  ;;  %v3646_v62 = vrot.slane %v7206_v58, 5 }
 0x28a   : > { %5876 = vmatprep.subr.bf16.mxu1 %v6316_v54  ;;  %v5170_v51 = vcombine.low %v3407_v11, %v3421_v33  ;;  %v5184_v26 = vrot.slane %v3608_v17, 9  ;;  %v6331_v58 = vld [vmem:[%s7471_s6 + $0x188] sm:$0xff]   ;;  %v5187_v33 = vrot.slane %v3611_v28, 9  ;;  %v6332_v11 = vld [vmem:[%s7471_s6 + $0x190] sm:$0xff]   ;;  %v3989_v28 = vld [vmem:[#allocation2 + $0x20] sm:$0xf] }
 0x28b   : > { %v3393_v25 = vsel %vm6538_vm2, %v3388_v2, %v3392_v16  ;;  %6007 = vmatpush3.bf16.msra.mxu0 %v7235_v32  ;;  %v6327_v2 = vld [vmem:[%s7471_s6 + $0x168] sm:$0xff]   ;;  %v3642_v16 = vrot.slane %v7190_v3, 5 }
 0x28c   : > { %5869 = vmatmul.mubr.bf16.gmra.mrb[4].mxu1 %v6315_v18  ;;  %v3425_v18 = vrot.slane %v3423_v61, 4  ;;  %v3647_v31 = vsel %vm7008_vm11, %v5184_v26, %v3646_v62  ;;  %v3991_v62 = vld [vmem:[#allocation2 + $0x28] sm:$0xf] }
 0x28d   : > { %5877 = vmatpush3.bf16.msra.mxu1 %v6316_v54  ;;  %5888 = vmatprep.mubr.bf16.mxu1 %v5168_v24  ;;  %v7220_v54 = vld [vmem:[#allocation2 + $0x44] sm:$0x1] }
 0x28e   : > { %5878 = vmatprep.subr.bf16.mxu1 %v6317_v23  ;;  %v6322_v24 = vld [vmem:[%s7471_s6 + $0x140] sm:$0xff]   ;;  %v3446_v27 = vshll.u32 %v7220_v54, 16 }
 0x290   : > { %v3448_v40 = vrot.slane %v3446_v27, 5  ;;  %v3643_v27 = vsel %vm7008_vm11, %v5183_v13, %v3642_v16  ;;  %v6344_v13 = vld [vmem:[%s7471_s6 + $0x1d0] sm:$0xff]  }
 0x291   : > { %5879 = vmatpush3.bf16.msra.mxu1 %v6317_v23  ;;  %v3378_v23 = vrot.slane %v3376_v37, 5  ;;  %v5204_v37 = vcombine.low %v3631_v63, %v3635_v57  ;;  %v6340_v57 = vld [vmem:[%s7471_s6 + $0x1c0] sm:$0xff]   ;;  %v7331_v63 = vld [vmem:[#allocation2 + $0x14] sm:$0x1] }
 0x292   : > { %5880 = vmatprep.subr.bf16.mxu1 %v6318_v29  ;;  %v3449_v56 = vsel %vm6538_vm2, %v3444_v21, %v3448_v40  ;;  %v6337_v21 = vld [vmem:[%s7471_s6 + $0x1b0] sm:$0xff]  }
 0x293   : > { %v3379_v14 = vsel %vm6538_vm2, %v3374_v10, %v3378_v23  ;;  %v3609_v10 = vld [vmem:[#allocation2 + $0x30] sm:$0xe]  ;;  %v5182_v23 = vrot.slane %v3606_v12, 9 }
 0x294   : > { %v5169_v35 = vcombine.low %v3379_v14, %v3393_v25  ;;  %v6330_v25 = vld [vmem:[%s7471_s6 + $0x180] sm:$0xff]   ;;  %v3610_v14 = vld [vmem:[#allocation2 + $0x38] sm:$0xe] }
 0x295   : > { %5881 = vmatpush3.bf16.msra.mxu1 %v6318_v29  ;;  %v7229_v29 = vld [vmem:[#allocation2 + $0x3c] sm:$0x1] }
 0x296   : > { %5882 = vmatprep.subr.bf16.mxu1 %v6319_v34  ;;  %v3432_v36 = vshll.u32 %v7229_v29, 16 }
 0x298   : > { %v3434_v55 = vrot.slane %v3432_v36, 5  ;;  %v3654_v36 = vrot.slane %v7229_v29, 5  ;;  %v6335_v29 = vld [vmem:[%s7471_s6 + $0x1a0] sm:$0xff]  }
 0x299   : > { %5883 = vmatpush3.bf16.msra.mxu1 %v6319_v34  ;;  %v3429_v34 = vor.u32 %v3428_v22, %v3425_v18  ;;  %v5185_v18 = vrot.slane %v3609_v10, 9  ;;  %v3650_v22 = vrot.slane %v7202_v20, 5  ;;  %v6341_v10 = vld [vmem:[#allocation2 + $0x30] ss:$8 sps:$4 sm:$0xff]  }
 0x29a   : > { %5884 = vmatprep.subr.bf16.mxu1 %v6320_v44 }
 0x29b   : > { %v3430_v48 = vrot.slane %v3429_v34, 4  ;;  %v3651_v3 = vsel %vm7008_vm11, %v5185_v18, %v3650_v22  ;;  %v3658_v34 = vrot.slane %v7220_v54, 5  ;;  %v6334_v54 = vld [vmem:[%s7471_s6 + $0x198] sm:$0xff]  }
 0x29c   : > { %v5206_v30 = vcombine.low %v3647_v31, %v3651_v3  ;;  %v6346_v3 = vld [vmem:[%s7471_s6 + $0x1e0] sm:$0xff]   ;;  %v3995_v31 = vld [vmem:[#allocation2 + $0x38] sm:$0xf] }
 0x29d   : > { %5885 = vmatpush3.bf16.msra.mxu1 %v6320_v44  ;;  %v6366_v44 = vld [vmem:[%s7254_s16] sm:$0xff]   ;;  %v3435_v59 = vsel %vm6538_vm2, %v3430_v48, %v3434_v55 }
 0x29e   : > { %5886 = vmatprep.subr.bf16.mxu1 %v6321_v1  ;;  %6008 = vmatprep.mubr.bf16.mxu0 %v6366_v44  ;;  %v5171_v61 = vcombine.low %v3435_v59, %v3449_v56  ;;  %v3987_v44 = vld [vmem:[#allocation2 + $0x18] sm:$0xf] }
 0x29f   : > { %6009 = vmatmul.mubr.bf16.vlgmr.msra.gmra.mrb[8].mxu0 %v6367_v7  ;;  %v4016_v47 = vshrl.u32 %v3987_v44, 16  ;;  %v4019_v50 = vshll.u32 %v3987_v44, 16  ;;  %v7359_v44 = vld [vmem:[#allocation2 + $0x2c] sm:$0x1] }
 0x2a1   : > { %5887 = vmatpush3.bf16.msra.mxu1 %v6321_v1  ;;  %v6326_v1 = vld [vmem:[%s7471_s6 + $0x160] sm:$0xff]   ;;  %v4018_v59 = vrot.slane %v4016_v47, 4 }
 0x2a2   : > { %5896 = vmatprep.subr.bf16.mxu1 %v6322_v24 }
 0x2a4   : > { %5889 = vmatmul.mubr.bf16.vlgmr.msra.gmra.mrb[0].mxu1 %v5169_v35  ;;  %v5186_v35 = vrot.slane %v3610_v14, 9 }
 0x2a5   : > { %5892 = vmatprep.mubr.bf16.mxu1 %v5170_v51  ;;  %5897 = vmatpush3.bf16.msra.mxu1 %v6322_v24  ;;  %v3638_v24 = vrot.slane %v7195_v45, 5  ;;  %v3985_v51 = vld [vmem:[#allocation2 + $0x10] sm:$0xf] }
 0x2a6   : > { %5898 = vmatprep.subr.bf16.mxu1 %v6323_v39  ;;  %v3655_v40 = vsel %vm7008_vm11, %v5186_v35, %v3654_v36  ;;  %v4002_v48 = vshrl.u32 %v3985_v51, 16  ;;  %v4005_v7 = vshll.u32 %v3985_v51, 16  ;;  %v4072_v35 = vshrl.u32 %v3995_v31, 16 }
 0x2a7   : > { %v3639_v20 = vsel %vm7008_vm11, %v5182_v23, %v3638_v24  ;;  %v6343_v23 = vld [vmem:[#allocation2 + $0x40] ss:$8 sps:$4 sm:$0xff]   ;;  %v4075_v36 = vshll.u32 %v3995_v31, 16 }
 0x2a8   : > { %v5205_v45 = vcombine.low %v3639_v20, %v3643_v27  ;;  %v4004_v55 = vrot.slane %v4002_v48, 4  ;;  %v4007_v56 = vrot.slane %v4005_v7, 5  ;;  %v3993_v27 = vld [vmem:[#allocation2 + $0x30] sm:$0xf]  ;;  %v4044_v20 = vshrl.u32 %v3991_v62, 16 }
 0x2a9   : > { %5899 = vmatpush3.bf16.msra.mxu1 %v6323_v39  ;;  %v3659_v39 = vsel %vm7008_vm11, %v5187_v33, %v3658_v34  ;;  %v4061_v14 = vshll.u32 %v3993_v27, 16  ;;  %v4033_v33 = vshll.u32 %v3989_v28, 16  ;;  %v6347_v34 = vld [vmem:[%s7471_s6 + $0x1e8] sm:$0xff]   ;;  %v4074_v48 = vrot.slane %v4072_v35, 4  ;;  %v4267_v35 = vld [vmem:[#allocation2 + $0x10] sm:$0xe] }
 0x2aa   : > { %5900 = vmatprep.subr.bf16.mxu1 %v6324_v0  ;;  %v5207_v41 = vcombine.low %v3655_v40, %v3659_v39  ;;  %v4046_v39 = vrot.slane %v4044_v20, 4  ;;  %v4077_v7 = vrot.slane %v4075_v36, 5 }
 0x2ac   : > { %5893 = vmatmul.mubr.bf16.gmra.mrb[4].mxu1 %v5171_v61  ;;  %v4021_v61 = vrot.slane %v4019_v50, 5  ;;  %v7361_v50 = vld [vmem:[#allocation2 + $0x34] sm:$0x1] }
 0x2ad   : > { %5901 = vmatpush3.bf16.msra.mxu1 %v6324_v0  ;;  %5912 = vmatprep.mubr.bf16.mxu1 %v5204_v37  ;;  %v6338_v0 = vld [vmem:[%s7471_s6 + $0x1b8] sm:$0xff]  }
 0x2ae   : > { %5902 = vmatprep.subr.bf16.mxu1 %v6325_v38  ;;  %v7333_v37 = vld [vmem:[#allocation2 + $0x1c] sm:$0x1]  ;;  %v4022_v8 = vor.u32 %v4021_v61, %v4018_v59 }
 0x2af   : > { %v4025_v12 = vshll.u32 %v7333_v37, 16 }
 0x2b0   : > { %v4023_v17 = vrot.slane %v4022_v8, 4  ;;  %v4078_v8 = vor.u32 %v4077_v7, %v4074_v48  ;;  %v6354_v48 = vld [vmem:[%s7471_s6 + $0x210] sm:$0xff]  }
 0x2b1   : > { %5903 = vmatpush3.bf16.msra.mxu1 %v6325_v38  ;;  %v4008_v38 = vor.u32 %v4007_v56, %v4004_v55  ;;  %v4027_v22 = vrot.slane %v4025_v12, 5 }
 0x2b2   : > { %5904 = vmatprep.subr.bf16.mxu1 %v6326_v1 }
 0x2b3   : > { %v4028_v24 = vsel %vm6538_vm2, %v4023_v17, %v4027_v22 }
 0x2b5   : > { %5905 = vmatpush3.bf16.msra.mxu1 %v6326_v1  ;;  %v6339_v1 = vld [vmem:[#allocation2 + $0x20] ss:$8 sps:$4 sm:$0xff]  }
 0x2b6   : > { %5906 = vmatprep.subr.bf16.mxu1 %v6327_v2 }
 0x2b9   : > { %5907 = vmatpush3.bf16.msra.mxu1 %v6327_v2  ;;  %v6342_v2 = vld [vmem:[%s7471_s6 + $0x1c8] sm:$0xff]  }
 0x2ba   : > { %5908 = vmatprep.subr.bf16.mxu1 %v6328_v6 }
 0x2bd   : > { %5909 = vmatpush3.bf16.msra.mxu1 %v6328_v6  ;;  %v4011_v6 = vshll.u32 %v7331_v63, 16 }
 0x2be   : > { %5910 = vmatprep.subr.bf16.mxu1 %v6329_v4 }
 0x2bf   : > { %v4013_v16 = vrot.slane %v4011_v6, 5  ;;  %v4067_v6 = vshll.u32 %v7361_v50, 16 }
 0x2c1   : > { %5911 = vmatpush3.bf16.msra.mxu1 %v6329_v4  ;;  %v4009_v4 = vrot.slane %v4008_v38, 4  ;;  %v4053_v38 = vshll.u32 %v7359_v44, 16 }
 0x2c2   : > { %5920 = vmatprep.subr.bf16.mxu1 %v6330_v25 }
 0x2c3   : > { %v4014_v18 = vsel %vm6538_vm2, %v4009_v4, %v4013_v16 }
 0x2c4   : > { %5913 = vmatmul.mubr.bf16.vlgmr.msra.gmra.mrb[0].mxu1 %v5205_v45  ;;  %v5260_v26 = vcombine.low %v4014_v18, %v4028_v24  ;;  %v4047_v45 = vshll.u32 %v3991_v62, 16  ;;  %v4055_v24 = vrot.slane %v4053_v38, 5  ;;  %v4069_v62 = vrot.slane %v4067_v6, 5  ;;  %v6360_v38 = vld [vmem:[%s7471_s6 + $0x228] sm:$0xff]  }
 0x2c5   : > { %5916 = vmatprep.mubr.bf16.mxu1 %v5206_v30  ;;  %5921 = vmatpush3.bf16.msra.mxu1 %v6330_v25  ;;  %v6345_v25 = vld [vmem:[%s7471_s6 + $0x1d8] sm:$0xff]   ;;  %v4030_v30 = vshrl.u32 %v3989_v28, 16  ;;  %v4270_v6 = vld [vmem:[#allocation2 + $0x28] sm:$0xe] }
 0x2c6   : > { %5922 = vmatprep.subr.bf16.mxu1 %v6331_v58  ;;  %v4049_v40 = vrot.slane %v4047_v45, 5 }
 0x2c8   : > { %v4050_v47 = vor.u32 %v4049_v40, %v4046_v39  ;;  %v6352_v39 = vld [vmem:[%s7471_s6 + $0x208] sm:$0xff]  }
 0x2c9   : > { %5923 = vmatpush3.bf16.msra.mxu1 %v6331_v58  ;;  %v4058_v58 = vshrl.u32 %v3993_v27, 16  ;;  %v4079_v27 = vrot.slane %v4078_v8, 4  ;;  %v4271_v8 = vld [vmem:[#allocation2 + $0x30] sm:$0xe] }
 0x2ca   : > { %5924 = vmatprep.subr.bf16.mxu1 %v6332_v11 }
 0x2cc   : > { %5917 = vmatmul.mubr.bf16.gmra.mrb[4].mxu1 %v5207_v41  ;;  %v4060_v41 = vrot.slane %v4058_v58, 4 }
 0x2cd   : > { %5925 = vmatpush3.bf16.msra.mxu1 %v6332_v11  ;;  %5936 = vmatprep.mubr.bf16.mxu1 %v6333_v60  ;;  %v3999_v11 = vld [vmem:[#allocation2 + $0x48] sm:$0xf]  ;;  %v3997_v60 = vld [vmem:[#allocation2 + $0x40] sm:$0xf] }
 0x2ce   : > { %5926 = vmatprep.subr.bf16.mxu1 %v6334_v54  ;;  %v4100_v51 = vshrl.u32 %v3999_v11, 16  ;;  %v4086_v55 = vshrl.u32 %v3997_v60, 16  ;;  %v4089_v56 = vshll.u32 %v3997_v60, 16 }
 0x2d0   : > { %v4088_v16 = vrot.slane %v4086_v55, 4  ;;  %v4091_v17 = vrot.slane %v4089_v56, 5 }
 0x2d1   : > { %5927 = vmatpush3.bf16.msra.mxu1 %v6334_v54  ;;  %v4063_v54 = vrot.slane %v4061_v14, 5 }
 0x2d2   : > { %5928 = vmatprep.subr.bf16.mxu1 %v6335_v29  ;;  %v4092_v31 = vor.u32 %v4091_v17, %v4088_v16  ;;  %v4272_v16 = vld [vmem:[#allocation2 + $0x38] sm:$0xe]  ;;  %v5276_v17 = vrot.slane %v4271_v8, 9 }
 0x2d3   : > { %v4064_v59 = vor.u32 %v4063_v54, %v4060_v41 }
 0x2d4   : > { %v4093_v41 = vrot.slane %v4092_v31, 4 }
 0x2d5   : > { %5929 = vmatpush3.bf16.msra.mxu1 %v6335_v29  ;;  %v4032_v29 = vrot.slane %v4030_v30, 4  ;;  %v4065_v18 = vrot.slane %v4064_v59, 4 }
 0x2d6   : > { %5930 = vmatprep.subr.bf16.mxu1 %v6336_v42 }
 0x2d7   : > { %v4070_v14 = vsel %vm6538_vm2, %v4065_v18, %v4069_v62  ;;  %v4309_v18 = vrot.slane %v7361_v50, 5 }
 0x2d9   : > { %5931 = vmatpush3.bf16.msra.mxu1 %v6336_v42  ;;  %v4035_v42 = vrot.slane %v4033_v33, 5 }
 0x2da   : > { %5932 = vmatprep.subr.bf16.mxu1 %v6337_v21 }
 0x2db   : > { %v4036_v61 = vor.u32 %v4035_v42, %v4032_v29  ;;  %v4268_v29 = vld [vmem:[#allocation2 + $0x18] sm:$0xe]  ;;  %v5272_v42 = vrot.slane %v4267_v35, 9 }
 0x2dc   : > { %v5273_v7 = vrot.slane %v4268_v29, 9 }
 0x2dd   : > { %5933 = vmatpush3.bf16.msra.mxu1 %v6337_v21  ;;  %v6348_v21 = vld [vmem:[%s7471_s6 + $0x1f0] sm:$0xff]  }
 0x2de   : > { %5934 = vmatprep.subr.bf16.mxu1 %v6338_v0 }
 0x2e1   : > { %5935 = vmatpush3.bf16.msra.mxu1 %v6338_v0  ;;  %v4103_v0 = vshll.u32 %v3999_v11, 16 }
 0x2e2   : > { %5944 = vmatprep.subr.bf16.mxu1 %v6340_v57 }
 0x2e3   : > { %v4105_v4 = vrot.slane %v4103_v0, 5  ;;  %v4297_v0 = vrot.slane %v7333_v37, 5 }
 0x2e4   : > { %5937 = vmatmul.mubr.bf16.vlgmr.msra.gmra.mrb[0].mxu1 %v6339_v1  ;;  %v7366_v1 = vld [vmem:[#allocation2 + $0x3c] sm:$0x1] }
 0x2e5   : > { %5940 = vmatprep.mubr.bf16.mxu1 %v6341_v10  ;;  %5945 = vmatpush3.bf16.msra.mxu1 %v6340_v57  ;;  %v7363_v57 = vld [vmem:[#allocation2 + $0x24] sm:$0x1]  ;;  %v4102_v10 = vrot.slane %v4100_v51, 4  ;;  %v4081_v22 = vshll.u32 %v7366_v1, 16  ;;  %v4293_v51 = vrot.slane %v7331_v63, 5  ;;  %v4298_v59 = vsel %vm7008_vm11, %v5273_v7, %v4297_v0 }
 0x2e6   : > { %5946 = vmatprep.subr.bf16.mxu1 %v6342_v2  ;;  %v4039_v12 = vshll.u32 %v7363_v57, 16 }
 0x2e7   : > { %v4106_v28 = vor.u32 %v4105_v4, %v4102_v10  ;;  %v4083_v30 = vrot.slane %v4081_v22, 5  ;;  %v4294_v63 = vsel %vm7008_vm11, %v5272_v42, %v4293_v51  ;;  %v6364_v10 = vld [vmem:[%s7471_s6 + $0x238] sm:$0xff]   ;;  %v4269_v4 = vld [vmem:[#allocation2 + $0x20] sm:$0xe] }
 0x2e8   : > { %v4041_v20 = vrot.slane %v4039_v12, 5  ;;  %v5296_v37 = vcombine.low %v4294_v63, %v4298_v59  ;;  %v5275_v12 = vrot.slane %v4270_v6, 9  ;;  %v5274_v22 = vrot.slane %v4269_v4, 9 }
 0x2e9   : > { %5947 = vmatpush3.bf16.msra.mxu1 %v6342_v2  ;;  %v6349_v2 = vld [vmem:[%s7471_s6 + $0x1f8] sm:$0xff]   ;;  %v4084_v11 = vsel %vm6538_vm2, %v4079_v27, %v4083_v30  ;;  %v4107_v54 = vrot.slane %v4106_v28, 4  ;;  %v4274_v27 = vld [vmem:[#allocation2 + $0x48] sm:$0xe]  ;;  %v4310_v28 = vsel %vm7008_vm11, %v5276_v17, %v4309_v18 }
 0x2ea   : > { %5948 = vmatprep.subr.bf16.mxu1 %v6344_v13  ;;  %v5262_v40 = vcombine.low %v4070_v14, %v4084_v11 }
 0x2ec   : > { %5941 = vmatmul.mubr.bf16.gmra.mrb[4].mxu1 %v6343_v23  ;;  %v4037_v23 = vrot.slane %v4036_v61, 4  ;;  %v6356_v61 = vld [vmem:[%s7471_s6 + $0x218] sm:$0xff]  }
 0x2ed   : > { %5949 = vmatpush3.bf16.msra.mxu1 %v6344_v13  ;;  %5960 = vmatprep.mubr.bf16.mxu1 %v5260_v26  ;;  %v4051_v13 = vrot.slane %v4050_v47, 4  ;;  %v6350_v26 = vld [vmem:[%s7471_s6 + $0x200] sm:$0xff]  }
 0x2ee   : > { %5950 = vmatprep.subr.bf16.mxu1 %v6345_v25  ;;  %v4042_v33 = vsel %vm6538_vm2, %v4037_v23, %v4041_v20  ;;  %v4301_v23 = vrot.slane %v7363_v57, 5 }
 0x2ef   : > { %v4056_v45 = vsel %vm6538_vm2, %v4051_v13, %v4055_v24  ;;  %v4305_v13 = vrot.slane %v7359_v44, 5  ;;  %v5277_v24 = vrot.slane %v4272_v16, 9  ;;  %v4273_v44 = vld [vmem:[#allocation2 + $0x40] sm:$0xe] }
 0x2f0   : > { %v5261_v36 = vcombine.low %v4042_v33, %v4056_v45  ;;  %v4302_v50 = vsel %vm7008_vm11, %v5274_v22, %v4301_v23  ;;  %v5278_v31 = vrot.slane %v4273_v44, 9 }
 0x2f1   : > { %5951 = vmatpush3.bf16.msra.mxu1 %v6345_v25  ;;  %v7374_v25 = vld [vmem:[#allocation2 + $0x4c] sm:$0x1]  ;;  %v4306_v62 = vsel %vm7008_vm11, %v5275_v12, %v4305_v13 }
 0x2f2   : > { %5952 = vmatprep.subr.bf16.mxu1 %v6346_v3  ;;  %v4109_v58 = vshll.u32 %v7374_v25, 16  ;;  %v5297_v20 = vcombine.low %v4302_v50, %v4306_v62  ;;  %v4321_v14 = vrot.slane %v7374_v25, 5 }
 0x2f4   : > { %v4111_v60 = vrot.slane %v4109_v58, 5 }
 0x2f5   : > { %5953 = vmatpush3.bf16.msra.mxu1 %v6346_v3  ;;  %v7379_v3 = vld [vmem:[#allocation2 + $0x44] sm:$0x1] }
 0x2f6   : > { %5954 = vmatprep.subr.bf16.mxu1 %v6347_v34  ;;  %v4112_v55 = vsel %vm6538_vm2, %v4107_v54, %v4111_v60  ;;  %v4317_v58 = vrot.slane %v7379_v3, 5 }
 0x2f8   : > { %v4318_v30 = vsel %vm7008_vm11, %v5278_v31, %v4317_v58 }
 0x2f9   : > { %5955 = vmatpush3.bf16.msra.mxu1 %v6347_v34  ;;  %v4095_v34 = vshll.u32 %v7379_v3, 16 }
 0x2fa   : > { %5956 = vmatprep.subr.bf16.mxu1 %v6348_v21 }
 0x2fd   : > { %5957 = vmatpush3.bf16.msra.mxu1 %v6348_v21  ;;  %v4097_v21 = vrot.slane %v4095_v34, 5  ;;  %v6368_v34 = vld [vmem:[%s7254_s16 + $0x10] sm:$0xff]  }
 0x2fe   : > { %5958 = vmatprep.subr.bf16.mxu1 %v6349_v2 }
 0x2ff   : > { %v4098_v47 = vsel %vm6538_vm2, %v4093_v41, %v4097_v21 }
 0x300   : > { %v5263_v56 = vcombine.low %v4098_v47, %v4112_v55 }
 0x301   : > { %5959 = vmatpush3.bf16.msra.mxu1 %v6349_v2  ;;  %v6362_v2 = vld [vmem:[%s7471_s6 + $0x230] sm:$0xff]  }
 0x302   : > { %5968 = vmatprep.subr.bf16.mxu1 %v6350_v26 }
 0x304   : > { %5961 = vmatmul.mubr.bf16.vlgmr.msra.gmra.mrb[0].mxu1 %v5261_v36 }
 0x305   : > { %5964 = vmatprep.mubr.bf16.mxu1 %v5262_v40  ;;  %5969 = vmatpush3.bf16.msra.mxu1 %v6350_v26  ;;  %v4313_v26 = vrot.slane %v7366_v1, 5  ;;  %v5279_v1 = vrot.slane %v4274_v27, 9 }
 0x306   : > { %5970 = vmatprep.subr.bf16.mxu1 %v6352_v39 }
 0x307   : > { %v4314_v57 = vsel %vm7008_vm11, %v5277_v24, %v4313_v26  ;;  %v4322_v33 = vsel %vm7008_vm11, %v5279_v1, %v4321_v14 }
 0x308   : > { %v5298_v45 = vcombine.low %v4310_v28, %v4314_v57  ;;  %v5299_v35 = vcombine.low %v4318_v30, %v4322_v33 }
 0x309   : > { %5971 = vmatpush3.bf16.msra.mxu1 %v6352_v39 }
 0x30a   : > { %5972 = vmatprep.subr.bf16.mxu1 %v6354_v48 }
 0x30c   : > { %5965 = vmatmul.mubr.bf16.gmra.mrb[4].mxu1 %v5263_v56 }
 0x30d   : > { %5973 = vmatpush3.bf16.msra.mxu1 %v6354_v48  ;;  %5984 = vmatprep.mubr.bf16.mxu1 %v5296_v37 }
 0x30e   : > { %5974 = vmatprep.subr.bf16.mxu1 %v6356_v61 }
 0x311   : > { %5975 = vmatpush3.bf16.msra.mxu1 %v6356_v61 }
 0x312   : > { %5976 = vmatprep.subr.bf16.mxu1 %v6358_v46 }
 0x315   : > { %5977 = vmatpush3.bf16.msra.mxu1 %v6358_v46 }
 0x316   : > { %5978 = vmatprep.subr.bf16.mxu1 %v6360_v38 }
 0x319   : > { %5979 = vmatpush3.bf16.msra.mxu1 %v6360_v38 }
 0x31a   : > { %5980 = vmatprep.subr.bf16.mxu1 %v6362_v2 }
 0x31d   : > { %5981 = vmatpush3.bf16.msra.mxu1 %v6362_v2 }
 0x31e   : > { %5982 = vmatprep.subr.bf16.mxu1 %v6364_v10 }
 0x321   : > { %5983 = vmatpush3.bf16.msra.mxu1 %v6364_v10 }
 0x322   : > { %6016 = vmatprep.subr.bf16.mxu1 %v7143_v52 }
 0x324   : > { %5985 = vmatmul.mubr.bf16.vlgmr.msra.gmra.mrb[0].mxu1 %v5297_v20 }
 0x325   : > { %5988 = vmatprep.mubr.bf16.mxu1 %v5298_v45  ;;  %6024 = vmatpush3.bf16.msra.mxu1 %v7143_v52 }
 0x326   : > { %6017 = vmatprep.subr.bf16.mxu1 %v7152_v15 }
 0x329   : > { %6025 = vmatpush3.bf16.msra.mxu1 %v7152_v15 }
 0x32a   : > { %6018 = vmatprep.subr.bf16.mxu1 %v7167_v19 }
 0x32c   : > { %5989 = vmatmul.mubr.bf16.gmra.mrb[4].mxu1 %v5299_v35 }
 0x32d   : > { %6026 = vmatpush3.bf16.msra.mxu1 %v7167_v19  ;;  %6012 = vmatprep.mubr.bf16.mxu1 %v6368_v34 }
 0x32e   : > { %6019 = vmatprep.subr.bf16.mxu1 %v7176_v49 }
 0x331   : > { %6027 = vmatpush3.bf16.msra.mxu1 %v7176_v49 }
 0x332   : > { %6020 = vmatprep.subr.bf16.mxu1 %v7186_v5 }
 0x335   : > { %6028 = vmatpush3.bf16.msra.mxu1 %v7186_v5 }
 0x336   : > { %6021 = vmatprep.subr.bf16.mxu1 %v7200_v53 }
 0x339   : > { %6029 = vmatpush3.bf16.msra.mxu1 %v7200_v53 }
 0x33a   : > { %6022 = vmatprep.subr.bf16.mxu1 %v7217_v9 }
 0x33d   : > { %6030 = vmatpush3.bf16.msra.mxu1 %v7217_v9 }
 0x33e   : > { %6023 = vmatprep.subr.bf16.mxu1 %v7235_v32 }
 0x341   : > { %6031 = vmatpush3.bf16.msra.mxu1 %v7235_v32 }
 0x344   : > { %6013 = vmatmul.mubr.bf16.vlgmr.msra.gmra.mrb[4].mxu1 %v6369_v43 }
 0x372   : > { %v6010_v52 = vpop.f32.mrb[8].mxu0 }
 0x373   : > { %v4607_v15 = vpop.f32.mrb[9].mxu0 }
 0x374   : > { %v6011_v19 = vpop.f32.mrb[10].mxu0 }
 0x375   : > { %v4610_v49 = vpop.f32.mrb[11].mxu0 }
 0x3f7   : > { %v5986_v5 = vpop.f32.mrb[0].mxu1 }
 0x3f8   : > { %v6032_v53 = vadd.f32 %v6010_v52, %v5986_v5  ;;  %v4438_v25 = vpop.f32.mrb[1].mxu1 }
 0x3f9   : > { %v6033_v3 = vadd.f32 %v4607_v15, %v4438_v25  ;;  %v5987_v9 = vpop.f32.mrb[2].mxu1 }
 0x3fa   : > { %4648 = vst [vmem:[%s439_s12 + $0x10] sm:$0xff] %v6032_v53  ;;  %v6034_v36 = vadd.f32 %v6011_v19, %v5987_v9  ;;  %v4441_v11 = vpop.f32.mrb[3].mxu1 }
 0x3fb   : > { %4646 = vst [vmem:[%s439_s12] sm:$0xff] %v6033_v3  ;;  %v6035_v32 = vadd.f32 %v4610_v49, %v4441_v11 }
 0x3fc   : > { %4649 = vst [vmem:[%s439_s12 + $0x18] sm:$0xff] %v6034_v36 }
 0x3fd   : > { %4647 = vst [vmem:[%s439_s12 + $0x8] sm:$0xff] %v6035_v32 }
 0x417   : > { %v6014_v39 = vpop.f32.mrb[4].mxu1 }
 0x418   : > { %4652 = vst [vmem:[%s439_s12 + $0x30] sm:$0xff] %v6014_v39  ;;  %v4623_v40 = vpop.f32.mrb[5].mxu1 }
 0x419   : > { %4650 = vst [vmem:[%s439_s12 + $0x20] sm:$0xff] %v4623_v40  ;;  %v6015_v41 = vpop.f32.mrb[6].mxu1 }
 0x41a   : > { %4653 = vst [vmem:[%s439_s12 + $0x38] sm:$0xff] %v6015_v41  ;;  %v4626_v54 = vpop.f32.mrb[7].mxu1 }
 0x41b   : > { %4651 = vst [vmem:[%s439_s12 + $0x28] sm:$0xff] %v4626_v54 }
 0x41c PF: > { %s20_s13 = sadd.s32 1, %s6376_s13  }
 0x41d   : > { %p17_p4 = scmp.ge.s32.totalorder %s20_s13, 4  }
 0x41f   :  { %19 = sbr.rel (!%p17_p4) target bundleno = 1 (0x1), region = 122 }

</bundles_post_ra>
